<compile_context>
chip_gen: v7x
topology: tpu7x:2x2x1
jax: 0.10.0
libtpu: 0.0.40
codegen_flags: <defaults>
</compile_context>

<pallas_src>
import functools

import jax
import jax.numpy as jnp
from jax.experimental import pallas as pl
from jax.experimental.pallas import tpu as pltpu

C = 256            # channel count fixed by the module (nn.Conv2d(256, 256, ...))
PADL = 16          # interior column offset in padded scratch (bf16 tile = 16 sublanes)
ACC_ROW_CAP = 2048 # max rows per conv2 matmul chunk (f32 accumulator <= 2 MiB)


# ---------------------------------------------------------------------------
# Fused kernel: conv1(1x1)+ReLU -> conv2(3x3,pad1)+ReLU -> conv3(1x1)
# ---------------------------------------------------------------------------
def _embednet_kernel(x_ref, w1_ref, b1_ref, w2_ref, b2_ref, w3_ref, b3_ref,
                     o_ref, pad_ref, acc_ref, y2_ref, *, H, W, rc):
    W_pad = W + 2 * PADL
    b1v = b1_ref[...]
    b2v = b2_ref[...]
    b3v = b3_ref[...]

    # ---- zero only the halo ring of the padded scratch (not the whole scratch)
    zrow = jnp.zeros((1, W_pad, C), jnp.bfloat16)
    pad_ref[0:1, :, :] = zrow
    pad_ref[H + 1:H + 2, :, :] = zrow
    zcol = jnp.zeros((H, 1, C), jnp.bfloat16)
    pad_ref[1:H + 1, PADL - 1:PADL, :] = zcol
    pad_ref[1:H + 1, PADL + W:PADL + W + 1, :] = zcol

    # ---- conv1: 1x1 + ReLU, one M=H*W matmul; bf16 result stored 16-aligned
    x2d = x_ref[0].reshape(H * W, C)                                 # bf16
    y1 = jnp.dot(x2d, w1_ref[...], preferred_element_type=jnp.float32)
    y1 = jnp.maximum(y1 + b1v, 0.0)                                  # f32 bias/ReLU
    pad_ref[1:H + 1, PADL:PADL + W, :] = y1.astype(jnp.bfloat16).reshape(H, W, C)

    # ---- conv2 (3x3, pad 1) + ReLU, chunked over rc output rows (rc*W <= 2048)
    n_chunks = H // rc
    for hc in range(n_chunks):
        r0 = hc * rc
        first = True
        for dx in range(3):
            # One sublane-shifted slab per dx (3 relayouts/chunk, not 9); dy is a
            # cheap slice of the slab's major axis.
            slab = pad_ref[r0:r0 + rc + 2, PADL - 1 + dx:PADL - 1 + dx + W, :]
            for dy in range(3):
                taps = slab[dy:dy + rc].reshape(rc * W, C)
                d = jnp.dot(taps, w2_ref[dy, dx],
                            preferred_element_type=jnp.float32)
                if first:
                    acc_ref[...] = d
                    first = False
                else:
                    acc_ref[...] += d
        y2 = jnp.maximum(acc_ref[...] + b2v, 0.0).astype(jnp.bfloat16)
        y2_ref[r0 * W:(r0 + rc) * W, :] = y2

    # ---- conv3 (1x1): single M=H*W matmul over the whole image ------------
    y3 = jnp.dot(y2_ref[...], w3_ref[...], preferred_element_type=jnp.float32)
    o_ref[0] = (y3 + b3v).reshape(H, W, C).astype(o_ref.dtype)


# ---------------------------------------------------------------------------
# Wrapper: NCHW <-> NHWC plumbing + bf16 casts happen outside the kernel
# ---------------------------------------------------------------------------
def embednet_forward(x_nchw, params):
    N, cin, H, W = x_nchw.shape
    assert cin == C
    assert W % 8 == 0, "W must be a multiple of 8 (16 preferred for bf16 tiles)"

    # Largest divisor of H such that rc*W <= ACC_ROW_CAP rows per conv2 matmul.
    max_rows = max(1, ACC_ROW_CAP // W)
    rc = 1
    for d in range(1, H + 1):
        if H % d == 0 and d <= max_rows:
            rc = d

    x = jnp.transpose(x_nchw, (0, 2, 3, 1)).astype(jnp.bfloat16)     # NCHW->NHWC
    w1 = params["w1"].astype(jnp.bfloat16)
    w2 = params["w2"].astype(jnp.bfloat16)
    w3 = params["w3"].astype(jnp.bfloat16)
    b1, b2, b3 = params["b1"], params["b2"], params["b3"]

    # VMEM budget derived from the actual block / scratch sizes (+25% headroom).
    W_pad = W + 2 * PADL
    vmem_needed = (
        2 * H * W * C * 2                       # input block (bf16, double-buffered)
        + 2 * H * W * C * 4                     # output block (f32, double-buffered)
        + 2 * (w1.size + w2.size + w3.size) * 2 # bf16 weights (double-buffered)
        + 2 * (b1.size + b2.size + b3.size) * 4 # f32 biases
        + (H + 2) * W_pad * C * 2               # padded conv1 scratch (bf16)
        + rc * W * C * 4                        # conv2 f32 accumulator
        + H * W * C * 2)                        # y2 scratch (bf16)
    vmem_limit = int(min(max(vmem_needed * 5 // 4, 16 * 1024 * 1024),
                         100 * 1024 * 1024))

    flops = 2 * N * H * W * C * C * (1 + 9 + 1)
    bytes_accessed = (x.size * 2 + N * H * W * C * 4
                      + (w1.size + w2.size + w3.size) * 2
                      + (b1.size + b2.size + b3.size) * 4)

    out = pl.pallas_call(
        functools.partial(_embednet_kernel, H=H, W=W, rc=rc),
        out_shape=jax.ShapeDtypeStruct((N, H, W, C), jnp.float32),
        grid_spec=pltpu.PrefetchScalarGridSpec(
            num_scalar_prefetch=0,
            grid=(N,),
            in_specs=[
                pl.BlockSpec((1, H, W, C), lambda n: (n, 0, 0, 0)),   # x
                pl.BlockSpec((C, C), lambda n: (0, 0)),               # w1
                pl.BlockSpec((1, C), lambda n: (0, 0)),               # b1
                pl.BlockSpec((3, 3, C, C), lambda n: (0, 0, 0, 0)),   # w2
                pl.BlockSpec((1, C), lambda n: (0, 0)),               # b2
                pl.BlockSpec((C, C), lambda n: (0, 0)),               # w3
                pl.BlockSpec((1, C), lambda n: (0, 0)),               # b3
            ],
            out_specs=pl.BlockSpec((1, H, W, C), lambda n: (n, 0, 0, 0)),
            scratch_shapes=[
                pltpu.VMEM((H + 2, W_pad, C), jnp.bfloat16),   # padded conv1 out
                pltpu.VMEM((rc * W, C), jnp.float32),          # conv2 accumulator
                pltpu.VMEM((H * W, C), jnp.bfloat16),          # relu(conv2) for conv3
            ],
        ),
        compiler_params=pltpu.CompilerParams(
            dimension_semantics=("parallel",),   # N>=2 -> both v7x TCs get work
            vmem_limit_bytes=vmem_limit,
        ),
        cost_estimate=pl.CostEstimate(flops=flops, transcendentals=0,
                                      bytes_accessed=bytes_accessed),
    )(x, w1, b1, w2, b2, w3, b3)

    return jnp.transpose(out, (0, 3, 1, 2)).astype(x_nchw.dtype)      # NHWC->NCHW


# ---------------------------------------------------------------------------
# Params (match PyTorch init: kaiming_uniform_(a=1), zero biases)
# ---------------------------------------------------------------------------
def init_params(key):
    k1, k2, k3 = jax.random.split(key, 3)

    def kaiming_uniform(k, shape, fan_in):
        bound = (3.0 / fan_in) ** 0.5
        return jax.random.uniform(k, shape, jnp.float32, -bound, bound)

    # PyTorch layout (Cout, Cin, kh, kw) -> matmul-friendly layouts.
    w1 = kaiming_uniform(k1, (C, C, 1, 1), C * 1 * 1)
    w2 = kaiming_uniform(k2, (C, C, 3, 3), C * 3 * 3)
    w3 = kaiming_uniform(k3, (C, C, 1, 1), C * 1 * 1)
    return {
        "w1": jnp.transpose(w1[:, :, 0, 0], (1, 0)),          # (Cin, Cout)
        "w2": jnp.transpose(w2, (2, 3, 1, 0)),                 # (kh, kw, Cin, Cout)
        "w3": jnp.transpose(w3[:, :, 0, 0], (1, 0)),
        "b1": jnp.zeros((1, C), jnp.float32),
        "b2": jnp.zeros((1, C), jnp.float32),
        "b3": jnp.zeros((1, C), jnp.float32),
    }


# Pure-JAX reference (XLA convs, f32 HIGHEST precision) for a sanity check.
def ref_forward(x_nchw, params):
    x = jnp.transpose(x_nchw, (0, 2, 3, 1))

    def conv(x, w, b, pad):
        y = jax.lax.conv_general_dilated(
            x, w, (1, 1), pad,
            dimension_numbers=("NHWC", "HWIO", "NHWC"),
            precision=jax.lax.Precision.HIGHEST)
        return y + b.reshape(1, 1, 1, -1)

    y = jax.nn.relu(conv(x, params["w1"].reshape(1, 1, C, C),
                         params["b1"], "VALID"))
    y = jax.nn.relu(conv(y, params["w2"], params["b2"], "SAME"))
    y = conv(y, params["w3"].reshape(1, 1, C, C), params["b3"], "VALID")
    return jnp.transpose(y, (0, 3, 1, 2))


if __name__ == "__main__":
    key = jax.random.PRNGKey(0)
    k_param, k_x = jax.random.split(key)

    params = init_params(k_param)
    # Channels are fixed at 256 by the module; small spatial size for the test.
    x = jax.random.normal(k_x, (2, C, 16, 16), jnp.float32)

    out = jax.block_until_ready(jax.jit(embednet_forward)(x, params))
    ref = jax.block_until_ready(ref_forward(x, params))

    assert out.shape == ref.shape == (2, C, 16, 16)
    # bf16 MXU operands (f32 accumulation) vs f32 HIGHEST-precision reference.
    err = float(jnp.max(jnp.abs(out - ref)))
    assert jnp.allclose(out, ref, atol=3e-2, rtol=2e-2), f"max abs err={err}"

    print("KERNEL_OK")
</pallas_src>

<mosaic_0001>
module attributes {stable_mosaic.version = 11 : i64} {
  func.func @_embednet_kernel(%arg0: i32, %arg1: memref<1x16x16x256xbf16, #tpu.memory_space<vmem>>, %arg2: memref<256x256xbf16, #tpu.memory_space<vmem>>, %arg3: memref<1x256xf32, #tpu.memory_space<vmem>>, %arg4: memref<3x3x256x256xbf16, #tpu.memory_space<vmem>>, %arg5: memref<1x256xf32, #tpu.memory_space<vmem>>, %arg6: memref<256x256xbf16, #tpu.memory_space<vmem>>, %arg7: memref<1x256xf32, #tpu.memory_space<vmem>>, %arg8: memref<1x16x16x256xf32, #tpu.memory_space<vmem>>, %arg9: memref<18x48x256xbf16, #tpu.memory_space<vmem>>, %arg10: memref<256x256xf32, #tpu.memory_space<vmem>>, %arg11: memref<256x256xbf16, #tpu.memory_space<vmem>>) attributes {dimension_semantics = [#tpu.dimension_semantics<parallel>], iteration_bounds = array<i64: 2>, scalar_prefetch = 0 : i64, scratch_operands = 3 : i64, tpu.core_type = #tpu.core_type<tc>, window_params = [{transform_indices = @transform_0, window_bounds = array<i64: 1, 16, 16, 256>}, {pipeline_mode = #tpu.pipeline_mode<synchronous>, transform_indices = @transform_1, window_bounds = array<i64: 256, 256>}, {pipeline_mode = #tpu.pipeline_mode<synchronous>, transform_indices = @transform_2, window_bounds = array<i64: 1, 256>}, {pipeline_mode = #tpu.pipeline_mode<synchronous>, transform_indices = @transform_3, window_bounds = array<i64: 3, 3, 256, 256>}, {pipeline_mode = #tpu.pipeline_mode<synchronous>, transform_indices = @transform_4, window_bounds = array<i64: 1, 256>}, {pipeline_mode = #tpu.pipeline_mode<synchronous>, transform_indices = @transform_5, window_bounds = array<i64: 256, 256>}, {pipeline_mode = #tpu.pipeline_mode<synchronous>, transform_indices = @transform_6, window_bounds = array<i64: 1, 256>}, {transform_indices = @transform_7, window_bounds = array<i64: 1, 16, 16, 256>}]} {
    %c0 = arith.constant 0 : index
    %c0_0 = arith.constant 0 : index
    %0 = vector.load %arg3[%c0, %c0_0] : memref<1x256xf32, #tpu.memory_space<vmem>>, vector<1x256xf32>
    %c0_1 = arith.constant 0 : index
    %c0_2 = arith.constant 0 : index
    %1 = vector.load %arg5[%c0_1, %c0_2] : memref<1x256xf32, #tpu.memory_space<vmem>>, vector<1x256xf32>
    %c0_3 = arith.constant 0 : index
    %c0_4 = arith.constant 0 : index
    %2 = vector.load %arg7[%c0_3, %c0_4] : memref<1x256xf32, #tpu.memory_space<vmem>>, vector<1x256xf32>
    %cst = arith.constant 0.000000e+00 : bf16
    %3 = vector.broadcast %cst : bf16 to vector<1x48x256xbf16>
    %c0_5 = arith.constant 0 : index
    %c0_6 = arith.constant 0 : index
    %c0_7 = arith.constant 0 : index
    %4 = vector.load %arg9[%c0_5, %c0_6, %c0_7] : memref<18x48x256xbf16, #tpu.memory_space<vmem>>, vector<1x48x256xbf16>
    tpu.vector_store %arg9[%c0_5, %c0_6, %c0_7], %3 {strides = array<i32>} : memref<18x48x256xbf16, #tpu.memory_space<vmem>>, vector<1x48x256xbf16>,
    %c17 = arith.constant 17 : index
    %c0_8 = arith.constant 0 : index
    %c0_9 = arith.constant 0 : index
    %5 = vector.load %arg9[%c17, %c0_8, %c0_9] : memref<18x48x256xbf16, #tpu.memory_space<vmem>>, vector<1x48x256xbf16>
    tpu.vector_store %arg9[%c17, %c0_8, %c0_9], %3 {strides = array<i32>} : memref<18x48x256xbf16, #tpu.memory_space<vmem>>, vector<1x48x256xbf16>,
    %cst_10 = arith.constant 0.000000e+00 : bf16
    %6 = vector.broadcast %cst_10 : bf16 to vector<16x1x256xbf16>
    %c1 = arith.constant 1 : index
    %c15 = arith.constant 15 : index
    %c0_11 = arith.constant 0 : index
    %7 = vector.load %arg9[%c1, %c15, %c0_11] : memref<18x48x256xbf16, #tpu.memory_space<vmem>>, vector<16x1x256xbf16>
    tpu.vector_store %arg9[%c1, %c15, %c0_11], %6 {strides = array<i32>} : memref<18x48x256xbf16, #tpu.memory_space<vmem>>, vector<16x1x256xbf16>,
    %c1_12 = arith.constant 1 : index
    %c32 = arith.constant 32 : index
    %c0_13 = arith.constant 0 : index
    %8 = vector.load %arg9[%c1_12, %c32, %c0_13] : memref<18x48x256xbf16, #tpu.memory_space<vmem>>, vector<16x1x256xbf16>
    tpu.vector_store %arg9[%c1_12, %c32, %c0_13], %6 {strides = array<i32>} : memref<18x48x256xbf16, #tpu.memory_space<vmem>>, vector<16x1x256xbf16>,
    %c0_14 = arith.constant 0 : index
    %c0_15 = arith.constant 0 : index
    %c0_16 = arith.constant 0 : index
    %c0_17 = arith.constant 0 : index
    %9 = vector.load %arg1[%c0_14, %c0_15, %c0_16, %c0_17] : memref<1x16x16x256xbf16, #tpu.memory_space<vmem>>, vector<1x16x16x256xbf16>
    %10 = vector.shape_cast %9 : vector<1x16x16x256xbf16> to vector<16x16x256xbf16>
    %11 = vector.shape_cast %10 : vector<16x16x256xbf16> to vector<256x256xbf16>
    %c0_18 = arith.constant 0 : index
    %c0_19 = arith.constant 0 : index
    %12 = vector.load %arg2[%c0_18, %c0_19] : memref<256x256xbf16, #tpu.memory_space<vmem>>, vector<256x256xbf16>
    %cst_20 = arith.constant dense<0.000000e+00> : vector<256x256xf32>
    %13 = tpu.matmul %11, %12, %cst_20 {dimension_numbers = #tpu.dot_dimension_numbers<[1], [0], [0], [1], [0, 0, 1, 1], [], []>} : vector<256x256xbf16>, vector<256x256xbf16>, vector<256x256xf32> -> vector<256x256xf32>
    %14 = vector.broadcast %0 : vector<1x256xf32> to vector<256x256xf32>
    %15 = arith.addf %13, %14 : vector<256x256xf32>
    %cst_21 = arith.constant 0.000000e+00 : f32
    %16 = vector.broadcast %cst_21 : f32 to vector<256x256xf32>
    %17 = arith.maximumf %15, %16 : vector<256x256xf32>
    %18 = arith.truncf %17 : vector<256x256xf32> to vector<256x256xbf16>
    %19 = vector.shape_cast %18 : vector<256x256xbf16> to vector<16x16x256xbf16>
    %c1_22 = arith.constant 1 : index
    %c16 = arith.constant 16 : index
    %c0_23 = arith.constant 0 : index
    %20 = vector.load %arg9[%c1_22, %c16, %c0_23] : memref<18x48x256xbf16, #tpu.memory_space<vmem>>, vector<16x16x256xbf16>
    tpu.vector_store %arg9[%c1_22, %c16, %c0_23], %19 {strides = array<i32>} : memref<18x48x256xbf16, #tpu.memory_space<vmem>>, vector<16x16x256xbf16>,
    %c0_24 = arith.constant 0 : index
    %c15_25 = arith.constant 15 : index
    %c0_26 = arith.constant 0 : index
    %21 = vector.load %arg9[%c0_24, %c15_25, %c0_26] : memref<18x48x256xbf16, #tpu.memory_space<vmem>>, vector<18x16x256xbf16>
    %22 = vector.extract_strided_slice %21 {offsets = [0, 0, 0], sizes = [16, 16, 256], strides = [1, 1, 1]} : vector<18x16x256xbf16> to vector<16x16x256xbf16>
    %23 = vector.shape_cast %22 : vector<16x16x256xbf16> to vector<256x256xbf16>
    %c0_27 = arith.constant 0 : index
    %c0_28 = arith.constant 0 : index
    %c0_29 = arith.constant 0 : index
    %c0_30 = arith.constant 0 : index
    %24 = vector.load %arg4[%c0_27, %c0_28, %c0_29, %c0_30] : memref<3x3x256x256xbf16, #tpu.memory_space<vmem>>, vector<1x1x256x256xbf16>
    %25 = vector.shape_cast %24 : vector<1x1x256x256xbf16> to vector<256x256xbf16>
    %cst_31 = arith.constant dense<0.000000e+00> : vector<256x256xf32>
    %26 = tpu.matmul %23, %25, %cst_31 {dimension_numbers = #tpu.dot_dimension_numbers<[1], [0], [0], [1], [0, 0, 1, 1], [], []>} : vector<256x256xbf16>, vector<256x256xbf16>, vector<256x256xf32> -> vector<256x256xf32>
    %c0_32 = arith.constant 0 : index
    %c0_33 = arith.constant 0 : index
    %27 = vector.load %arg10[%c0_32, %c0_33] : memref<256x256xf32, #tpu.memory_space<vmem>>, vector<256x256xf32>
    tpu.vector_store %arg10[%c0_32, %c0_33], %26 {strides = array<i32>} : memref<256x256xf32, #tpu.memory_space<vmem>>, vector<256x256xf32>,
    %28 = vector.extract_strided_slice %21 {offsets = [1, 0, 0], sizes = [16, 16, 256], strides = [1, 1, 1]} : vector<18x16x256xbf16> to vector<16x16x256xbf16>
    %29 = vector.shape_cast %28 : vector<16x16x256xbf16> to vector<256x256xbf16>
    %c1_34 = arith.constant 1 : index
    %c0_35 = arith.constant 0 : index
    %c0_36 = arith.constant 0 : index
    %c0_37 = arith.constant 0 : index
    %30 = vector.load %arg4[%c1_34, %c0_35, %c0_36, %c0_37] : memref<3x3x256x256xbf16, #tpu.memory_space<vmem>>, vector<1x1x256x256xbf16>
    %31 = vector.shape_cast %30 : vector<1x1x256x256xbf16> to vector<256x256xbf16>
    %cst_38 = arith.constant dense<0.000000e+00> : vector<256x256xf32>
    %32 = tpu.matmul %29, %31, %cst_38 {dimension_numbers = #tpu.dot_dimension_numbers<[1], [0], [0], [1], [0, 0, 1, 1], [], []>} : vector<256x256xbf16>, vector<256x256xbf16>, vector<256x256xf32> -> vector<256x256xf32>
    %c0_39 = arith.constant 0 : index
    %c0_40 = arith.constant 0 : index
    %33 = vector.load %arg10[%c0_39, %c0_40] : memref<256x256xf32, #tpu.memory_space<vmem>>, vector<256x256xf32>
    %34 = arith.addf %33, %32 : vector<256x256xf32>
    %c0_41 = arith.constant 0 : index
    %c0_42 = arith.constant 0 : index
    %35 = vector.load %arg10[%c0_41, %c0_42] : memref<256x256xf32, #tpu.memory_space<vmem>>, vector<256x256xf32>
    tpu.vector_store %arg10[%c0_41, %c0_42], %34 {strides = array<i32>} : memref<256x256xf32, #tpu.memory_space<vmem>>, vector<256x256xf32>,
    %36 = vector.extract_strided_slice %21 {offsets = [2, 0, 0], sizes = [16, 16, 256], strides = [1, 1, 1]} : vector<18x16x256xbf16> to vector<16x16x256xbf16>
    %37 = vector.shape_cast %36 : vector<16x16x256xbf16> to vector<256x256xbf16>
    %c2 = arith.constant 2 : index
    %c0_43 = arith.constant 0 : index
    %c0_44 = arith.constant 0 : index
    %c0_45 = arith.constant 0 : index
    %38 = vector.load %arg4[%c2, %c0_43, %c0_44, %c0_45] : memref<3x3x256x256xbf16, #tpu.memory_space<vmem>>, vector<1x1x256x256xbf16>
    %39 = vector.shape_cast %38 : vector<1x1x256x256xbf16> to vector<256x256xbf16>
    %cst_46 = arith.constant dense<0.000000e+00> : vector<256x256xf32>
    %40 = tpu.matmul %37, %39, %cst_46 {dimension_numbers = #tpu.dot_dimension_numbers<[1], [0], [0], [1], [0, 0, 1, 1], [], []>} : vector<256x256xbf16>, vector<256x256xbf16>, vector<256x256xf32> -> vector<256x256xf32>
    %c0_47 = arith.constant 0 : index
    %c0_48 = arith.constant 0 : index
    %41 = vector.load %arg10[%c0_47, %c0_48] : memref<256x256xf32, #tpu.memory_space<vmem>>, vector<256x256xf32>
    %42 = arith.addf %41, %40 : vector<256x256xf32>
    %c0_49 = arith.constant 0 : index
    %c0_50 = arith.constant 0 : index
    %43 = vector.load %arg10[%c0_49, %c0_50] : memref<256x256xf32, #tpu.memory_space<vmem>>, vector<256x256xf32>
    tpu.vector_store %arg10[%c0_49, %c0_50], %42 {strides = array<i32>} : memref<256x256xf32, #tpu.memory_space<vmem>>, vector<256x256xf32>,
    %c0_51 = arith.constant 0 : index
    %c16_52 = arith.constant 16 : index
    %c0_53 = arith.constant 0 : index
    %44 = vector.load %arg9[%c0_51, %c16_52, %c0_53] : memref<18x48x256xbf16, #tpu.memory_space<vmem>>, vector<18x16x256xbf16>
    %45 = vector.extract_strided_slice %44 {offsets = [0, 0, 0], sizes = [16, 16, 256], strides = [1, 1, 1]} : vector<18x16x256xbf16> to vector<16x16x256xbf16>
    %46 = vector.shape_cast %45 : vector<16x16x256xbf16> to vector<256x256xbf16>
    %c0_54 = arith.constant 0 : index
    %c1_55 = arith.constant 1 : index
    %c0_56 = arith.constant 0 : index
    %c0_57 = arith.constant 0 : index
    %47 = vector.load %arg4[%c0_54, %c1_55, %c0_56, %c0_57] : memref<3x3x256x256xbf16, #tpu.memory_space<vmem>>, vector<1x1x256x256xbf16>
    %48 = vector.shape_cast %47 : vector<1x1x256x256xbf16> to vector<256x256xbf16>
    %cst_58 = arith.constant dense<0.000000e+00> : vector<256x256xf32>
    %49 = tpu.matmul %46, %48, %cst_58 {dimension_numbers = #tpu.dot_dimension_numbers<[1], [0], [0], [1], [0, 0, 1, 1], [], []>} : vector<256x256xbf16>, vector<256x256xbf16>, vector<256x256xf32> -> vector<256x256xf32>
    %c0_59 = arith.constant 0 : index
    %c0_60 = arith.constant 0 : index
    %50 = vector.load %arg10[%c0_59, %c0_60] : memref<256x256xf32, #tpu.memory_space<vmem>>, vector<256x256xf32>
    %51 = arith.addf %50, %49 : vector<256x256xf32>
    %c0_61 = arith.constant 0 : index
    %c0_62 = arith.constant 0 : index
    %52 = vector.load %arg10[%c0_61, %c0_62] : memref<256x256xf32, #tpu.memory_space<vmem>>, vector<256x256xf32>
    tpu.vector_store %arg10[%c0_61, %c0_62], %51 {strides = array<i32>} : memref<256x256xf32, #tpu.memory_space<vmem>>, vector<256x256xf32>,
    %53 = vector.extract_strided_slice %44 {offsets = [1, 0, 0], sizes = [16, 16, 256], strides = [1, 1, 1]} : vector<18x16x256xbf16> to vector<16x16x256xbf16>
    %54 = vector.shape_cast %53 : vector<16x16x256xbf16> to vector<256x256xbf16>
    %c1_63 = arith.constant 1 : index
    %c1_64 = arith.constant 1 : index
    %c0_65 = arith.constant 0 : index
    %c0_66 = arith.constant 0 : index
    %55 = vector.load %arg4[%c1_63, %c1_64, %c0_65, %c0_66] : memref<3x3x256x256xbf16, #tpu.memory_space<vmem>>, vector<1x1x256x256xbf16>
    %56 = vector.shape_cast %55 : vector<1x1x256x256xbf16> to vector<256x256xbf16>
    %cst_67 = arith.constant dense<0.000000e+00> : vector<256x256xf32>
    %57 = tpu.matmul %54, %56, %cst_67 {dimension_numbers = #tpu.dot_dimension_numbers<[1], [0], [0], [1], [0, 0, 1, 1], [], []>} : vector<256x256xbf16>, vector<256x256xbf16>, vector<256x256xf32> -> vector<256x256xf32>
    %c0_68 = arith.constant 0 : index
    %c0_69 = arith.constant 0 : index
    %58 = vector.load %arg10[%c0_68, %c0_69] : memref<256x256xf32, #tpu.memory_space<vmem>>, vector<256x256xf32>
    %59 = arith.addf %58, %57 : vector<256x256xf32>
    %c0_70 = arith.constant 0 : index
    %c0_71 = arith.constant 0 : index
    %60 = vector.load %arg10[%c0_70, %c0_71] : memref<256x256xf32, #tpu.memory_space<vmem>>, vector<256x256xf32>
    tpu.vector_store %arg10[%c0_70, %c0_71], %59 {strides = array<i32>} : memref<256x256xf32, #tpu.memory_space<vmem>>, vector<256x256xf32>,
    %61 = vector.extract_strided_slice %44 {offsets = [2, 0, 0], sizes = [16, 16, 256], strides = [1, 1, 1]} : vector<18x16x256xbf16> to vector<16x16x256xbf16>
    %62 = vector.shape_cast %61 : vector<16x16x256xbf16> to vector<256x256xbf16>
    %c2_72 = arith.constant 2 : index
    %c1_73 = arith.constant 1 : index
    %c0_74 = arith.constant 0 : index
    %c0_75 = arith.constant 0 : index
    %63 = vector.load %arg4[%c2_72, %c1_73, %c0_74, %c0_75] : memref<3x3x256x256xbf16, #tpu.memory_space<vmem>>, vector<1x1x256x256xbf16>
    %64 = vector.shape_cast %63 : vector<1x1x256x256xbf16> to vector<256x256xbf16>
    %cst_76 = arith.constant dense<0.000000e+00> : vector<256x256xf32>
    %65 = tpu.matmul %62, %64, %cst_76 {dimension_numbers = #tpu.dot_dimension_numbers<[1], [0], [0], [1], [0, 0, 1, 1], [], []>} : vector<256x256xbf16>, vector<256x256xbf16>, vector<256x256xf32> -> vector<256x256xf32>
    %c0_77 = arith.constant 0 : index
    %c0_78 = arith.constant 0 : index
    %66 = vector.load %arg10[%c0_77, %c0_78] : memref<256x256xf32, #tpu.memory_space<vmem>>, vector<256x256xf32>
    %67 = arith.addf %66, %65 : vector<256x256xf32>
    %c0_79 = arith.constant 0 : index
    %c0_80 = arith.constant 0 : index
    %68 = vector.load %arg10[%c0_79, %c0_80] : memref<256x256xf32, #tpu.memory_space<vmem>>, vector<256x256xf32>
    tpu.vector_store %arg10[%c0_79, %c0_80], %67 {strides = array<i32>} : memref<256x256xf32, #tpu.memory_space<vmem>>, vector<256x256xf32>,
    %c0_81 = arith.constant 0 : index
    %c17_82 = arith.constant 17 : index
    %c0_83 = arith.constant 0 : index
    %69 = vector.load %arg9[%c0_81, %c17_82, %c0_83] : memref<18x48x256xbf16, #tpu.memory_space<vmem>>, vector<18x16x256xbf16>
    %70 = vector.extract_strided_slice %69 {offsets = [0, 0, 0], sizes = [16, 16, 256], strides = [1, 1, 1]} : vector<18x16x256xbf16> to vector<16x16x256xbf16>
    %71 = vector.shape_cast %70 : vector<16x16x256xbf16> to vector<256x256xbf16>
    %c0_84 = arith.constant 0 : index
    %c2_85 = arith.constant 2 : index
    %c0_86 = arith.constant 0 : index
    %c0_87 = arith.constant 0 : index
    %72 = vector.load %arg4[%c0_84, %c2_85, %c0_86, %c0_87] : memref<3x3x256x256xbf16, #tpu.memory_space<vmem>>, vector<1x1x256x256xbf16>
    %73 = vector.shape_cast %72 : vector<1x1x256x256xbf16> to vector<256x256xbf16>
    %cst_88 = arith.constant dense<0.000000e+00> : vector<256x256xf32>
    %74 = tpu.matmul %71, %73, %cst_88 {dimension_numbers = #tpu.dot_dimension_numbers<[1], [0], [0], [1], [0, 0, 1, 1], [], []>} : vector<256x256xbf16>, vector<256x256xbf16>, vector<256x256xf32> -> vector<256x256xf32>
    %c0_89 = arith.constant 0 : index
    %c0_90 = arith.constant 0 : index
    %75 = vector.load %arg10[%c0_89, %c0_90] : memref<256x256xf32, #tpu.memory_space<vmem>>, vector<256x256xf32>
    %76 = arith.addf %75, %74 : vector<256x256xf32>
    %c0_91 = arith.constant 0 : index
    %c0_92 = arith.constant 0 : index
    %77 = vector.load %arg10[%c0_91, %c0_92] : memref<256x256xf32, #tpu.memory_space<vmem>>, vector<256x256xf32>
    tpu.vector_store %arg10[%c0_91, %c0_92], %76 {strides = array<i32>} : memref<256x256xf32, #tpu.memory_space<vmem>>, vector<256x256xf32>,
    %78 = vector.extract_strided_slice %69 {offsets = [1, 0, 0], sizes = [16, 16, 256], strides = [1, 1, 1]} : vector<18x16x256xbf16> to vector<16x16x256xbf16>
    %79 = vector.shape_cast %78 : vector<16x16x256xbf16> to vector<256x256xbf16>
    %c1_93 = arith.constant 1 : index
    %c2_94 = arith.constant 2 : index
    %c0_95 = arith.constant 0 : index
    %c0_96 = arith.constant 0 : index
    %80 = vector.load %arg4[%c1_93, %c2_94, %c0_95, %c0_96] : memref<3x3x256x256xbf16, #tpu.memory_space<vmem>>, vector<1x1x256x256xbf16>
    %81 = vector.shape_cast %80 : vector<1x1x256x256xbf16> to vector<256x256xbf16>
    %cst_97 = arith.constant dense<0.000000e+00> : vector<256x256xf32>
    %82 = tpu.matmul %79, %81, %cst_97 {dimension_numbers = #tpu.dot_dimension_numbers<[1], [0], [0], [1], [0, 0, 1, 1], [], []>} : vector<256x256xbf16>, vector<256x256xbf16>, vector<256x256xf32> -> vector<256x256xf32>
    %c0_98 = arith.constant 0 : index
    %c0_99 = arith.constant 0 : index
    %83 = vector.load %arg10[%c0_98, %c0_99] : memref<256x256xf32, #tpu.memory_space<vmem>>, vector<256x256xf32>
    %84 = arith.addf %83, %82 : vector<256x256xf32>
    %c0_100 = arith.constant 0 : index
    %c0_101 = arith.constant 0 : index
    %85 = vector.load %arg10[%c0_100, %c0_101] : memref<256x256xf32, #tpu.memory_space<vmem>>, vector<256x256xf32>
    tpu.vector_store %arg10[%c0_100, %c0_101], %84 {strides = array<i32>} : memref<256x256xf32, #tpu.memory_space<vmem>>, vector<256x256xf32>,
    %86 = vector.extract_strided_slice %69 {offsets = [2, 0, 0], sizes = [16, 16, 256], strides = [1, 1, 1]} : vector<18x16x256xbf16> to vector<16x16x256xbf16>
    %87 = vector.shape_cast %86 : vector<16x16x256xbf16> to vector<256x256xbf16>
    %c2_102 = arith.constant 2 : index
    %c2_103 = arith.constant 2 : index
    %c0_104 = arith.constant 0 : index
    %c0_105 = arith.constant 0 : index
    %88 = vector.load %arg4[%c2_102, %c2_103, %c0_104, %c0_105] : memref<3x3x256x256xbf16, #tpu.memory_space<vmem>>, vector<1x1x256x256xbf16>
    %89 = vector.shape_cast %88 : vector<1x1x256x256xbf16> to vector<256x256xbf16>
    %cst_106 = arith.constant dense<0.000000e+00> : vector<256x256xf32>
    %90 = tpu.matmul %87, %89, %cst_106 {dimension_numbers = #tpu.dot_dimension_numbers<[1], [0], [0], [1], [0, 0, 1, 1], [], []>} : vector<256x256xbf16>, vector<256x256xbf16>, vector<256x256xf32> -> vector<256x256xf32>
    %c0_107 = arith.constant 0 : index
    %c0_108 = arith.constant 0 : index
    %91 = vector.load %arg10[%c0_107, %c0_108] : memref<256x256xf32, #tpu.memory_space<vmem>>, vector<256x256xf32>
    %92 = arith.addf %91, %90 : vector<256x256xf32>
    %c0_109 = arith.constant 0 : index
    %c0_110 = arith.constant 0 : index
    %93 = vector.load %arg10[%c0_109, %c0_110] : memref<256x256xf32, #tpu.memory_space<vmem>>, vector<256x256xf32>
    tpu.vector_store %arg10[%c0_109, %c0_110], %92 {strides = array<i32>} : memref<256x256xf32, #tpu.memory_space<vmem>>, vector<256x256xf32>,
    %c0_111 = arith.constant 0 : index
    %c0_112 = arith.constant 0 : index
    %94 = vector.load %arg10[%c0_111, %c0_112] : memref<256x256xf32, #tpu.memory_space<vmem>>, vector<256x256xf32>
    %95 = vector.broadcast %1 : vector<1x256xf32> to vector<256x256xf32>
    %96 = arith.addf %94, %95 : vector<256x256xf32>
    %cst_113 = arith.constant 0.000000e+00 : f32
    %97 = vector.broadcast %cst_113 : f32 to vector<256x256xf32>
    %98 = arith.maximumf %96, %97 : vector<256x256xf32>
    %99 = arith.truncf %98 : vector<256x256xf32> to vector<256x256xbf16>
    %c0_114 = arith.constant 0 : index
    %c0_115 = arith.constant 0 : index
    %100 = vector.load %arg11[%c0_114, %c0_115] : memref<256x256xbf16, #tpu.memory_space<vmem>>, vector<256x256xbf16>
    tpu.vector_store %arg11[%c0_114, %c0_115], %99 {strides = array<i32>} : memref<256x256xbf16, #tpu.memory_space<vmem>>, vector<256x256xbf16>,
    %c0_116 = arith.constant 0 : index
    %c0_117 = arith.constant 0 : index
    %101 = vector.load %arg11[%c0_116, %c0_117] : memref<256x256xbf16, #tpu.memory_space<vmem>>, vector<256x256xbf16>
    %c0_118 = arith.constant 0 : index
    %c0_119 = arith.constant 0 : index
    %102 = vector.load %arg6[%c0_118, %c0_119] : memref<256x256xbf16, #tpu.memory_space<vmem>>, vector<256x256xbf16>
    %cst_120 = arith.constant dense<0.000000e+00> : vector<256x256xf32>
    %103 = tpu.matmul %101, %102, %cst_120 {dimension_numbers = #tpu.dot_dimension_numbers<[1], [0], [0], [1], [0, 0, 1, 1], [], []>} : vector<256x256xbf16>, vector<256x256xbf16>, vector<256x256xf32> -> vector<256x256xf32>
    %104 = vector.broadcast %2 : vector<1x256xf32> to vector<256x256xf32>
    %105 = arith.addf %103, %104 : vector<256x256xf32>
    %106 = vector.shape_cast %105 : vector<256x256xf32> to vector<16x16x256xf32>
    %c0_121 = arith.constant 0 : index
    %c0_122 = arith.constant 0 : index
    %c0_123 = arith.constant 0 : index
    %c0_124 = arith.constant 0 : index
    %107 = vector.load %arg8[%c0_121, %c0_122, %c0_123, %c0_124] : memref<1x16x16x256xf32, #tpu.memory_space<vmem>>, vector<1x16x16x256xf32>
    %108 = vector.shape_cast %107 : vector<1x16x16x256xf32> to vector<16x16x256xf32>
    %109 = vector.shape_cast %106 : vector<16x16x256xf32> to vector<1x16x16x256xf32>
    tpu.vector_store %arg8[%c0_121, %c0_122, %c0_123, %c0_124], %109 {strides = array<i32>} : memref<1x16x16x256xf32, #tpu.memory_space<vmem>>, vector<1x16x16x256xf32>,
    return
  }
  func.func @transform_0(%arg0: i32) -> (i32, i32, i32, i32) {
    %c0_i32 = arith.constant 0 : i32
    %c0_i32_0 = arith.constant 0 : i32
    %c0_i32_1 = arith.constant 0 : i32
    %c0_i32_2 = arith.constant 0 : i32
    return %arg0, %c0_i32, %c0_i32_0, %c0_i32_1 : i32, i32, i32, i32
  }
  func.func @transform_1(%arg0: i32) -> (i32, i32) {
    %c0_i32 = arith.constant 0 : i32
    %c0_i32_0 = arith.constant 0 : i32
    %c0_i32_1 = arith.constant 0 : i32
    return %c0_i32, %c0_i32_0 : i32, i32
  }
  func.func @transform_2(%arg0: i32) -> (i32, i32) {
    %c0_i32 = arith.constant 0 : i32
    %c0_i32_0 = arith.constant 0 : i32
    %c0_i32_1 = arith.constant 0 : i32
    return %c0_i32, %c0_i32_0 : i32, i32
  }
  func.func @transform_3(%arg0: i32) -> (i32, i32, i32, i32) {
    %c0_i32 = arith.constant 0 : i32
    %c0_i32_0 = arith.constant 0 : i32
    %c0_i32_1 = arith.constant 0 : i32
    %c0_i32_2 = arith.constant 0 : i32
    %c0_i32_3 = arith.constant 0 : i32
    return %c0_i32, %c0_i32_0, %c0_i32_1, %c0_i32_2 : i32, i32, i32, i32
  }
  func.func @transform_4(%arg0: i32) -> (i32, i32) {
    %c0_i32 = arith.constant 0 : i32
    %c0_i32_0 = arith.constant 0 : i32
    %c0_i32_1 = arith.constant 0 : i32
    return %c0_i32, %c0_i32_0 : i32, i32
  }
  func.func @transform_5(%arg0: i32) -> (i32, i32) {
    %c0_i32 = arith.constant 0 : i32
    %c0_i32_0 = arith.constant 0 : i32
    %c0_i32_1 = arith.constant 0 : i32
    return %c0_i32, %c0_i32_0 : i32, i32
  }
  func.func @transform_6(%arg0: i32) -> (i32, i32) {
    %c0_i32 = arith.constant 0 : i32
    %c0_i32_0 = arith.constant 0 : i32
    %c0_i32_1 = arith.constant 0 : i32
    return %c0_i32, %c0_i32_0 : i32, i32
  }
  func.func @transform_7(%arg0: i32) -> (i32, i32, i32, i32) {
    %c0_i32 = arith.constant 0 : i32
    %c0_i32_0 = arith.constant 0 : i32
    %c0_i32_1 = arith.constant 0 : i32
    %c0_i32_2 = arith.constant 0 : i32
    return %arg0, %c0_i32, %c0_i32_0, %c0_i32_1 : i32, i32, i32, i32
  }
}

</mosaic_0001>

<bundles_post_ra>
// kernel: embednet_forward.1
= control target key start
LH: loop header
LB: loop body
LE: loop exit
PB: predicated region body
PF: predicated region fallthrough
CT: control target
= control target key end

     0   :  { %12 = vsyncpa [#allocation6], 0  ;;  %s12712_s0 = inlined_call_operand.vmem [shape: bf16[2,16,16,256], index: 0, kind: input, shape index: {}]   ;;  %s12713_s1 = inlined_call_operand.vmem [shape: bf16[256,256], index: 1, kind: input, shape index: {}]   ;;  %s12714_s2 = inlined_call_operand.vmem [shape: f32[1,256], index: 2, kind: input, shape index: {}]   ;;  %s12715_s3 = inlined_call_operand.vmem [shape: bf16[3,3,256,256], index: 3, kind: input, shape index: {}]   ;;  %s12716_s4 = inlined_call_operand.vmem [shape: f32[1,256], index: 4, kind: input, shape index: {}]   ;;  %s12717_s5 = inlined_call_operand.vmem [shape: bf16[256,256], index: 5, kind: input, shape index: {}]   ;;  %s12718_s6 = inlined_call_operand.vmem [shape: f32[1,256], index: 6, kind: input, shape index: {}]   ;;  %s12719_s7 = inlined_call_operand.hbm [shape: f32[2,16,16,256], index: 7, kind: output, shape index: {}]  }
   0x1   :  { %14 = vsyncpa [#allocation6 + $0x1], 0  ;;  %s10207_s24 = smov 0   ;;  %s10209_s25 = smov 0  }
   0x2   :  { %s10211_s26 = smov 0   ;;  %s10213_s27 = smov 0  }
   0x3 LB: > { %s10228_s28 = sadd.s32 4294967295, %s10161_s27   ;;  %s8234_s29 = sadd.s32 4294967294, %s10161_s27   ;;  %s10161_s27 = sphi %s10213_s27, %s12809_s27   ;;  %s10157_s26 = sphi %s10211_s26, %s12808_s26   ;;  %s10153_s25 = sphi %s10209_s25, %s12807_s25   ;;  %s10149_s24 = sphi %s10207_s24, %s12806_s24  }
   0x4   : > { %s10232_s30 = sadd.s32 1, %s10161_s27   ;;  %s179_s8 = sadd.s32 1, %s10157_s26 }
   0x5   : > { %s176_s9 = ssub.s32 %s10161_s27, %s10232_s30  ;;  %p189_p0 = scmp.ne.s32.totalorder %s10157_s26, %s10153_s25 }
   0x6   : > { %p177_p1 = scmp.eq.s32.totalorder %s176_s9, 0  ;;  %p190_p2 = scmp.eq.s32.totalorder %s10228_s28, 1 }
   0x7   : > { %p195_p3 = scmp.ne.s32.totalorder %s10153_s25, %s10149_s24  ;;  %p196_p4 = scmp.eq.s32.totalorder %s8234_s29, 1 }
   0x8   : > { %s10243_s10 = scalar_select %p177_p1, %s10157_s26, %s179_s8  }
   0x9   : > { %p10245_p5 = por %p190_p2, %p189_p0  ;;  %p10249_p6 = por %p196_p4, %p195_p3 }
   0xa   : > { %p8237_p7 = scmp.ge.s32.totalorder %s10161_s27, 1  ;;  %p240_p8 = scmp.lt.s32.totalorder %s10161_s27, 3 }
   0xc   : > { %p241_p9 = pnand %p8237_p7, %p240_p8 }
   0xe   : > { %244 = sbr.rel (%p241_p9) target bundleno = 1516 (0x5ec), region = 48 }
  0x15   : > { %v9474_v0 = vld [vmem:[%s12713_s1 + $0x4] ss:$8 sps:$4 sm:$0xff]   ;;  %v9476_v1 = vld [vmem:[%s12713_s1] ss:$8 sps:$4 sm:$0xff]   ;;  %v9477_v2 = vld [vmem:[%s12713_s1 + $0x14] ss:$8 sps:$4 sm:$0xff]  }
  0x16   : > { %888 = vmatprep.subr.bf16.mxu0 %v9474_v0  ;;  %v9479_v3 = vld [vmem:[%s12713_s1 + $0x10] ss:$8 sps:$4 sm:$0xff]   ;;  %v9480_v4 = vld [vmem:[%s12713_s1 + $0x24] ss:$8 sps:$4 sm:$0xff]   ;;  %v9482_v5 = vld [vmem:[%s12713_s1 + $0x20] ss:$8 sps:$4 sm:$0xff]  }
  0x17   : > { %889 = vmatpush1.bf16.msra.mxu0 %v9476_v1  ;;  %v9483_v6 = vld [vmem:[%s12713_s1 + $0x34] ss:$8 sps:$4 sm:$0xff]   ;;  %p272_p10 = scmp.lt.s32.totalorder %s10228_s28, 1  ;;  %v9485_v7 = vld [vmem:[%s12713_s1 + $0x30] ss:$8 sps:$4 sm:$0xff]   ;;  %vm295_vm0 = vcmask 1047559  }
  0x18   : > { %890 = vmatprep.subr.bf16.mxu0 %v9477_v2  ;;  %v9486_v8 = vld [vmem:[%s12713_s1 + $0x44] ss:$8 sps:$4 sm:$0xff]   ;;  %v9488_v9 = vld [vmem:[%s12713_s1 + $0x40] ss:$8 sps:$4 sm:$0xff]   ;;  %v9489_v10 = vld [vmem:[%s12713_s1 + $0x54] ss:$8 sps:$4 sm:$0xff]  }
  0x19   : > { %s273_s17 = scalar_select %p272_p10, %s10228_s28, 1  ;;  %v9491_v11 = vld [vmem:[%s12713_s1 + $0x50] ss:$8 sps:$4 sm:$0xff]   ;;  %v9492_v12 = vld [vmem:[%s12713_s1 + $0x64] ss:$8 sps:$4 sm:$0xff]   ;;  %vm394_vm4 = vcmask 1040384  }
  0x1a   : > { %v9494_v14 = vld [vmem:[%s12713_s1 + $0x60] ss:$8 sps:$4 sm:$0xff]   ;;  %v9495_v15 = vld [vmem:[%s12713_s1 + $0x74] ss:$8 sps:$4 sm:$0xff]   ;;  %v9497_v16 = vld [vmem:[%s12713_s1 + $0x70] ss:$8 sps:$4 sm:$0xff]  }
  0x1b   : > { %891 = vmatpush1.bf16.msra.mxu0 %v9479_v3  ;;  %s8886_s22 = sshll.u32 %s273_s17, 8  ;;  %v9498_v17 = vld [vmem:[%s12713_s1 + $0x84] ss:$8 sps:$4 sm:$0xff]   ;;  %v9500_v18 = vld [vmem:[%s12713_s1 + $0x80] ss:$8 sps:$4 sm:$0xff]   ;;  %s269_s16 = sand.u32 1, %s10153_s25  }
  0x1c   : > { %892 = vmatprep.subr.bf16.mxu0 %v9480_v4  ;;  %s10296_s13 = scalar_lea.vmem %s12712_s0, %s8886_s22  ;;  %v9501_v19 = vld [vmem:[%s12713_s1 + $0x94] ss:$8 sps:$4 sm:$0xff]   ;;  %v9503_v20 = vld [vmem:[%s12713_s1 + $0x90] ss:$8 sps:$4 sm:$0xff]   ;;  %v9504_v21 = vld [vmem:[%s12713_s1 + $0xa4] ss:$8 sps:$4 sm:$0xff]  }
  0x1d   : > { %v9524_v13 = vld [vmem:[%s10296_s13 + $0x4] ss:$8 sps:$4 sm:$0xff]   ;;  %v9506_v22 = vld [vmem:[%s12713_s1 + $0xa0] ss:$8 sps:$4 sm:$0xff]   ;;  %v9507_v23 = vld [vmem:[%s12713_s1 + $0xb4] ss:$8 sps:$4 sm:$0xff]  }
  0x1e   : > { %920 = vmatprep.mubr.bf16.mxu0 %v9524_v13  ;;  %v9509_v24 = vld [vmem:[%s12713_s1 + $0xb0] ss:$8 sps:$4 sm:$0xff]   ;;  %v9510_v25 = vld [vmem:[%s12713_s1 + $0xc4] ss:$8 sps:$4 sm:$0xff]   ;;  %v9512_v26 = vld [vmem:[%s12713_s1 + $0xc0] ss:$8 sps:$4 sm:$0xff]  }
  0x1f   : > { %893 = vmatpush1.bf16.msra.mxu0 %v9482_v5  ;;  %v9513_v27 = vld [vmem:[%s12713_s1 + $0xd4] ss:$8 sps:$4 sm:$0xff]   ;;  %v9515_v28 = vld [vmem:[%s12713_s1 + $0xd0] ss:$8 sps:$4 sm:$0xff]   ;;  %v9516_v29 = vld [vmem:[%s12713_s1 + $0xe4] ss:$8 sps:$4 sm:$0xff]  }
  0x20   : > { %894 = vmatprep.subr.bf16.mxu0 %v9483_v6  ;;  %v9518_v30 = vld [vmem:[%s12713_s1 + $0xe0] ss:$8 sps:$4 sm:$0xff]   ;;  %v9519_v31 = vld [vmem:[%s12713_s1 + $0xf4] ss:$8 sps:$4 sm:$0xff]   ;;  %v9521_v32 = vld [vmem:[%s12713_s1 + $0xf0] ss:$8 sps:$4 sm:$0xff]  }
  0x21   : > { %v9569_v33 = vld [vmem:[%s12715_s3 + $0x4] ss:$8 sps:$4 sm:$0xff]   ;;  %v9522_v34 = vld [vmem:[%s10296_s13] ss:$8 sps:$4 sm:$0xff]   ;;  %v9525_v35 = vld [vmem:[%s10296_s13 + $0x14] ss:$8 sps:$4 sm:$0xff]  }
  0x22   : > { %v9567_v36 = vld [vmem:[%s12715_s3] ss:$8 sps:$4 sm:$0xff]   ;;  %v9572_v37 = vld [vmem:[%s12715_s3 + $0x14] ss:$8 sps:$4 sm:$0xff]   ;;  %v9570_v38 = vld [vmem:[%s12715_s3 + $0x10] ss:$8 sps:$4 sm:$0xff]  }
  0x23   : > { %895 = vmatpush1.bf16.msra.mxu0 %v9485_v7  ;;  %v9575_v39 = vld [vmem:[%s12715_s3 + $0x24] ss:$8 sps:$4 sm:$0xff]   ;;  %v9527_v40 = vld [vmem:[%s10296_s13 + $0x10] ss:$8 sps:$4 sm:$0xff]   ;;  %v9573_v42 = vld [vmem:[%s12715_s3 + $0x20] ss:$8 sps:$4 sm:$0xff]  }
  0x24   : > { %896 = vmatprep.subr.bf16.mxu0 %v9486_v8  ;;  %v9528_v41 = vld [vmem:[%s10296_s13 + $0x24] ss:$8 sps:$4 sm:$0xff]   ;;  %v9578_v43 = vld [vmem:[%s12715_s3 + $0x34] ss:$8 sps:$4 sm:$0xff]   ;;  %v9576_v44 = vld [vmem:[%s12715_s3 + $0x30] ss:$8 sps:$4 sm:$0xff]  }
  0x25   : > { %v9581_v45 = vld [vmem:[%s12715_s3 + $0x44] ss:$8 sps:$4 sm:$0xff]   ;;  %v9530_v46 = vld [vmem:[%s10296_s13 + $0x20] ss:$8 sps:$4 sm:$0xff]   ;;  %v9531_v47 = vld [vmem:[%s10296_s13 + $0x34] ss:$8 sps:$4 sm:$0xff]  }
  0x26   : > { %v9579_v48 = vld [vmem:[%s12715_s3 + $0x40] ss:$8 sps:$4 sm:$0xff]   ;;  %v9584_v49 = vld [vmem:[%s12715_s3 + $0x54] ss:$8 sps:$4 sm:$0xff]   ;;  %v9582_v50 = vld [vmem:[%s12715_s3 + $0x50] ss:$8 sps:$4 sm:$0xff]  }
  0x27   : > { %897 = vmatpush1.bf16.msra.mxu0 %v9488_v9  ;;  %v9587_v51 = vld [vmem:[%s12715_s3 + $0x64] ss:$8 sps:$4 sm:$0xff]   ;;  %v9533_v52 = vld [vmem:[%s10296_s13 + $0x30] ss:$8 sps:$4 sm:$0xff]   ;;  %v9585_v54 = vld [vmem:[%s12715_s3 + $0x60] ss:$8 sps:$4 sm:$0xff]  }
  0x28   : > { %898 = vmatprep.subr.bf16.mxu0 %v9489_v10  ;;  %v9534_v53 = vld [vmem:[%s10296_s13 + $0x44] ss:$8 sps:$4 sm:$0xff]   ;;  %v9590_v55 = vld [vmem:[%s12715_s3 + $0x74] ss:$8 sps:$4 sm:$0xff]   ;;  %v9588_v56 = vld [vmem:[%s12715_s3 + $0x70] ss:$8 sps:$4 sm:$0xff]  }
  0x29   : > { %v9593_v57 = vld [vmem:[%s12715_s3 + $0x84] ss:$8 sps:$4 sm:$0xff]   ;;  %v9536_v58 = vld [vmem:[%s10296_s13 + $0x40] ss:$8 sps:$4 sm:$0xff]   ;;  %v9537_v59 = vld [vmem:[%s10296_s13 + $0x54] ss:$8 sps:$4 sm:$0xff]  }
  0x2a   : > { %v9591_v60 = vld [vmem:[%s12715_s3 + $0x80] ss:$8 sps:$4 sm:$0xff]   ;;  %v9596_v61 = vld [vmem:[%s12715_s3 + $0x94] ss:$8 sps:$4 sm:$0xff]   ;;  %v9594_v62 = vld [vmem:[%s12715_s3 + $0x90] ss:$8 sps:$4 sm:$0xff]  }
  0x2b   : > { %899 = vmatpush1.bf16.msra.mxu0 %v9491_v11  ;;  %v9599_v63 = vld [vmem:[%s12715_s3 + $0xa4] ss:$8 sps:$4 sm:$0xff]   ;;  %v9539_v0 = vld [vmem:[%s10296_s13 + $0x50] ss:$8 sps:$4 sm:$0xff]   ;;  %v9597_v2 = vld [vmem:[%s12715_s3 + $0xa0] ss:$8 sps:$4 sm:$0xff]  }
  0x2c   : > { %900 = vmatprep.subr.bf16.mxu0 %v9492_v12  ;;  %v9540_v1 = vld [vmem:[%s10296_s13 + $0x64] ss:$8 sps:$4 sm:$0xff]   ;;  %v9602_v3 = vld [vmem:[%s12715_s3 + $0xb4] ss:$8 sps:$4 sm:$0xff]   ;;  %v9600_v4 = vld [vmem:[%s12715_s3 + $0xb0] ss:$8 sps:$4 sm:$0xff]  }
  0x2d   : > { %v9542_v5 = vld [vmem:[%s10296_s13 + $0x60] ss:$8 sps:$4 sm:$0xff]   ;;  %v9543_v6 = vld [vmem:[%s10296_s13 + $0x74] ss:$8 sps:$4 sm:$0xff]   ;;  %v9545_v7 = vld [vmem:[%s10296_s13 + $0x70] ss:$8 sps:$4 sm:$0xff]  }
  0x2e   : > { %v9546_v8 = vld [vmem:[%s10296_s13 + $0x84] ss:$8 sps:$4 sm:$0xff]   ;;  %v9548_v9 = vld [vmem:[%s10296_s13 + $0x80] ss:$8 sps:$4 sm:$0xff]   ;;  %v9549_v10 = vld [vmem:[%s10296_s13 + $0x94] ss:$8 sps:$4 sm:$0xff]  }
  0x2f   : > { %901 = vmatpush1.bf16.msra.mxu0 %v9494_v14  ;;  %v9551_v11 = vld [vmem:[%s10296_s13 + $0x90] ss:$8 sps:$4 sm:$0xff]   ;;  %v9552_v12 = vld [vmem:[%s10296_s13 + $0xa4] ss:$8 sps:$4 sm:$0xff]   ;;  %v9554_v13 = vld [vmem:[%s10296_s13 + $0xa0] ss:$8 sps:$4 sm:$0xff]  }
  0x30   : > { %902 = vmatprep.subr.bf16.mxu0 %v9495_v15  ;;  %v9555_v14 = vld [vmem:[%s10296_s13 + $0xb4] ss:$8 sps:$4 sm:$0xff]   ;;  %v9605_v15 = vld [vmem:[%s12715_s3 + $0xc4] ss:$8 sps:$4 sm:$0xff]   ;;  %vm296_vm1 = vsmask.f32 7966 }
  0x31   : > { %vm10487_vm2 = vmand %vm295_vm0, %vm296_vm1  ;;  %vm395_vm3 = vsmask.f32 256  ;;  %vm5196_vm6 = vsmask.f32 7424  ;;  %s8238_s19 = sshll.u32 %s269_s16, 9  ;;  %s8887_s21 = sshll.u32 %s10228_s28, 13 }
  0x32   : > { %vm10513_vm5 = vmand %vm394_vm4, %vm395_vm3  ;;  %s12532_s20 = scalar_lea.vmem [#allocation5], %s8238_s19  ;;  %s12661_s29 = scalar_lea.hbm %s12719_s7, %s8887_s21 }
  0x33   : > { %903 = vmatpush1.bf16.msra.mxu0 %v9497_v16  ;;  %v9603_v16 = vld [vmem:[%s12715_s3 + $0xc0] ss:$8 sps:$4 sm:$0xff]   ;;  %s8172_s22 = sshll.u32 %s12532_s20, 4  ;;  %s12671_s28 = scalar_lea.sflag [#allocation6], %s269_s16  ;;  %s12663_s22 = int_to_ptr.vmem [resolvable:$true] %s8172_s22 }
  0x34   : > { %904 = vmatprep.subr.bf16.mxu0 %v9498_v17  ;;  %v9608_v17 = vld [vmem:[%s12715_s3 + $0xd4] ss:$8 sps:$4 sm:$0xff]   ;;  %s10099_s8 = scalar_lea.vmem %s12663_s22, 8192  ;;  %s10164_s9 = smov [#allocation5]  }
  0x35   : > { %p10100_p11 = scmp.ne.s32.totalorder %s12663_s22, %s10099_s8  ;;  %s10103_s14 = sshll.u32 %s10164_s9, 4  ;;  %s10104_s14 = int_to_ptr.vmem [resolvable:$false] %s10103_s14 }
  0x36   : > { %s10105_s15 = scalar_lea.vmem %s10104_s14, 16384  ;;  %p10106_p0 = scmp.lt.s32.totalorder %s12663_s22, %s10104_s14 }
  0x37   : > { %905 = vmatpush1.bf16.msra.mxu0 %v9500_v18  ;;  %v10163_v18 = vmov 0   ;;  %p10101_p12 = pnand %p10100_p11, %p10245_p5  ;;  %p10107_p1 = scmp.lt.s32.totalorder %s10105_s15, %s10099_s8 }
  0x38   : > { %906 = vmatprep.subr.bf16.mxu0 %v9501_v19  ;;  %282 = vst [vmem:[#allocation2 + $0x8] sm:$0xff] %v10163_v18  ;;  %281 = vst [vmem:[#allocation2] sm:$0xff] %v10163_v18  ;;  %v9606_v19 = vld [vmem:[%s12715_s3 + $0xd0] ss:$8 sps:$4 sm:$0xff]  }
  0x39   : > { %285 = vst [vmem:[#allocation2 + $0x20] sm:$0xff] %v10163_v18  ;;  %286 = vst [vmem:[#allocation2 + $0x28] sm:$0xff] %v10163_v18  ;;  %p10102_p13 = pneg %p10101_p12  ;;  %p10108_p2 = por %p10107_p1, %p10106_p0 }
  0x3a   : > { %288 = vst [vmem:[#allocation2 + $0x330] sm:$0xff] %v10163_v18  ;;  %289 = vst [vmem:[#allocation2 + $0x338] sm:$0xff] %v10163_v18 }
  0x3b   : > { %907 = vmatpush1.bf16.msra.mxu0 %v9503_v20  ;;  %292 = vst [vmem:[#allocation2 + $0x350] sm:$0xff] %v10163_v18  ;;  %293 = vst [vmem:[#allocation2 + $0x358] sm:$0xff] %v10163_v18  ;;  %v9557_v20 = vld [vmem:[%s10296_s13 + $0xb0] ss:$8 sps:$4 sm:$0xff]   ;;  %p10109_p3 = pnand %p10108_p2, %p10102_p13 }
  0x3c   : > { %908 = vmatprep.subr.bf16.mxu0 %v9504_v21  ;;  %v9558_v21 = vld [vmem:[%s10296_s13 + $0xc4] ss:$8 sps:$4 sm:$0xff]  }
  0x3f   : > { %909 = vmatpush1.bf16.msra.mxu0 %v9506_v22  ;;  %v9614_v22 = vld [vmem:[%s12715_s3 + $0xe4] ss:$8 sps:$4 sm:$0xff]  }
  0x40   : > { %910 = vmatprep.subr.bf16.mxu0 %v9507_v23  ;;  %v9612_v23 = vld [vmem:[%s12715_s3 + $0xe0] ss:$8 sps:$4 sm:$0xff]  }
  0x43   : > { %911 = vmatpush1.bf16.msra.mxu0 %v9509_v24  ;;  %v9615_v24 = vld [vmem:[%s12715_s3 + $0x104] ss:$8 sps:$4 sm:$0xff]  }
  0x44   : > { %912 = vmatprep.subr.bf16.mxu0 %v9510_v25  ;;  %v9617_v25 = vld [vmem:[%s12715_s3 + $0x100] ss:$8 sps:$4 sm:$0xff]   ;;  %8888 = vmatprep.subr.bf16.mxu1 %v9615_v24  ;;  %v325_v24 = vld [vmem:[#allocation2 + $0xf8] sm:$0x80] }
  0x45   : > { %8904 = vmatpush1.bf16.msra.mxu1 %v9617_v25 }
  0x47   : > { %913 = vmatpush1.bf16.msra.mxu0 %v9512_v26 }
  0x48   : > { %914 = vmatprep.subr.bf16.mxu0 %v9513_v27  ;;  %v301_v27 = vld [vmem:[#allocation2 + $0x38] sm:$0x80] }
  0x4b   : > { %915 = vmatpush1.bf16.msra.mxu0 %v9515_v28  ;;  %v302_v28 = vsel %vm10487_vm2, 0, %v301_v27  ;;  %v326_v27 = vsel %vm10487_vm2, 0, %v325_v24 }
  0x4c   : > { %916 = vmatprep.subr.bf16.mxu0 %v9516_v29  ;;  %v298_v29 = vld [vmem:[#allocation2 + $0x30] sm:$0x80]  ;;  %303 = vst [vmem:[#allocation2 + $0x38] sm:$0x80] %v302_v28  ;;  %327 = vst [vmem:[#allocation2 + $0xf8] sm:$0x80] %v326_v27 }
  0x4d   : > { %v9678_v27 = vld [vmem:[%s12715_s3 + $0x310] ss:$8 sps:$4 sm:$0xff]  }
  0x4f   : > { %917 = vmatpush1.bf16.msra.mxu0 %v9518_v30  ;;  %v9620_v30 = vld [vmem:[%s12715_s3 + $0xf4] ss:$8 sps:$4 sm:$0xff]  }
  0x50   : > { %918 = vmatprep.subr.bf16.mxu0 %v9519_v31  ;;  %v299_v31 = vsel %vm10487_vm2, 0, %v298_v29  ;;  %v9645_v29 = vld [vmem:[%s12715_s3 + $0x194] ss:$8 sps:$4 sm:$0xff]  }
  0x51   : > { %300 = vst [vmem:[#allocation2 + $0x30] sm:$0x80] %v299_v31  ;;  %v9647_v31 = vld [vmem:[%s12715_s3 + $0x190] ss:$8 sps:$4 sm:$0xff]  }
  0x53   : > { %919 = vmatpush1.bf16.msra.mxu0 %v9521_v32  ;;  %v9618_v32 = vld [vmem:[%s12715_s3 + $0xf0] ss:$8 sps:$4 sm:$0xff]  }
  0x54   : > { %1889 = vmatprep.subr.bf16.mxu0 %v9569_v33  ;;  %v9621_v33 = vld [vmem:[%s12715_s3 + $0x114] ss:$8 sps:$4 sm:$0xff]  }
  0x55   : > { %8889 = vmatprep.subr.bf16.mxu1 %v9621_v33  ;;  %v418_v33 = vld [vmem:[#allocation2 + $0xe8] sm:$0x1] }
  0x56   : > { %921 = vmatmul.mubr.bf16.vlgmr.msra.gmra.mrb[0].mxu0 %v9522_v34  ;;  %v9623_v34 = vld [vmem:[%s12715_s3 + $0x110] ss:$8 sps:$4 sm:$0xff]  }
  0x57   : > { %930 = vmatprep.mubr.bf16.mxu0 %v9525_v35  ;;  %1890 = vmatpush1.bf16.msra.mxu0 %v9567_v36  ;;  %v9560_v35 = vld [vmem:[%s10296_s13 + $0xc0] ss:$8 sps:$4 sm:$0xff]   ;;  %v9561_v36 = vld [vmem:[%s10296_s13 + $0xd4] ss:$8 sps:$4 sm:$0xff]  }
  0x58   : > { %1891 = vmatprep.subr.bf16.mxu0 %v9572_v37  ;;  %8905 = vmatpush1.bf16.msra.mxu1 %v9623_v34  ;;  %v9624_v37 = vld [vmem:[%s12715_s3 + $0x124] ss:$8 sps:$4 sm:$0xff]   ;;  %v419_v34 = vsel %vm10513_vm5, 0, %v418_v33  ;;  %v9684_v33 = vld [vmem:[%s12715_s3 + $0x320] ss:$8 sps:$4 sm:$0xff]  }
  0x59   : > { %8890 = vmatprep.subr.bf16.mxu1 %v9624_v37  ;;  %v328_v37 = vld [vmem:[#allocation2 + $0x120] sm:$0x80]  ;;  %420 = vst [vmem:[#allocation2 + $0xe8] sm:$0x1] %v419_v34  ;;  %v358_v34 = vld [vmem:[#allocation2 + $0x210] sm:$0x80] }
  0x5b   : > { %1892 = vmatpush1.bf16.msra.mxu0 %v9570_v38  ;;  %v304_v38 = vld [vmem:[#allocation2 + $0x60] sm:$0x80] }
  0x5c   : > { %1893 = vmatprep.subr.bf16.mxu0 %v9575_v39  ;;  %v9797_v39 = vld [vmem:[%s12715_s3 + $0x614] ss:$8 sps:$4 sm:$0xff]  }
  0x5e   : > { %931 = vmatmul.mubr.bf16.gmra.mrb[4].mxu0 %v9527_v40  ;;  %v9626_v40 = vld [vmem:[%s12715_s3 + $0x120] ss:$8 sps:$4 sm:$0xff]  }
  0x5f   : > { %940 = vmatprep.mubr.bf16.mxu0 %v9528_v41  ;;  %1894 = vmatpush1.bf16.msra.mxu0 %v9573_v42  ;;  %v307_v41 = vld [vmem:[#allocation2 + $0x68] sm:$0x80]  ;;  %v305_v42 = vsel %vm10487_vm2, 0, %v304_v38 }
  0x60   : > { %1895 = vmatprep.subr.bf16.mxu0 %v9578_v43  ;;  %v308_v43 = vsel %vm10487_vm2, 0, %v307_v41  ;;  %306 = vst [vmem:[#allocation2 + $0x60] sm:$0x80] %v305_v42  ;;  %8906 = vmatpush1.bf16.msra.mxu1 %v9626_v40  ;;  %v9650_v40 = vld [vmem:[%s12715_s3 + $0x1a0] ss:$8 sps:$4 sm:$0xff]   ;;  %v329_v42 = vsel %vm10487_vm2, 0, %v328_v37 }
  0x61   : > { %309 = vst [vmem:[#allocation2 + $0x68] sm:$0x80] %v308_v43  ;;  %v331_v41 = vld [vmem:[#allocation2 + $0x128] sm:$0x80]  ;;  %330 = vst [vmem:[#allocation2 + $0x120] sm:$0x80] %v329_v42 }
  0x62   : > { %v332_v43 = vsel %vm10487_vm2, 0, %v331_v41  ;;  %v359_v37 = vsel %vm10487_vm2, 0, %v358_v34  ;;  %v451_v41 = vld [vmem:[#allocation2 + $0x200] sm:$0x1]  ;;  %v454_v42 = vld [vmem:[#allocation2 + $0x208] sm:$0x1] }
  0x63   : > { %1896 = vmatpush1.bf16.msra.mxu0 %v9576_v44  ;;  %v400_v44 = vld [vmem:[#allocation2 + $0x58] sm:$0x1]  ;;  %333 = vst [vmem:[#allocation2 + $0x128] sm:$0x80] %v332_v43  ;;  %360 = vst [vmem:[#allocation2 + $0x210] sm:$0x80] %v359_v37 }
  0x64   : > { %1897 = vmatprep.subr.bf16.mxu0 %v9581_v45  ;;  %v401_v45 = vsel %vm10513_vm5, 0, %v400_v44  ;;  %v9651_v44 = vld [vmem:[%s12715_s3 + $0x1b4] ss:$8 sps:$4 sm:$0xff]   ;;  %v452_v43 = vsel %vm10513_vm5, 0, %v451_v41  ;;  %v9758_v41 = vld [vmem:[%s12715_s3 + $0x3e4] ss:$8 sps:$4 sm:$0xff]  }
  0x65   : > { %402 = vst [vmem:[#allocation2 + $0x58] sm:$0x1] %v401_v45  ;;  %v9653_v45 = vld [vmem:[%s12715_s3 + $0x1b0] ss:$8 sps:$4 sm:$0xff]   ;;  %453 = vst [vmem:[#allocation2 + $0x200] sm:$0x1] %v452_v43 }
  0x66   : > { %941 = vmatmul.mubr.bf16.gmra.mrb[8].mxu0 %v9530_v46  ;;  %v397_v46 = vld [vmem:[#allocation2 + $0x50] sm:$0x1]  ;;  %v9752_v34 = vld [vmem:[%s12715_s3 + $0x3d4] ss:$8 sps:$4 sm:$0xff]  }
  0x67   : > { %950 = vmatprep.mubr.bf16.mxu0 %v9531_v47  ;;  %1898 = vmatpush1.bf16.msra.mxu0 %v9579_v48  ;;  %v9627_v47 = vld [vmem:[%s12715_s3 + $0x134] ss:$8 sps:$4 sm:$0xff]   ;;  %v398_v48 = vsel %vm10513_vm5, 0, %v397_v46  ;;  %v421_v46 = vld [vmem:[#allocation2 + $0x110] sm:$0x1] }
  0x68   : > { %1899 = vmatprep.subr.bf16.mxu0 %v9584_v49  ;;  %v9629_v49 = vld [vmem:[%s12715_s3 + $0x130] ss:$8 sps:$4 sm:$0xff]   ;;  %399 = vst [vmem:[#allocation2 + $0x50] sm:$0x1] %v398_v48  ;;  %8891 = vmatprep.subr.bf16.mxu1 %v9627_v47  ;;  %v422_v48 = vsel %vm10513_vm5, 0, %v421_v46 }
  0x69   : > { %8907 = vmatpush1.bf16.msra.mxu1 %v9629_v49  ;;  %v424_v47 = vld [vmem:[#allocation2 + $0x118] sm:$0x1]  ;;  %423 = vst [vmem:[#allocation2 + $0x110] sm:$0x1] %v422_v48  ;;  %v9696_v46 = vld [vmem:[%s12715_s3 + $0x340] ss:$8 sps:$4 sm:$0xff]  }
  0x6a   : > { %v425_v49 = vsel %vm10513_vm5, 0, %v424_v47  ;;  %v364_v47 = vld [vmem:[#allocation2 + $0x240] sm:$0x80]  ;;  %v367_v48 = vld [vmem:[#allocation2 + $0x248] sm:$0x80] }
  0x6b   : > { %1900 = vmatpush1.bf16.msra.mxu0 %v9582_v50  ;;  %v9563_v50 = vld [vmem:[%s10296_s13 + $0xd0] ss:$8 sps:$4 sm:$0xff]   ;;  %426 = vst [vmem:[#allocation2 + $0x118] sm:$0x1] %v425_v49  ;;  %v365_v49 = vsel %vm10487_vm2, 0, %v364_v47 }
  0x6c   : > { %1901 = vmatprep.subr.bf16.mxu0 %v9587_v51  ;;  %v9630_v51 = vld [vmem:[%s12715_s3 + $0x144] ss:$8 sps:$4 sm:$0xff]   ;;  %366 = vst [vmem:[#allocation2 + $0x240] sm:$0x80] %v365_v49 }
  0x6d   : > { %8892 = vmatprep.subr.bf16.mxu1 %v9630_v51  ;;  %v334_v51 = vld [vmem:[#allocation2 + $0x150] sm:$0x80] }
  0x6e   : > { %951 = vmatmul.mubr.bf16.gmra.mrb[12].mxu0 %v9533_v52  ;;  %v310_v52 = vld [vmem:[#allocation2 + $0x90] sm:$0x80] }
  0x6f   : > { %960 = vmatprep.mubr.bf16.mxu0 %v9534_v53  ;;  %1902 = vmatpush1.bf16.msra.mxu0 %v9585_v54  ;;  %v9564_v53 = vld [vmem:[%s10296_s13 + $0xe4] ss:$8 sps:$4 sm:$0xff]   ;;  %v9632_v54 = vld [vmem:[%s12715_s3 + $0x140] ss:$8 sps:$4 sm:$0xff]  }
  0x70   : > { %1903 = vmatprep.subr.bf16.mxu0 %v9590_v55  ;;  %v313_v55 = vld [vmem:[#allocation2 + $0x98] sm:$0x80]  ;;  %8908 = vmatpush1.bf16.msra.mxu1 %v9632_v54 }
  0x73   : > { %1904 = vmatpush1.bf16.msra.mxu0 %v9588_v56  ;;  %v314_v56 = vsel %vm10487_vm2, 0, %v313_v55  ;;  %v335_v55 = vsel %vm10487_vm2, 0, %v334_v51  ;;  %v9704_v51 = vld [vmem:[%s12715_s3 + $0x354] ss:$8 sps:$4 sm:$0xff]  }
  0x74   : > { %1905 = vmatprep.subr.bf16.mxu0 %v9593_v57  ;;  %v311_v57 = vsel %vm10487_vm2, 0, %v310_v52  ;;  %315 = vst [vmem:[#allocation2 + $0x98] sm:$0x80] %v314_v56  ;;  %v9656_v52 = vld [vmem:[%s12715_s3 + $0x1c0] ss:$8 sps:$4 sm:$0xff]  }
  0x75   : > { %312 = vst [vmem:[#allocation2 + $0x90] sm:$0x80] %v311_v57  ;;  %336 = vst [vmem:[#allocation2 + $0x150] sm:$0x80] %v335_v55  ;;  %v9657_v56 = vld [vmem:[%s12715_s3 + $0x1d4] ss:$8 sps:$4 sm:$0xff]  }
  0x76   : > { %961 = vmatmul.mubr.bf16.gmra.mrb[16].mxu0 %v9536_v58  ;;  %v403_v58 = vld [vmem:[#allocation2 + $0x80] sm:$0x1]  ;;  %v9659_v57 = vld [vmem:[%s12715_s3 + $0x1d0] ss:$8 sps:$4 sm:$0xff]  }
  0x77   : > { %970 = vmatprep.mubr.bf16.mxu0 %v9537_v59  ;;  %1906 = vmatpush1.bf16.msra.mxu0 %v9591_v60  ;;  %v9633_v59 = vld [vmem:[%s12715_s3 + $0x154] ss:$8 sps:$4 sm:$0xff]   ;;  %v9635_v60 = vld [vmem:[%s12715_s3 + $0x150] ss:$8 sps:$4 sm:$0xff]  }
  0x78   : > { %1907 = vmatprep.subr.bf16.mxu0 %v9596_v61  ;;  %v9566_v61 = vld [vmem:[%s10296_s13 + $0xe0] ss:$8 sps:$4 sm:$0xff]   ;;  %8893 = vmatprep.subr.bf16.mxu1 %v9633_v59 }
  0x79   : > { %8909 = vmatpush1.bf16.msra.mxu1 %v9635_v60  ;;  %v430_v59 = vld [vmem:[#allocation2 + $0x148] sm:$0x1] }
  0x7b   : > { %1908 = vmatpush1.bf16.msra.mxu0 %v9594_v62  ;;  %v406_v62 = vld [vmem:[#allocation2 + $0x88] sm:$0x1] }
  0x7c   : > { %1909 = vmatprep.subr.bf16.mxu0 %v9599_v63  ;;  %v404_v63 = vsel %vm10513_vm5, 0, %v403_v58  ;;  %v427_v58 = vld [vmem:[#allocation2 + $0x140] sm:$0x1] }
  0x7d   : > { %405 = vst [vmem:[#allocation2 + $0x80] sm:$0x1] %v404_v63  ;;  %v428_v60 = vsel %vm10513_vm5, 0, %v427_v58  ;;  %v340_v63 = vld [vmem:[#allocation2 + $0x180] sm:$0x80] }
  0x7e   : > { %971 = vmatmul.mubr.bf16.gmra.mrb[20].mxu0 %v9539_v0  ;;  %v1210_v0 = vld [vmem:[#allocation2 + $0x8] sm:$0x80]  ;;  %429 = vst [vmem:[#allocation2 + $0x140] sm:$0x1] %v428_v60  ;;  %v9708_v58 = vld [vmem:[%s12715_s3 + $0x360] ss:$8 sps:$4 sm:$0xff]  }
  0x7f   : > { %980 = vmatprep.mubr.bf16.mxu0 %v9540_v1  ;;  %1910 = vmatpush1.bf16.msra.mxu0 %v9597_v2  ;;  %v407_v1 = vsel %vm10513_vm5, 0, %v406_v62  ;;  %v9609_v2 = vld [vmem:[%s10296_s13 + $0xf4] ss:$8 sps:$4 sm:$0xff]   ;;  %v9660_v62 = vld [vmem:[%s12715_s3 + $0x1e4] ss:$8 sps:$4 sm:$0xff]  }
  0x80   : > { %1911 = vmatprep.subr.bf16.mxu0 %v9602_v3  ;;  %v9636_v3 = vld [vmem:[%s12715_s3 + $0x164] ss:$8 sps:$4 sm:$0xff]   ;;  %408 = vst [vmem:[#allocation2 + $0x88] sm:$0x1] %v407_v1  ;;  %v373_v60 = vld [vmem:[#allocation2 + $0x278] sm:$0x80] }
  0x81   : > { %8894 = vmatprep.subr.bf16.mxu1 %v9636_v3  ;;  %v343_v1 = vld [vmem:[#allocation2 + $0x188] sm:$0x80] }
  0x82   : > { %v344_v3 = vsel %vm10487_vm2, 0, %v343_v1  ;;  %v463_v1 = vld [vmem:[#allocation2 + $0x260] sm:$0x1] }
  0x83   : > { %1912 = vmatpush1.bf16.msra.mxu0 %v9600_v4  ;;  %v316_v4 = vld [vmem:[#allocation2 + $0xc0] sm:$0x80]  ;;  %345 = vst [vmem:[#allocation2 + $0x188] sm:$0x80] %v344_v3  ;;  %v464_v3 = vsel %vm10513_vm5, 0, %v463_v1 }
  0x84   : > { %1913 = vmatprep.subr.bf16.mxu0 %v9605_v15  ;;  %465 = vst [vmem:[#allocation2 + $0x260] sm:$0x1] %v464_v3 }
  0x86   : > { %981 = vmatmul.mubr.bf16.gmra.mrb[24].mxu0 %v9542_v5  ;;  %v9638_v5 = vld [vmem:[%s12715_s3 + $0x160] ss:$8 sps:$4 sm:$0xff]  }
  0x87   : > { %990 = vmatprep.mubr.bf16.mxu0 %v9543_v6  ;;  %1914 = vmatpush1.bf16.msra.mxu0 %v9603_v16  ;;  %v319_v6 = vld [vmem:[#allocation2 + $0xc8] sm:$0x80]  ;;  %v1209_v16 = vld [vmem:[#allocation2] sm:$0x80] }
  0x88   : > { %1915 = vmatprep.subr.bf16.mxu0 %v9608_v17  ;;  %8910 = vmatpush1.bf16.msra.mxu1 %v9638_v5  ;;  %v9665_v5 = vld [vmem:[%s12715_s3 + $0x1f0] ss:$8 sps:$4 sm:$0xff]  }
  0x8b   : > { %1916 = vmatpush1.bf16.msra.mxu0 %v9606_v19  ;;  %v9611_v19 = vld [vmem:[%s10296_s13 + $0xf0] ss:$8 sps:$4 sm:$0xff]  }
  0x8c   : > { %1917 = vmatprep.subr.bf16.mxu0 %v9614_v22  ;;  %v1282_v22 = vshrl.u32 %v1209_v16, 16  ;;  %v442_v16 = vld [vmem:[#allocation2 + $0x1a8] sm:$0x1] }
  0x8e   : > { %991 = vmatmul.mubr.bf16.gmra.mrb[28].mxu0 %v9545_v7  ;;  %v317_v7 = vsel %vm10487_vm2, 0, %v316_v4  ;;  %v9663_v4 = vld [vmem:[%s12715_s3 + $0x1f4] ss:$8 sps:$4 sm:$0xff]  }
  0x8f   : > { %1000 = vmatprep.mubr.bf16.mxu0 %v9546_v8  ;;  %1918 = vmatpush1.bf16.msra.mxu0 %v9612_v23  ;;  %v1294_v8 = vshrl.u32 %v1210_v0, 16  ;;  %318 = vst [vmem:[#allocation2 + $0xc0] sm:$0x80] %v317_v7  ;;  %v9644_v23 = vld [vmem:[%s12715_s3 + $0x180] ss:$8 sps:$4 sm:$0xff]  }
  0x90   : > { %1919 = vmatprep.subr.bf16.mxu0 %v9620_v30  ;;  %v1284_v30 = vrot.slane %v1282_v22, 7  ;;  %v9662_v0 = vld [vmem:[%s12715_s3 + $0x1e0] ss:$8 sps:$4 sm:$0xff]   ;;  %v436_v7 = vld [vmem:[#allocation2 + $0x178] sm:$0x1] }
  0x91   : > { %v1296_v15 = vrot.slane %v1294_v8, 7  ;;  %v355_v22 = vld [vmem:[#allocation2 + $0x1e8] sm:$0x80] }
  0x92   : > { %v356_v24 = vsel %vm10487_vm2, 0, %v355_v22  ;;  %v472_v22 = vld [vmem:[#allocation2 + $0x298] sm:$0x1] }
  0x93   : > { %1920 = vmatpush1.bf16.msra.mxu0 %v9618_v32  ;;  %v415_v32 = vld [vmem:[#allocation2 + $0xe0] sm:$0x1]  ;;  %357 = vst [vmem:[#allocation2 + $0x1e8] sm:$0x80] %v356_v24  ;;  %v9738_v24 = vld [vmem:[%s12715_s3 + $0x3b0] ss:$8 sps:$4 sm:$0xff]  }
  0x96   : > { %1001 = vmatmul.mubr.bf16.gmra.mrb[32].mxu0 %v9548_v9  ;;  %v1300_v9 = vrot.slane %v10163_v18, 7 }
  0x97   : > { %1010 = vmatprep.mubr.bf16.mxu0 %v9549_v10  ;;  %v320_v10 = vsel %vm10487_vm2, 0, %v319_v6  ;;  %v433_v6 = vld [vmem:[#allocation2 + $0x170] sm:$0x1] }
  0x98   : > { %321 = vst [vmem:[#allocation2 + $0xc8] sm:$0x80] %v320_v10  ;;  %v1304_v25 = vsel %vm395_vm3, %v1296_v15, %v1300_v9  ;;  %v1292_v38 = vsel %vm395_vm3, %v1284_v30, %v1300_v9  ;;  %v434_v8 = vsel %vm10513_vm5, 0, %v433_v6  ;;  %v437_v9 = vsel %vm10513_vm5, 0, %v436_v7  ;;  %v9668_v10 = vld [vmem:[%s12715_s3 + $0x404] ss:$8 sps:$4 sm:$0xff]  }
  0x99   : > { %435 = vst [vmem:[#allocation2 + $0x170] sm:$0x1] %v434_v8  ;;  %438 = vst [vmem:[#allocation2 + $0x178] sm:$0x1] %v437_v9  ;;  %v439_v15 = vld [vmem:[#allocation2 + $0x1a0] sm:$0x1] }
  0x9a   : > { %v9720_v6 = vld [vmem:[%s12715_s3 + $0x380] ss:$8 sps:$4 sm:$0xff]   ;;  %v376_v7 = vld [vmem:[#allocation2 + $0x2a0] sm:$0x80]  ;;  %v379_v8 = vld [vmem:[#allocation2 + $0x2a8] sm:$0x80] }
  0x9b   : > { %v377_v9 = vsel %vm10487_vm2, 0, %v376_v7 }
  0x9c   : > { %378 = vst [vmem:[#allocation2 + $0x2a0] sm:$0x80] %v377_v9 }
  0x9e   : > { %1011 = vmatmul.mubr.bf16.gmra.mrb[36].mxu0 %v9551_v11  ;;  %v9639_v11 = vld [vmem:[%s12715_s3 + $0x174] ss:$8 sps:$4 sm:$0xff]  }
  0x9f   : > { %1020 = vmatprep.mubr.bf16.mxu0 %v9552_v12  ;;  %v409_v12 = vld [vmem:[#allocation2 + $0xb0] sm:$0x1]  ;;  %8895 = vmatprep.subr.bf16.mxu1 %v9639_v11  ;;  %v346_v11 = vld [vmem:[#allocation2 + $0x1b0] sm:$0x80] }
  0xa0   : > { %v410_v18 = vsel %vm10513_vm5, 0, %v409_v12  ;;  %v349_v12 = vld [vmem:[#allocation2 + $0x1b8] sm:$0x80] }
  0xa1   : > { %411 = vst [vmem:[#allocation2 + $0xb0] sm:$0x1] %v410_v18  ;;  %v9674_v18 = vld [vmem:[%s12715_s3 + $0x304] ss:$8 sps:$4 sm:$0xff]  }
  0xa2   : > { %2365 = vmatprep.subr.bf16.mxu0 %v9674_v18 }
  0xa6   : > { %1021 = vmatmul.mubr.bf16.gmra.mrb[40].mxu0 %v9554_v13  ;;  %v9641_v13 = vld [vmem:[%s12715_s3 + $0x170] ss:$8 sps:$4 sm:$0xff]  }
  0xa7   : > { %1030 = vmatprep.mubr.bf16.mxu0 %v9555_v14  ;;  %v412_v14 = vld [vmem:[#allocation2 + $0xb8] sm:$0x1]  ;;  %8911 = vmatpush1.bf16.msra.mxu1 %v9641_v13  ;;  %v350_v13 = vsel %vm10487_vm2, 0, %v349_v12 }
  0xa8   : > { %v413_v17 = vsel %vm10513_vm5, 0, %v412_v14  ;;  %v347_v14 = vsel %vm10487_vm2, 0, %v346_v11  ;;  %351 = vst [vmem:[#allocation2 + $0x1b8] sm:$0x80] %v350_v13  ;;  %v9728_v11 = vld [vmem:[%s12715_s3 + $0x394] ss:$8 sps:$4 sm:$0xff]  }
  0xa9   : > { %414 = vst [vmem:[#allocation2 + $0xb8] sm:$0x1] %v413_v17  ;;  %348 = vst [vmem:[#allocation2 + $0x1b0] sm:$0x80] %v347_v14  ;;  %v440_v17 = vsel %vm10513_vm5, 0, %v439_v15  ;;  %v558_v14 = vlaneseq }
  0xaa   : > { %441 = vst [vmem:[#allocation2 + $0x1a0] sm:$0x1] %v440_v17  ;;  %v9726_v12 = vld [vmem:[%s12715_s3 + $0x390] ss:$8 sps:$4 sm:$0xff]   ;;  %v9734_v13 = vld [vmem:[%s12715_s3 + $0x3a4] ss:$8 sps:$4 sm:$0xff]  }
  0xab   : > { %v9732_v15 = vld [vmem:[%s12715_s3 + $0x3a0] ss:$8 sps:$4 sm:$0xff]   ;;  %v385_v17 = vld [vmem:[#allocation2 + $0x2d8] sm:$0x80] }
  0xac   : > { %v386_v18 = vsel %vm10487_vm2, 0, %v385_v17 }
  0xad   : > { %387 = vst [vmem:[#allocation2 + $0x2d8] sm:$0x80] %v386_v18 }
  0xae   : > { %1031 = vmatmul.mubr.bf16.gmra.mrb[44].mxu0 %v9557_v20  ;;  %v9642_v20 = vld [vmem:[%s12715_s3 + $0x184] ss:$8 sps:$4 sm:$0xff]  }
  0xaf   : > { %1040 = vmatprep.mubr.bf16.mxu0 %v9558_v21  ;;  %v322_v21 = vld [vmem:[#allocation2 + $0xf0] sm:$0x80]  ;;  %8896 = vmatprep.subr.bf16.mxu1 %v9642_v20  ;;  %v9672_v20 = vld [vmem:[%s12715_s3 + $0x300] ss:$8 sps:$4 sm:$0xff]  }
  0xb0   : > { %v323_v28 = vsel %vm10487_vm2, 0, %v322_v21  ;;  %8912 = vmatpush1.bf16.msra.mxu1 %v9644_v23  ;;  %v352_v21 = vld [vmem:[#allocation2 + $0x1e0] sm:$0x80] }
  0xb1   : > { %324 = vst [vmem:[#allocation2 + $0xf0] sm:$0x80] %v323_v28  ;;  %8897 = vmatprep.subr.bf16.mxu1 %v9645_v29  ;;  %v353_v23 = vsel %vm10487_vm2, 0, %v352_v21  ;;  %v445_v28 = vld [vmem:[#allocation2 + $0x1d0] sm:$0x1] }
  0xb2   : > { %354 = vst [vmem:[#allocation2 + $0x1e0] sm:$0x80] %v353_v23  ;;  %v448_v29 = vld [vmem:[#allocation2 + $0x1d8] sm:$0x1]  ;;  %v446_v30 = vsel %vm10513_vm5, 0, %v445_v28  ;;  %v559_v23 = vshrl.u32 %v558_v14, 7 }
  0xb3   : > { %447 = vst [vmem:[#allocation2 + $0x1d0] sm:$0x1] %v446_v30  ;;  %v9740_v21 = vld [vmem:[%s12715_s3 + $0x3b4] ss:$8 sps:$4 sm:$0xff]   ;;  %v9746_v28 = vld [vmem:[%s12715_s3 + $0x3c4] ss:$8 sps:$4 sm:$0xff]  }
  0xb4   : > { %8913 = vmatpush1.bf16.msra.mxu1 %v9647_v31  ;;  %v9686_v31 = vld [vmem:[%s12715_s3 + $0x324] ss:$8 sps:$4 sm:$0xff]   ;;  %v9744_v30 = vld [vmem:[%s12715_s3 + $0x3c0] ss:$8 sps:$4 sm:$0xff]  }
  0xb6   : > { %1041 = vmatmul.mubr.bf16.gmra.mrb[48].mxu0 %v9560_v35  ;;  %v416_v35 = vsel %vm10513_vm5, 0, %v415_v32  ;;  %v449_v32 = vsel %vm10513_vm5, 0, %v448_v29  ;;  %v10792_v29 = vsub.s32 0, %v559_v23 }
  0xb7   : > { %1050 = vmatprep.mubr.bf16.mxu0 %v9561_v36  ;;  %v9648_v36 = vld [vmem:[%s12715_s3 + $0x1a4] ss:$8 sps:$4 sm:$0xff]   ;;  %417 = vst [vmem:[#allocation2 + $0xe0] sm:$0x1] %v416_v35  ;;  %450 = vst [vmem:[#allocation2 + $0x1d8] sm:$0x1] %v449_v32 }
  0xb8   : > { %8898 = vmatprep.subr.bf16.mxu1 %v9648_v36  ;;  %v361_v35 = vld [vmem:[#allocation2 + $0x218] sm:$0x80]  ;;  %12738 = vst [vmem:[#allocation8_spill] sm:$0xff] %v10792_v29  ;;  %v10800_v32 = vsub.s32 1, %v559_v23  ;;  %v1218_v23 = vld [vmem:[#allocation2 + $0x68] sm:$0x80] }
  0xb9   : > { %8914 = vmatpush1.bf16.msra.mxu1 %v9650_v40  ;;  %v362_v36 = vsel %vm10487_vm2, 0, %v361_v35  ;;  %v9690_v40 = vld [vmem:[%s12715_s3 + $0x330] ss:$8 sps:$4 sm:$0xff]  }
  0xba   : > { %8899 = vmatprep.subr.bf16.mxu1 %v9651_v44  ;;  %363 = vst [vmem:[#allocation2 + $0x218] sm:$0x80] %v362_v36  ;;  %v9698_v44 = vld [vmem:[%s12715_s3 + $0x344] ss:$8 sps:$4 sm:$0xff]   ;;  %12739 = vst [vmem:[#allocation9_spill] sm:$0xff] %v10800_v32 }
  0xbb   : > { %v475_v36 = vld [vmem:[#allocation2 + $0x2c0] sm:$0x1] }
  0xbc   : > { %v476_v43 = vsel %vm10513_vm5, 0, %v475_v36  ;;  %v1342_v36 = vshrl.u32 %v1218_v23, 16 }
  0xbd   : > { %8915 = vmatpush1.bf16.msra.mxu1 %v9653_v45  ;;  %v455_v45 = vsel %vm10513_vm5, 0, %v454_v42  ;;  %477 = vst [vmem:[#allocation2 + $0x2c0] sm:$0x1] %v476_v43 }
  0xbe   : > { %1051 = vmatmul.mubr.bf16.gmra.mrb[52].mxu0 %v9563_v50  ;;  %v9654_v50 = vld [vmem:[%s12715_s3 + $0x1c4] ss:$8 sps:$4 sm:$0xff]   ;;  %456 = vst [vmem:[#allocation2 + $0x208] sm:$0x1] %v455_v45 }
  0xbf   : > { %1060 = vmatprep.mubr.bf16.mxu0 %v9564_v53  ;;  %v337_v53 = vld [vmem:[#allocation2 + $0x158] sm:$0x80]  ;;  %8900 = vmatprep.subr.bf16.mxu1 %v9654_v50  ;;  %v368_v50 = vsel %vm10487_vm2, 0, %v367_v48 }
  0xc0   : > { %v338_v54 = vsel %vm10487_vm2, 0, %v337_v53  ;;  %369 = vst [vmem:[#allocation2 + $0x248] sm:$0x80] %v368_v50  ;;  %v457_v53 = vld [vmem:[#allocation2 + $0x230] sm:$0x1] }
  0xc1   : > { %8916 = vmatpush1.bf16.msra.mxu1 %v9656_v52  ;;  %339 = vst [vmem:[#allocation2 + $0x158] sm:$0x80] %v338_v54  ;;  %v9702_v52 = vld [vmem:[%s12715_s3 + $0x350] ss:$8 sps:$4 sm:$0xff]   ;;  %v458_v55 = vsel %vm10513_vm5, 0, %v457_v53 }
  0xc2   : > { %8901 = vmatprep.subr.bf16.mxu1 %v9657_v56  ;;  %v460_v54 = vld [vmem:[#allocation2 + $0x238] sm:$0x1]  ;;  %v9710_v56 = vld [vmem:[%s12715_s3 + $0x364] ss:$8 sps:$4 sm:$0xff]   ;;  %459 = vst [vmem:[#allocation2 + $0x230] sm:$0x1] %v458_v55 }
  0xc3   : > { %v9762_v53 = vld [vmem:[%s12715_s3 + $0x3f0] ss:$8 sps:$4 sm:$0xff]  }
  0xc5   : > { %8917 = vmatpush1.bf16.msra.mxu1 %v9659_v57  ;;  %v461_v57 = vsel %vm10513_vm5, 0, %v460_v54  ;;  %v9764_v54 = vld [vmem:[%s12715_s3 + $0x3f4] ss:$8 sps:$4 sm:$0xff]  }
  0xc6   : > { %1061 = vmatmul.mubr.bf16.gmra.mrb[56].mxu0 %v9566_v61  ;;  %v431_v61 = vsel %vm10513_vm5, 0, %v430_v59  ;;  %8902 = vmatprep.subr.bf16.mxu1 %v9660_v62  ;;  %v370_v59 = vld [vmem:[#allocation2 + $0x270] sm:$0x80]  ;;  %462 = vst [vmem:[#allocation2 + $0x238] sm:$0x1] %v461_v57 }
  0xc7   : > { %1070 = vmatprep.mubr.bf16.mxu0 %v9609_v2  ;;  %432 = vst [vmem:[#allocation2 + $0x148] sm:$0x1] %v431_v61  ;;  %v341_v2 = vsel %vm10487_vm2, 0, %v340_v63  ;;  %v374_v61 = vsel %vm10487_vm2, 0, %v373_v60  ;;  %v371_v62 = vsel %vm10487_vm2, 0, %v370_v59 }
  0xc8   : > { %342 = vst [vmem:[#allocation2 + $0x180] sm:$0x80] %v341_v2  ;;  %v9716_v63 = vld [vmem:[%s12715_s3 + $0x374] ss:$8 sps:$4 sm:$0xff]   ;;  %375 = vst [vmem:[#allocation2 + $0x278] sm:$0x80] %v374_v61 }
  0xc9   : > { %8918 = vmatpush1.bf16.msra.mxu1 %v9662_v0  ;;  %372 = vst [vmem:[#allocation2 + $0x270] sm:$0x80] %v371_v62  ;;  %v9714_v0 = vld [vmem:[%s12715_s3 + $0x370] ss:$8 sps:$4 sm:$0xff]   ;;  %v466_v2 = vld [vmem:[#allocation2 + $0x268] sm:$0x1] }
  0xca   : > { %8903 = vmatprep.subr.bf16.mxu1 %v9663_v4  ;;  %v9722_v4 = vld [vmem:[%s12715_s3 + $0x384] ss:$8 sps:$4 sm:$0xff]   ;;  %v1213_v57 = vld [vmem:[#allocation2 + $0x30] sm:$0x80]  ;;  %v484_v61 = vld [vmem:[#allocation2 + $0x2f8] sm:$0x1] }
  0xcd   : > { %8919 = vmatpush1.bf16.msra.mxu1 %v9665_v5  ;;  %v467_v5 = vsel %vm10513_vm5, 0, %v466_v2 }
  0xce   : > { %1071 = vmatmul.mubr.bf16.gmra.mrb[60].mxu0 %v9611_v19  ;;  %4161 = vmatprep.subr.bf16.mxu1 %v9668_v10  ;;  %v443_v19 = vsel %vm10513_vm5, 0, %v442_v16  ;;  %468 = vst [vmem:[#allocation2 + $0x268] sm:$0x1] %v467_v5  ;;  %v380_v10 = vsel %vm10487_vm2, 0, %v379_v8  ;;  %v382_v16 = vld [vmem:[#allocation2 + $0x2d0] sm:$0x80] }
  0xcf   : > { %1921 = vmatprep.mubr.bf16.mxu0 %v1304_v25  ;;  %444 = vst [vmem:[#allocation2 + $0x1a8] sm:$0x1] %v443_v19  ;;  %v9680_v25 = vld [vmem:[%s12715_s3 + $0x314] ss:$8 sps:$4 sm:$0xff]   ;;  %381 = vst [vmem:[#allocation2 + $0x2a8] sm:$0x80] %v380_v10 }
  0xd0   : > { %v383_v19 = vsel %vm10487_vm2, 0, %v382_v16 }
  0xd1   : > { %384 = vst [vmem:[#allocation2 + $0x2d0] sm:$0x80] %v383_v19 }
  0xd6   : > { %1922 = vmatmul.mubr.bf16.vlgmr.msra.gmra.mrb[64].mxu0 %v1292_v38  ;;  %v9692_v38 = vld [vmem:[%s12715_s3 + $0x334] ss:$8 sps:$4 sm:$0xff]  }
  0xd7   : > { %2366 = vmatpush1.bf16.msra.mxu0 %v9672_v20  ;;  %v469_v20 = vld [vmem:[#allocation2 + $0x290] sm:$0x1] }
  0xd8   : > { %2367 = vmatprep.subr.bf16.mxu0 %v9680_v25  ;;  %v473_v25 = vsel %vm10513_vm5, 0, %v472_v22 }
  0xd9   : > { %474 = vst [vmem:[#allocation2 + $0x298] sm:$0x1] %v473_v25 }
  0xdb   : > { %2368 = vmatpush1.bf16.msra.mxu0 %v9678_v27  ;;  %v470_v27 = vsel %vm10513_vm5, 0, %v469_v20 }
  0xdc   : > { %2369 = vmatprep.subr.bf16.mxu0 %v9686_v31  ;;  %471 = vst [vmem:[#allocation2 + $0x290] sm:$0x1] %v470_v27  ;;  %v278_v31 = vld [vmem:[%s12714_s2] sm:$0x3] }
  0xdd   : > { %v10809_v35 = vrot.slane %v278_v31, %v10792_v29  ;;  %v10812_v37 = vrot.slane %v278_v31, %v10800_v32 }
  0xdf   : > { %2370 = vmatpush1.bf16.msra.mxu0 %v9684_v33  ;;  %v9750_v33 = vld [vmem:[%s12715_s3 + $0x3d0] ss:$8 sps:$4 sm:$0xff]  }
  0xe0   : > { %2371 = vmatprep.subr.bf16.mxu0 %v9692_v38  ;;  %v478_v38 = vld [vmem:[#allocation2 + $0x2c8] sm:$0x1] }
  0xe1   : > { %v479_v42 = vsel %vm10513_vm5, 0, %v478_v38 }
  0xe2   : > { %480 = vst [vmem:[#allocation2 + $0x2c8] sm:$0x1] %v479_v42 }
  0xe3   : > { %2372 = vmatpush1.bf16.msra.mxu0 %v9690_v40 }
  0xe4   : > { %2373 = vmatprep.subr.bf16.mxu0 %v9698_v44 }
  0xe7   : > { %2374 = vmatpush1.bf16.msra.mxu0 %v9696_v46  ;;  %v9756_v46 = vld [vmem:[%s12715_s3 + $0x3e0] ss:$8 sps:$4 sm:$0xff]  }
  0xe8   : > { %2375 = vmatprep.subr.bf16.mxu0 %v9704_v51 }
  0xeb   : > { %2376 = vmatpush1.bf16.msra.mxu0 %v9702_v52  ;;  %v1214_v52 = vld [vmem:[#allocation2 + $0x38] sm:$0x80] }
  0xec   : > { %2377 = vmatprep.subr.bf16.mxu0 %v9710_v56  ;;  %v1318_v3 = vshrl.u32 %v1214_v52, 16  ;;  %v1344_v52 = vrot.slane %v1342_v36, 7 }
  0xee   : > { %v1320_v16 = vrot.slane %v1318_v3, 7 }
  0xef   : > { %2378 = vmatpush1.bf16.msra.mxu0 %v9708_v58  ;;  %v481_v58 = vld [vmem:[#allocation2 + $0x2f0] sm:$0x1] }
  0xf0   : > { %2379 = vmatprep.subr.bf16.mxu0 %v9716_v63  ;;  %v482_v62 = vsel %vm10513_vm5, 0, %v481_v58 }
  0xf1   : > { %483 = vst [vmem:[#allocation2 + $0x2f0] sm:$0x1] %v482_v62 }
  0xf3   : > { %2380 = vmatpush1.bf16.msra.mxu0 %v9714_v0  ;;  %v485_v0 = vsel %vm10513_vm5, 0, %v484_v61 }
  0xf4   : > { %2381 = vmatprep.subr.bf16.mxu0 %v9722_v4  ;;  %486 = vst [vmem:[#allocation2 + $0x2f8] sm:$0x1] %v485_v0 }
  0xf7   : > { %2382 = vmatpush1.bf16.msra.mxu0 %v9720_v6  ;;  %v1306_v6 = vshrl.u32 %v1213_v57, 16 }
  0xf8   : > { %2383 = vmatprep.subr.bf16.mxu0 %v9728_v11 }
  0xfb   : > { %2384 = vmatpush1.bf16.msra.mxu0 %v9726_v12 }
  0xfc   : > { %2385 = vmatprep.subr.bf16.mxu0 %v9734_v13 }
  0xff   : > { %2386 = vmatpush1.bf16.msra.mxu0 %v9732_v15 }
 0x100   : > { %2387 = vmatprep.subr.bf16.mxu0 %v9740_v21  ;;  %v1308_v21 = vrot.slane %v1306_v6, 7 }
 0x103   : > { %2388 = vmatpush1.bf16.msra.mxu0 %v9738_v24 }
 0x104   : > { %2389 = vmatprep.subr.bf16.mxu0 %v9746_v28  ;;  %v1217_v28 = vld [vmem:[#allocation2 + $0x60] sm:$0x80] }
 0x105   : > { %v1330_v42 = vshrl.u32 %v1217_v28, 16 }
 0x107   : > { %2390 = vmatpush1.bf16.msra.mxu0 %v9744_v30  ;;  %v1332_v57 = vrot.slane %v1330_v42, 7 }
 0x108   : > { %2391 = vmatprep.subr.bf16.mxu0 %v9752_v34 }
 0x10b   : > { %2392 = vmatpush1.bf16.msra.mxu0 %v9750_v33 }
 0x10c   : > { %2393 = vmatprep.subr.bf16.mxu0 %v9758_v41 }
 0x10f   : > { %2394 = vmatpush1.bf16.msra.mxu0 %v9756_v46 }
 0x110   : > { %2395 = vmatprep.subr.bf16.mxu0 %v9764_v54 }
 0x113   : > { %2396 = vmatpush1.bf16.msra.mxu0 %v9762_v53 }
 0x129   : > { %v922_v40 = vpop.f32.mrb[0].mxu0 }
 0x12a   : > { %v923_v44 = vadd.f32 %v922_v40, %v10809_v35  ;;  %v924_v45 = vpop.f32.mrb[1].mxu0 }
 0x12b   : > { %v925_v47 = vadd.f32 %v924_v45, %v10812_v37  ;;  %v926_v48 = vpop.f32.mrb[2].mxu0 }
 0x12c   : > { %v927_v49 = vadd.f32 %v926_v48, %v10809_v35  ;;  %v928_v50 = vpop.f32.mrb[3].mxu0  ;;  %v1081_v55 = vmax.f32 %v923_v44, 0.0 }
 0x12d   : > { %v929_v51 = vadd.f32 %v928_v50, %v10812_v37  ;;  %v1082_v59 = vmax.f32 %v925_v47, 0.0 }
 0x12e   : > { %v1083_v56 = vmax.f32 %v927_v49, 0.0 }
 0x12f   : > { %v1084_v60 = vmax.f32 %v929_v51, 0.0 }
 0x130   : > { %v1145_v63 = vpack.c.bf16 %v1083_v56, %v1081_v55 }
 0x131   : > { %v1146_v1 = vpack.c.bf16 %v1084_v60, %v1082_v59  ;;  %v932_v2 = vpop.f32.mrb[4].mxu0  ;;  %v1222_v59 = vld [vmem:[#allocation2 + $0x98] sm:$0x80] }
 0x132   : > { %1177 = vst [vmem:[#allocation2 + $0x40] sm:$0xff] %v1145_v63  ;;  %v933_v4 = vadd.f32 %v932_v2, %v10809_v35  ;;  %v934_v5 = vpop.f32.mrb[5].mxu0  ;;  %v1310_v7 = vshrl.u32 %v1145_v63, 16  ;;  %v1313_v14 = vshll.u32 %v1145_v63, 16  ;;  %v1221_v63 = vld [vmem:[#allocation2 + $0x90] sm:$0x80] }
 0x133   : > { %1178 = vst [vmem:[#allocation2 + $0x48] sm:$0xff] %v1146_v1  ;;  %v935_v8 = vadd.f32 %v934_v5, %v10812_v37  ;;  %v936_v9 = vpop.f32.mrb[6].mxu0  ;;  %v1322_v10 = vshrl.u32 %v1146_v1, 16  ;;  %v1325_v18 = vshll.u32 %v1146_v1, 16 }
 0x134   : > { %v937_v11 = vadd.f32 %v936_v9, %v10809_v35  ;;  %v938_v12 = vpop.f32.mrb[7].mxu0  ;;  %v1312_v13 = vrot.slane %v1310_v7, 7  ;;  %v1085_v19 = vmax.f32 %v933_v4, 0.0  ;;  %v1366_v4 = vshrl.u32 %v1222_v59, 16 }
 0x135   : > { %v939_v15 = vadd.f32 %v938_v12, %v10812_v37  ;;  %v1324_v17 = vrot.slane %v1322_v10, 7  ;;  %v1086_v24 = vmax.f32 %v935_v8, 0.0  ;;  %v1354_v8 = vshrl.u32 %v1221_v63, 16  ;;  %v1230_v63 = vld [vmem:[#allocation2 + $0xf8] sm:$0x80] }
 0x136   : > { %v1087_v20 = vmax.f32 %v937_v11, 0.0  ;;  %v1315_v22 = vor.u32 %v1313_v14, %v1312_v13 }
 0x137   : > { %v1088_v25 = vmax.f32 %v939_v15, 0.0  ;;  %v1327_v27 = vor.u32 %v1325_v18, %v1324_v17  ;;  %v1368_v18 = vrot.slane %v1366_v4, 7  ;;  %v1356_v23 = vrot.slane %v1354_v8, 7  ;;  %v1229_v4 = vld [vmem:[#allocation2 + $0xf0] sm:$0x80] }
 0x138   : > { %v1147_v30 = vpack.c.bf16 %v1087_v20, %v1085_v19  ;;  %v10848_v41 = vsel %vm395_vm3, %v1308_v21, %v1315_v22 }
 0x139   : > { %v1148_v31 = vpack.c.bf16 %v1088_v25, %v1086_v24  ;;  %v942_v33 = vpop.f32.mrb[8].mxu0  ;;  %v10843_v34 = vsel %vm395_vm3, %v1320_v16, %v1327_v27  ;;  %v1226_v25 = vld [vmem:[#allocation2 + $0xc8] sm:$0x80] }
 0x13a   : > { %1179 = vst [vmem:[#allocation2 + $0x70] sm:$0xff] %v1147_v30  ;;  %v943_v38 = vadd.f32 %v942_v33, %v10809_v35  ;;  %v944_v40 = vpop.f32.mrb[9].mxu0  ;;  %1931 = vmatprep.mubr.bf16.mxu0 %v10843_v34  ;;  %v1334_v43 = vshrl.u32 %v1147_v30, 16  ;;  %v1337_v50 = vshll.u32 %v1147_v30, 16  ;;  %v1390_v42 = vshrl.u32 %v1226_v25, 16 }
 0x13b   : > { %1180 = vst [vmem:[#allocation2 + $0x78] sm:$0xff] %v1148_v31  ;;  %v945_v44 = vadd.f32 %v944_v40, %v10812_v37  ;;  %v946_v45 = vpop.f32.mrb[10].mxu0  ;;  %1932 = vmatmul.mubr.bf16.gmra.mrb[68].mxu0 %v10848_v41  ;;  %v1346_v46 = vshrl.u32 %v1148_v31, 16  ;;  %v1349_v54 = vshll.u32 %v1148_v31, 16  ;;  %v1225_v31 = vld [vmem:[#allocation2 + $0xc0] sm:$0x80] }
 0x13c   : > { %v947_v47 = vadd.f32 %v946_v45, %v10809_v35  ;;  %v948_v48 = vpop.f32.mrb[11].mxu0  ;;  %v1336_v49 = vrot.slane %v1334_v43, 7  ;;  %v1089_v55 = vmax.f32 %v943_v38, 0.0 }
 0x13d   : > { %v949_v51 = vadd.f32 %v948_v48, %v10812_v37  ;;  %v1348_v53 = vrot.slane %v1346_v46, 7  ;;  %v1090_v60 = vmax.f32 %v945_v44, 0.0  ;;  %v1378_v46 = vshrl.u32 %v1225_v31, 16 }
 0x13e   : > { %v1091_v56 = vmax.f32 %v947_v47, 0.0  ;;  %v1339_v58 = vor.u32 %v1337_v50, %v1336_v49 }
 0x13f   : > { %v1092_v61 = vmax.f32 %v949_v51, 0.0  ;;  %v1351_v62 = vor.u32 %v1349_v54, %v1348_v53 }
 0x140   : > { %v1149_v0 = vpack.c.bf16 %v1091_v56, %v1089_v55  ;;  %v10860_v7 = vsel %vm395_vm3, %v1332_v57, %v1339_v58  ;;  %v1392_v56 = vrot.slane %v1390_v42, 7 }
 0x141   : > { %v1150_v1 = vpack.c.bf16 %v1092_v61, %v1090_v60  ;;  %v952_v2 = vpop.f32.mrb[12].mxu0  ;;  %v10855_v3 = vsel %vm395_vm3, %v1344_v52, %v1351_v62  ;;  %v1380_v61 = vrot.slane %v1378_v46, 7 }
 0x142   : > { %1181 = vst [vmem:[#allocation2 + $0xa0] sm:$0xff] %v1149_v0  ;;  %v953_v5 = vadd.f32 %v952_v2, %v10809_v35  ;;  %v954_v6 = vpop.f32.mrb[13].mxu0  ;;  %1941 = vmatprep.mubr.bf16.mxu0 %v10855_v3  ;;  %v1358_v9 = vshrl.u32 %v1149_v0, 16  ;;  %v1361_v16 = vshll.u32 %v1149_v0, 16 }
 0x143   : > { %1182 = vst [vmem:[#allocation2 + $0xa8] sm:$0xff] %v1150_v1  ;;  %v955_v10 = vadd.f32 %v954_v6, %v10812_v37  ;;  %v956_v11 = vpop.f32.mrb[14].mxu0  ;;  %1942 = vmatmul.mubr.bf16.gmra.mrb[72].mxu0 %v10860_v7  ;;  %v1370_v12 = vshrl.u32 %v1150_v1, 16  ;;  %v1373_v20 = vshll.u32 %v1150_v1, 16 }
 0x144   : > { %v957_v13 = vadd.f32 %v956_v11, %v10809_v35  ;;  %v958_v14 = vpop.f32.mrb[15].mxu0  ;;  %v1360_v15 = vrot.slane %v1358_v9, 7  ;;  %v1093_v21 = vmax.f32 %v953_v5, 0.0 }
 0x145   : > { %v959_v17 = vadd.f32 %v958_v14, %v10812_v37  ;;  %v1372_v19 = vrot.slane %v1370_v12, 7  ;;  %v1094_v27 = vmax.f32 %v955_v10, 0.0  ;;  %v1414_v10 = vshrl.u32 %v1230_v63, 16 }
 0x146   : > { %v1095_v22 = vmax.f32 %v957_v13, 0.0  ;;  %v1363_v24 = vor.u32 %v1361_v16, %v1360_v15  ;;  %v1402_v14 = vshrl.u32 %v1229_v4, 16 }
 0x147   : > { %v1096_v28 = vmax.f32 %v959_v17, 0.0  ;;  %v1375_v30 = vor.u32 %v1373_v20, %v1372_v19 }
 0x148   : > { %v1151_v33 = vpack.c.bf16 %v1095_v22, %v1093_v21  ;;  %v10872_v45 = vsel %vm395_vm3, %v1356_v23, %v1363_v24  ;;  %v1416_v24 = vrot.slane %v1414_v10, 7  ;;  %v1404_v31 = vrot.slane %v1402_v14, 7  ;;  %v1238_v10 = vld [vmem:[#allocation2 + $0x158] sm:$0x80] }
 0x149   : > { %v1152_v36 = vpack.c.bf16 %v1096_v28, %v1094_v27  ;;  %v962_v38 = vpop.f32.mrb[16].mxu0  ;;  %v10867_v40 = vsel %vm395_vm3, %v1368_v18, %v1375_v30 }
 0x14a   : > { %1183 = vst [vmem:[#allocation2 + $0xd0] sm:$0xff] %v1151_v33  ;;  %v963_v43 = vadd.f32 %v962_v38, %v10809_v35  ;;  %v964_v44 = vpop.f32.mrb[17].mxu0  ;;  %1951 = vmatprep.mubr.bf16.mxu0 %v10867_v40  ;;  %v1382_v47 = vshrl.u32 %v1151_v33, 16  ;;  %v1385_v54 = vshll.u32 %v1151_v33, 16 }
 0x14b   : > { %1184 = vst [vmem:[#allocation2 + $0xd8] sm:$0xff] %v1152_v36  ;;  %v965_v48 = vadd.f32 %v964_v44, %v10812_v37  ;;  %v966_v49 = vpop.f32.mrb[18].mxu0  ;;  %1952 = vmatmul.mubr.bf16.gmra.mrb[76].mxu0 %v10872_v45  ;;  %v1394_v50 = vshrl.u32 %v1152_v36, 16  ;;  %v1397_v58 = vshll.u32 %v1152_v36, 16  ;;  %v1234_v36 = vld [vmem:[#allocation2 + $0x128] sm:$0x80] }
 0x14c   : > { %v967_v51 = vadd.f32 %v966_v49, %v10809_v35  ;;  %v968_v52 = vpop.f32.mrb[19].mxu0  ;;  %v1384_v53 = vrot.slane %v1382_v47, 7  ;;  %v1097_v59 = vmax.f32 %v963_v43, 0.0  ;;  %v1233_v44 = vld [vmem:[#allocation2 + $0x120] sm:$0x80] }
 0x14d   : > { %v969_v55 = vadd.f32 %v968_v52, %v10812_v37  ;;  %v1396_v57 = vrot.slane %v1394_v50, 7  ;;  %v1098_v0 = vmax.f32 %v965_v48, 0.0  ;;  %v1438_v50 = vshrl.u32 %v1234_v36, 16 }
 0x14e   : > { %v1099_v60 = vmax.f32 %v967_v51, 0.0  ;;  %v1387_v62 = vor.u32 %v1385_v54, %v1384_v53  ;;  %v1426_v54 = vshrl.u32 %v1233_v44, 16 }
 0x14f   : > { %v1100_v1 = vmax.f32 %v969_v55, 0.0  ;;  %v1399_v2 = vor.u32 %v1397_v58, %v1396_v57 }
 0x150   : > { %v1153_v5 = vpack.c.bf16 %v1099_v60, %v1097_v59  ;;  %v10884_v13 = vsel %vm395_vm3, %v1380_v61, %v1387_v62 }
 0x151   : > { %v1154_v6 = vpack.c.bf16 %v1100_v1, %v1098_v0  ;;  %v972_v8 = vpop.f32.mrb[20].mxu0  ;;  %v10879_v9 = vsel %vm395_vm3, %v1392_v56, %v1399_v2  ;;  %v1440_v0 = vrot.slane %v1438_v50, 7 }
 0x152   : > { %1185 = vst [vmem:[#allocation2 + $0x100] sm:$0xff] %v1153_v5  ;;  %v973_v11 = vadd.f32 %v972_v8, %v10809_v35  ;;  %v974_v12 = vpop.f32.mrb[21].mxu0  ;;  %1961 = vmatprep.mubr.bf16.mxu0 %v10879_v9  ;;  %v1406_v15 = vshrl.u32 %v1153_v5, 16  ;;  %v1409_v22 = vshll.u32 %v1153_v5, 16 }
 0x153   : > { %1186 = vst [vmem:[#allocation2 + $0x108] sm:$0xff] %v1154_v6  ;;  %v975_v16 = vadd.f32 %v974_v12, %v10812_v37  ;;  %v976_v17 = vpop.f32.mrb[22].mxu0  ;;  %1962 = vmatmul.mubr.bf16.gmra.mrb[80].mxu0 %v10884_v13  ;;  %v1418_v18 = vshrl.u32 %v1154_v6, 16  ;;  %v1421_v27 = vshll.u32 %v1154_v6, 16  ;;  %v1428_v6 = vrot.slane %v1426_v54, 7 }
 0x154   : > { %v977_v19 = vadd.f32 %v976_v17, %v10809_v35  ;;  %v978_v20 = vpop.f32.mrb[23].mxu0  ;;  %v1408_v21 = vrot.slane %v1406_v15, 7  ;;  %v1101_v28 = vmax.f32 %v973_v11, 0.0  ;;  %v1237_v15 = vld [vmem:[#allocation2 + $0x150] sm:$0x80] }
 0x155   : > { %v979_v23 = vadd.f32 %v978_v20, %v10812_v37  ;;  %v1420_v25 = vrot.slane %v1418_v18, 7  ;;  %v1102_v38 = vmax.f32 %v975_v16, 0.0  ;;  %v1462_v20 = vshrl.u32 %v1238_v10, 16  ;;  %v1242_v54 = vld [vmem:[#allocation2 + $0x188] sm:$0x80] }
 0x156   : > { %v1103_v30 = vmax.f32 %v977_v19, 0.0  ;;  %v1411_v33 = vor.u32 %v1409_v22, %v1408_v21 }
 0x157   : > { %v1104_v42 = vmax.f32 %v979_v23, 0.0  ;;  %v1423_v43 = vor.u32 %v1421_v27, %v1420_v25 }
 0x158   : > { %v1155_v46 = vpack.c.bf16 %v1103_v30, %v1101_v28  ;;  %v10896_v53 = vsel %vm395_vm3, %v1404_v31, %v1411_v33 }
 0x159   : > { %v1156_v47 = vpack.c.bf16 %v1104_v42, %v1102_v38  ;;  %v982_v48 = vpop.f32.mrb[24].mxu0  ;;  %v10891_v49 = vsel %vm395_vm3, %v1416_v24, %v1423_v43  ;;  %v1450_v24 = vshrl.u32 %v1237_v15, 16  ;;  %v1464_v43 = vrot.slane %v1462_v20, 7  ;;  %v9669_v15 = vld [vmem:[%s12715_s3 + $0x410] ss:$8 sps:$4 sm:$0xff]  }
 0x15a   : > { %1187 = vst [vmem:[#allocation2 + $0x130] sm:$0xff] %v1155_v46  ;;  %v983_v51 = vadd.f32 %v982_v48, %v10809_v35  ;;  %v984_v52 = vpop.f32.mrb[25].mxu0  ;;  %1971 = vmatprep.mubr.bf16.mxu0 %v10891_v49  ;;  %v1430_v55 = vshrl.u32 %v1155_v46, 16  ;;  %v1433_v62 = vshll.u32 %v1155_v46, 16 }
 0x15b   : > { %1188 = vst [vmem:[#allocation2 + $0x138] sm:$0xff] %v1156_v47  ;;  %v985_v56 = vadd.f32 %v984_v52, %v10812_v37  ;;  %v986_v57 = vpop.f32.mrb[26].mxu0  ;;  %1972 = vmatmul.mubr.bf16.gmra.mrb[84].mxu0 %v10896_v53  ;;  %v1442_v58 = vshrl.u32 %v1156_v47, 16  ;;  %v1445_v2 = vshll.u32 %v1156_v47, 16  ;;  %v1241_v47 = vld [vmem:[#allocation2 + $0x180] sm:$0x80] }
 0x15c   : > { %v987_v59 = vadd.f32 %v986_v57, %v10809_v35  ;;  %v988_v60 = vpop.f32.mrb[27].mxu0  ;;  %v1432_v61 = vrot.slane %v1430_v55, 7  ;;  %v1105_v4 = vmax.f32 %v983_v51, 0.0  ;;  %v1452_v51 = vrot.slane %v1450_v24, 7 }
 0x15d   : > { %v989_v63 = vadd.f32 %v988_v60, %v10812_v37  ;;  %v1444_v1 = vrot.slane %v1442_v58, 7  ;;  %v1106_v11 = vmax.f32 %v985_v56, 0.0 }
 0x15e   : > { %v1107_v5 = vmax.f32 %v987_v59, 0.0  ;;  %v1435_v8 = vor.u32 %v1433_v62, %v1432_v61  ;;  %v1474_v59 = vshrl.u32 %v1241_v47, 16 }
 0x15f   : > { %v1108_v12 = vmax.f32 %v989_v63, 0.0  ;;  %v1447_v14 = vor.u32 %v1445_v2, %v1444_v1  ;;  %v9666_v63 = vld [vmem:[%s12715_s3 + $0x400] ss:$8 sps:$4 sm:$0xff]  }
 0x160   : > { %v1157_v16 = vpack.c.bf16 %v1107_v5, %v1105_v4  ;;  %v10908_v23 = vsel %vm395_vm3, %v1428_v6, %v1435_v8  ;;  %v9671_v5 = vld [vmem:[%s12715_s3 + $0x414] ss:$8 sps:$4 sm:$0xff]  }
 0x161   : > { %v1158_v17 = vpack.c.bf16 %v1108_v12, %v1106_v11  ;;  %v992_v18 = vpop.f32.mrb[28].mxu0  ;;  %v10903_v19 = vsel %vm395_vm3, %v1440_v0, %v1447_v14  ;;  %v1486_v0 = vshrl.u32 %v1242_v54, 16 }
 0x162   : > { %1189 = vst [vmem:[#allocation2 + $0x160] sm:$0xff] %v1157_v16  ;;  %v993_v21 = vadd.f32 %v992_v18, %v10809_v35  ;;  %v994_v22 = vpop.f32.mrb[29].mxu0  ;;  %1981 = vmatprep.mubr.bf16.mxu0 %v10903_v19  ;;  %v1454_v25 = vshrl.u32 %v1157_v16, 16  ;;  %v1457_v38 = vshll.u32 %v1157_v16, 16  ;;  %v1476_v16 = vrot.slane %v1474_v59, 7 }
 0x163   : > { %1190 = vst [vmem:[#allocation2 + $0x168] sm:$0xff] %v1158_v17  ;;  %v995_v27 = vadd.f32 %v994_v22, %v10812_v37  ;;  %v996_v28 = vpop.f32.mrb[30].mxu0  ;;  %1982 = vmatmul.mubr.bf16.gmra.mrb[88].mxu0 %v10908_v23  ;;  %v1466_v30 = vshrl.u32 %v1158_v17, 16  ;;  %v1469_v46 = vshll.u32 %v1158_v17, 16 }
 0x164   : > { %v997_v31 = vadd.f32 %v996_v28, %v10809_v35  ;;  %v998_v33 = vpop.f32.mrb[31].mxu0  ;;  %v1456_v36 = vrot.slane %v1454_v25, 7  ;;  %v1109_v48 = vmax.f32 %v993_v21, 0.0  ;;  %v1488_v21 = vrot.slane %v1486_v0, 7  ;;  %v1246_v25 = vld [vmem:[#allocation2 + $0x1b8] sm:$0x80] }
 0x165   : > { %v999_v42 = vadd.f32 %v998_v33, %v10812_v37  ;;  %v1468_v44 = vrot.slane %v1466_v30, 7  ;;  %v1110_v55 = vmax.f32 %v995_v27, 0.0  ;;  %v1245_v33 = vld [vmem:[#allocation2 + $0x1b0] sm:$0x80] }
 0x166   : > { %v1111_v50 = vmax.f32 %v997_v31, 0.0  ;;  %v1459_v52 = vor.u32 %v1457_v38, %v1456_v36  ;;  %v9677_v31 = vld [vmem:[%s12715_s3 + $0x424] ss:$8 sps:$4 sm:$0xff]  }
 0x167   : > { %v1112_v56 = vmax.f32 %v999_v42, 0.0  ;;  %v1471_v57 = vor.u32 %v1469_v46, %v1468_v44  ;;  %v1510_v44 = vshrl.u32 %v1246_v25, 16 }
 0x168   : > { %v1159_v58 = vpack.c.bf16 %v1111_v50, %v1109_v48  ;;  %v10925_v4 = vsel %vm395_vm3, %v1452_v51, %v1459_v52  ;;  %v9675_v50 = vld [vmem:[%s12715_s3 + $0x420] ss:$8 sps:$4 sm:$0xff]   ;;  %v1498_v51 = vshrl.u32 %v1245_v33, 16  ;;  %v9791_v52 = vld [vmem:[%s12715_s3 + $0x604] ss:$8 sps:$4 sm:$0xff]  }
 0x169   : > { %v10914_v60 = vpack.c.bf16 %v1112_v56, %v1110_v55  ;;  %v1002_v61 = vpop.f32.mrb[32].mxu0  ;;  %v10917_v62 = vsel %vm395_vm3, %v1464_v43, %v1471_v57  ;;  %v9683_v57 = vld [vmem:[%s12715_s3 + $0x434] ss:$8 sps:$4 sm:$0xff]   ;;  %2969 = vmatprep.subr.bf16.mxu0 %v9791_v52 }
 0x16a   : > { %1191 = vst [vmem:[#allocation2 + $0x190] sm:$0xff] %v1159_v58  ;;  %v1003_v1 = vadd.f32 %v1002_v61, %v10809_v35  ;;  %v1004_v2 = vpop.f32.mrb[33].mxu0  ;;  %1991 = vmatprep.mubr.bf16.mxu0 %v10917_v62  ;;  %v1478_v6 = vshrl.u32 %v1159_v58, 16  ;;  %v1481_v18 = vshll.u32 %v1159_v58, 16 }
 0x16b   : > { %1192 = vst [vmem:[#allocation2 + $0x198] sm:$0xff] %v10914_v60  ;;  %v1005_v8 = vadd.f32 %v1004_v2, %v10812_v37  ;;  %v1006_v10 = vpop.f32.mrb[34].mxu0  ;;  %1992 = vmatmul.mubr.bf16.gmra.mrb[92].mxu0 %v10925_v4  ;;  %3695 = vmatprep.mubr.bf16.mxu1 %v10914_v60  ;;  %v1490_v11 = vshrl.u32 %v10914_v60, 16  ;;  %v1493_v24 = vshll.u32 %v10914_v60, 16  ;;  %v9681_v2 = vld [vmem:[%s12715_s3 + $0x430] ss:$8 sps:$4 sm:$0xff]  }
 0x16c   : > { %v1007_v12 = vadd.f32 %v1006_v10, %v10809_v35  ;;  %v1008_v14 = vpop.f32.mrb[35].mxu0  ;;  %3696 = vmatmul.mubr.bf16.vlgmr.msra.gmra.mrb[0].mxu1 %v1159_v58  ;;  %v1480_v17 = vrot.slane %v1478_v6, 7  ;;  %v1113_v27 = vmax.f32 %v1003_v1, 0.0 }
 0x16d   : > { %v1009_v20 = vadd.f32 %v1008_v14, %v10812_v37  ;;  %4162 = vmatpush1.bf16.msra.mxu1 %v9666_v63  ;;  %v1492_v22 = vrot.slane %v1490_v11, 7  ;;  %v1114_v36 = vmax.f32 %v1005_v8, 0.0  ;;  %v1500_v14 = vrot.slane %v1498_v51, 7 }
 0x16e   : > { %v1115_v28 = vmax.f32 %v1007_v12, 0.0  ;;  %4163 = vmatprep.subr.bf16.mxu1 %v9671_v5  ;;  %v1483_v30 = vor.u32 %v1481_v18, %v1480_v17  ;;  %v1512_v5 = vrot.slane %v1510_v44, 7 }
 0x16f   : > { %v1116_v38 = vmax.f32 %v1009_v20, 0.0  ;;  %v1495_v42 = vor.u32 %v1493_v24, %v1492_v22  ;;  %v9689_v20 = vld [vmem:[%s12715_s3 + $0x444] ss:$8 sps:$4 sm:$0xff]  }
 0x170   : > { %v10944_v43 = vpack.c.bf16 %v1115_v28, %v1113_v27  ;;  %v10961_v56 = vsel %vm395_vm3, %v1476_v16, %v1483_v30 }
 0x171   : > { %v10946_v46 = vpack.c.bf16 %v1116_v38, %v1114_v36  ;;  %v1012_v47 = vpop.f32.mrb[36].mxu0  ;;  %4164 = vmatpush1.bf16.msra.mxu1 %v9669_v15  ;;  %v10949_v48 = vsel %vm395_vm3, %v1488_v21, %v1495_v42  ;;  %v1249_v15 = vld [vmem:[#allocation2 + $0x1e0] sm:$0x80]  ;;  %v1250_v21 = vld [vmem:[#allocation2 + $0x1e8] sm:$0x80] }
 0x172   : > { %1193 = vst [vmem:[#allocation2 + $0x1c0] sm:$0xff] %v10944_v43  ;;  %v1013_v54 = vadd.f32 %v1012_v47, %v10809_v35  ;;  %v1014_v55 = vpop.f32.mrb[37].mxu0  ;;  %2001 = vmatprep.mubr.bf16.mxu0 %v10949_v48  ;;  %4165 = vmatprep.subr.bf16.mxu1 %v9677_v31  ;;  %v1502_v58 = vshrl.u32 %v10944_v43, 16  ;;  %v1505_v8 = vshll.u32 %v10944_v43, 16  ;;  %v1522_v28 = vshrl.u32 %v1249_v15, 16 }
 0x173   : > { %1194 = vst [vmem:[#allocation2 + $0x1c8] sm:$0xff] %v10946_v46  ;;  %v1015_v59 = vadd.f32 %v1014_v55, %v10812_v37  ;;  %v1016_v61 = vpop.f32.mrb[38].mxu0  ;;  %2002 = vmatmul.mubr.bf16.gmra.mrb[96].mxu0 %v10961_v56  ;;  %3705 = vmatprep.mubr.bf16.mxu1 %v10946_v46  ;;  %v1514_v63 = vshrl.u32 %v10946_v46, 16  ;;  %v1517_v12 = vshll.u32 %v10946_v46, 16  ;;  %v9687_v36 = vld [vmem:[%s12715_s3 + $0x440] ss:$8 sps:$4 sm:$0xff]  }
 0x174   : > { %v1017_v0 = vadd.f32 %v1016_v61, %v10809_v35  ;;  %v1018_v1 = vpop.f32.mrb[39].mxu0  ;;  %3706 = vmatmul.mubr.bf16.gmra.mrb[4].mxu1 %v10944_v43  ;;  %v1504_v6 = vrot.slane %v1502_v58, 7  ;;  %v1117_v16 = vmax.f32 %v1013_v54, 0.0  ;;  %v1534_v38 = vshrl.u32 %v1250_v21, 16  ;;  %v1253_v15 = vld [vmem:[#allocation2 + $0x210] sm:$0x80] }
 0x175   : > { %v1019_v10 = vadd.f32 %v1018_v1, %v10812_v37  ;;  %4166 = vmatpush1.bf16.msra.mxu1 %v9675_v50  ;;  %v1516_v11 = vrot.slane %v1514_v63, 7  ;;  %v1118_v22 = vmax.f32 %v1015_v59, 0.0  ;;  %v9695_v50 = vld [vmem:[%s12715_s3 + $0x454] ss:$8 sps:$4 sm:$0xff]   ;;  %v9693_v59 = vld [vmem:[%s12715_s3 + $0x450] ss:$8 sps:$4 sm:$0xff]  }
 0x176   : > { %v1119_v17 = vmax.f32 %v1017_v0, 0.0  ;;  %4167 = vmatprep.subr.bf16.mxu1 %v9683_v57  ;;  %v1507_v18 = vor.u32 %v1505_v8, %v1504_v6  ;;  %v1524_v61 = vrot.slane %v1522_v28, 7  ;;  %v1254_v8 = vld [vmem:[#allocation2 + $0x218] sm:$0x80]  ;;  %v9699_v28 = vld [vmem:[%s12715_s3 + $0x460] ss:$8 sps:$4 sm:$0xff]  }
 0x177   : > { %v1120_v24 = vmax.f32 %v1019_v10, 0.0  ;;  %v1519_v25 = vor.u32 %v1517_v12, %v1516_v11  ;;  %v1558_v21 = vshrl.u32 %v1254_v8, 16 }
 0x178   : > { %v10983_v27 = vpack.c.bf16 %v1119_v17, %v1117_v16  ;;  %v10997_v47 = vsel %vm395_vm3, %v1500_v14, %v1507_v18  ;;  %v9701_v14 = vld [vmem:[%s12715_s3 + $0x464] ss:$8 sps:$4 sm:$0xff]  }
 0x179   : > { %v10985_v30 = vpack.c.bf16 %v1120_v24, %v1118_v22  ;;  %v1022_v31 = vpop.f32.mrb[40].mxu0  ;;  %4168 = vmatpush1.bf16.msra.mxu1 %v9681_v2  ;;  %v10988_v33 = vsel %vm395_vm3, %v1512_v5, %v1519_v25  ;;  %v1536_v2 = vrot.slane %v1534_v38, 7 }
 0x17a   : > { %1195 = vst [vmem:[#allocation2 + $0x1f0] sm:$0xff] %v10983_v27  ;;  %v1023_v42 = vadd.f32 %v1022_v31, %v10809_v35  ;;  %v1024_v44 = vpop.f32.mrb[41].mxu0  ;;  %2011 = vmatprep.mubr.bf16.mxu0 %v10988_v33  ;;  %4169 = vmatprep.subr.bf16.mxu1 %v9689_v20  ;;  %v1526_v51 = vshrl.u32 %v10983_v27, 16  ;;  %v1529_v0 = vshll.u32 %v10983_v27, 16  ;;  %v1546_v31 = vshrl.u32 %v1253_v15, 16 }
 0x17b   : > { %1196 = vst [vmem:[#allocation2 + $0x1f8] sm:$0xff] %v10985_v30  ;;  %v1025_v52 = vadd.f32 %v1024_v44, %v10812_v37  ;;  %v1026_v54 = vpop.f32.mrb[42].mxu0  ;;  %2012 = vmatmul.mubr.bf16.gmra.mrb[100].mxu0 %v10997_v47  ;;  %3715 = vmatprep.mubr.bf16.mxu1 %v10985_v30  ;;  %v1538_v55 = vshrl.u32 %v10985_v30, 16  ;;  %v1541_v6 = vshll.u32 %v10985_v30, 16  ;;  %v9707_v44 = vld [vmem:[%s12715_s3 + $0x474] ss:$8 sps:$4 sm:$0xff]  }
 0x17c   : > { %v1027_v57 = vadd.f32 %v1026_v54, %v10809_v35  ;;  %v1028_v58 = vpop.f32.mrb[43].mxu0  ;;  %3716 = vmatmul.mubr.bf16.gmra.mrb[8].mxu1 %v10983_v27  ;;  %v1528_v63 = vrot.slane %v1526_v51, 7  ;;  %v1121_v10 = vmax.f32 %v1023_v42, 0.0 }
 0x17d   : > { %v1029_v1 = vadd.f32 %v1028_v58, %v10812_v37  ;;  %4170 = vmatpush1.bf16.msra.mxu1 %v9687_v36  ;;  %v1540_v5 = vrot.slane %v1538_v55, 7  ;;  %v1122_v16 = vmax.f32 %v1025_v52, 0.0  ;;  %v1560_v58 = vrot.slane %v1558_v21, 7 }
 0x17e   : > { %v1123_v11 = vmax.f32 %v1027_v57, 0.0  ;;  %4171 = vmatprep.subr.bf16.mxu1 %v9695_v50  ;;  %v1531_v12 = vor.u32 %v1529_v0, %v1528_v63  ;;  %v9705_v0 = vld [vmem:[%s12715_s3 + $0x470] ss:$8 sps:$4 sm:$0xff]  }
 0x17f   : > { %v1124_v17 = vmax.f32 %v1029_v1, 0.0  ;;  %v1543_v18 = vor.u32 %v1541_v6, %v1540_v5  ;;  %v1548_v5 = vrot.slane %v1546_v31, 7  ;;  %v9711_v31 = vld [vmem:[%s12715_s3 + $0x480] ss:$8 sps:$4 sm:$0xff]  }
 0x180   : > { %v11019_v20 = vpack.c.bf16 %v1123_v11, %v1121_v10  ;;  %v11033_v42 = vsel %vm395_vm3, %v1524_v61, %v1531_v12  ;;  %v9713_v11 = vld [vmem:[%s12715_s3 + $0x484] ss:$8 sps:$4 sm:$0xff]  }
 0x181   : > { %v11021_v22 = vpack.c.bf16 %v1124_v17, %v1122_v16  ;;  %v1032_v24 = vpop.f32.mrb[44].mxu0  ;;  %4172 = vmatpush1.bf16.msra.mxu1 %v9693_v59  ;;  %v11024_v25 = vsel %vm395_vm3, %v1536_v2, %v1543_v18  ;;  %v1258_v12 = vld [vmem:[#allocation2 + $0x248] sm:$0x80]  ;;  %v1257_v17 = vld [vmem:[#allocation2 + $0x240] sm:$0x80] }
 0x182   : > { %1197 = vst [vmem:[#allocation2 + $0x220] sm:$0xff] %v11019_v20  ;;  %v1033_v36 = vadd.f32 %v1032_v24, %v10809_v35  ;;  %v1034_v38 = vpop.f32.mrb[45].mxu0  ;;  %2021 = vmatprep.mubr.bf16.mxu0 %v11024_v25  ;;  %4173 = vmatprep.subr.bf16.mxu1 %v9701_v14  ;;  %v1550_v50 = vshrl.u32 %v11019_v20, 16  ;;  %v1553_v61 = vshll.u32 %v11019_v20, 16 }
 0x183   : > { %1198 = vst [vmem:[#allocation2 + $0x228] sm:$0xff] %v11021_v22  ;;  %v1035_v51 = vadd.f32 %v1034_v38, %v10812_v37  ;;  %v1036_v52 = vpop.f32.mrb[46].mxu0  ;;  %2022 = vmatmul.mubr.bf16.gmra.mrb[104].mxu0 %v11033_v42  ;;  %3725 = vmatprep.mubr.bf16.mxu1 %v11021_v22  ;;  %v1562_v54 = vshrl.u32 %v11021_v22, 16  ;;  %v1565_v2 = vshll.u32 %v11021_v22, 16 }
 0x184   : > { %v1037_v55 = vadd.f32 %v1036_v52, %v10809_v35  ;;  %v1038_v57 = vpop.f32.mrb[47].mxu0  ;;  %3726 = vmatmul.mubr.bf16.gmra.mrb[12].mxu1 %v11019_v20  ;;  %v1552_v59 = vrot.slane %v1550_v50, 7  ;;  %v1125_v6 = vmax.f32 %v1033_v36, 0.0  ;;  %v1582_v36 = vshrl.u32 %v1258_v12, 16 }
 0x185   : > { %v1039_v63 = vadd.f32 %v1038_v57, %v10812_v37  ;;  %4174 = vmatpush1.bf16.msra.mxu1 %v9699_v28  ;;  %v1564_v1 = vrot.slane %v1562_v54, 7  ;;  %v1126_v14 = vmax.f32 %v1035_v51, 0.0  ;;  %v9719_v51 = vld [vmem:[%s12715_s3 + $0x494] ss:$8 sps:$4 sm:$0xff]   ;;  %v1570_v52 = vshrl.u32 %v1257_v17, 16 }
 0x186   : > { %v1127_v8 = vmax.f32 %v1037_v55, 0.0  ;;  %4175 = vmatprep.subr.bf16.mxu1 %v9707_v44  ;;  %v1555_v10 = vor.u32 %v1553_v61, %v1552_v59  ;;  %v9725_v17 = vld [vmem:[%s12715_s3 + $0x4a4] ss:$8 sps:$4 sm:$0xff]  }
 0x187   : > { %v1128_v15 = vmax.f32 %v1039_v63, 0.0  ;;  %v1567_v16 = vor.u32 %v1565_v2, %v1564_v1  ;;  %v1262_v2 = vld [vmem:[#allocation2 + $0x278] sm:$0x80] }
 0x188   : > { %v11055_v18 = vpack.c.bf16 %v1127_v8, %v1125_v6  ;;  %v11069_v50 = vsel %vm395_vm3, %v1548_v5, %v1555_v10  ;;  %v1584_v6 = vrot.slane %v1582_v36, 7 }
 0x189   : > { %v11057_v21 = vpack.c.bf16 %v1128_v15, %v1126_v14  ;;  %v1042_v24 = vpop.f32.mrb[48].mxu0  ;;  %4176 = vmatpush1.bf16.msra.mxu1 %v9705_v0  ;;  %v11060_v28 = vsel %vm395_vm3, %v1560_v58, %v1567_v16  ;;  %v9717_v58 = vld [vmem:[%s12715_s3 + $0x490] ss:$8 sps:$4 sm:$0xff]   ;;  %v1572_v15 = vrot.slane %v1570_v52, 7 }
 0x18a   : > { %1199 = vst [vmem:[#allocation2 + $0x250] sm:$0xff] %v11055_v18  ;;  %v1043_v38 = vadd.f32 %v1042_v24, %v10809_v35  ;;  %v1044_v44 = vpop.f32.mrb[49].mxu0  ;;  %2031 = vmatprep.mubr.bf16.mxu0 %v11060_v28  ;;  %4177 = vmatprep.subr.bf16.mxu1 %v9713_v11  ;;  %v1574_v54 = vshrl.u32 %v11055_v18, 16  ;;  %v1577_v1 = vshll.u32 %v11055_v18, 16  ;;  %v1261_v11 = vld [vmem:[#allocation2 + $0x270] sm:$0x80] }
 0x18b   : > { %1200 = vst [vmem:[#allocation2 + $0x258] sm:$0xff] %v11057_v21  ;;  %v1045_v55 = vadd.f32 %v1044_v44, %v10812_v37  ;;  %v1046_v57 = vpop.f32.mrb[50].mxu0  ;;  %2032 = vmatmul.mubr.bf16.gmra.mrb[108].mxu0 %v11069_v50  ;;  %3735 = vmatprep.mubr.bf16.mxu1 %v11057_v21  ;;  %v1586_v59 = vshrl.u32 %v11057_v21, 16  ;;  %v1589_v10 = vshll.u32 %v11057_v21, 16 }
 0x18c   : > { %v1047_v61 = vadd.f32 %v1046_v57, %v10809_v35  ;;  %v1048_v63 = vpop.f32.mrb[51].mxu0  ;;  %3736 = vmatmul.mubr.bf16.gmra.mrb[16].mxu1 %v11055_v18  ;;  %v1576_v0 = vrot.slane %v1574_v54, 7  ;;  %v1129_v12 = vmax.f32 %v1043_v38, 0.0  ;;  %v1606_v57 = vshrl.u32 %v1262_v2, 16 }
 0x18d   : > { %v1049_v5 = vadd.f32 %v1048_v63, %v10812_v37  ;;  %4178 = vmatpush1.bf16.msra.mxu1 %v9711_v31  ;;  %v1588_v8 = vrot.slane %v1586_v59, 7  ;;  %v1130_v24 = vmax.f32 %v1045_v55, 0.0  ;;  %v1594_v31 = vshrl.u32 %v1261_v11, 16 }
 0x18e   : > { %v1131_v14 = vmax.f32 %v1047_v61, 0.0  ;;  %4179 = vmatprep.subr.bf16.mxu1 %v9719_v51  ;;  %v1579_v16 = vor.u32 %v1577_v1, %v1576_v0  ;;  %v9723_v51 = vld [vmem:[%s12715_s3 + $0x4a0] ss:$8 sps:$4 sm:$0xff]  }
 0x18f   : > { %v1132_v44 = vmax.f32 %v1049_v5, 0.0  ;;  %v1591_v54 = vor.u32 %v1589_v10, %v1588_v8  ;;  %v9729_v5 = vld [vmem:[%s12715_s3 + $0x4b0] ss:$8 sps:$4 sm:$0xff]  }
 0x190   : > { %v11091_v63 = vpack.c.bf16 %v1131_v14, %v1129_v12  ;;  %v11105_v61 = vsel %vm395_vm3, %v1572_v15, %v1579_v16  ;;  %v1596_v12 = vrot.slane %v1594_v31, 7  ;;  %v9737_v16 = vld [vmem:[%s12715_s3 + $0x4c4] ss:$8 sps:$4 sm:$0xff]  }
 0x191   : > { %v11093_v36 = vpack.c.bf16 %v1132_v44, %v1130_v24  ;;  %v1052_v59 = vpop.f32.mrb[52].mxu0  ;;  %4180 = vmatpush1.bf16.msra.mxu1 %v9717_v58  ;;  %v11096_v38 = vsel %vm395_vm3, %v1584_v6, %v1591_v54  ;;  %12741 = vst [vmem:[#allocation11_spill] sm:$0xff] %v11105_v61  ;;  %v9731_v58 = vld [vmem:[%s12715_s3 + $0x4b4] ss:$8 sps:$4 sm:$0xff]   ;;  %v1608_v6 = vrot.slane %v1606_v57, 7 }
 0x192   : > { %12740 = vst [vmem:[#allocation10_spill] sm:$0xff] %v11091_v63  ;;  %1201 = vst [vmem:[#allocation2 + $0x280] sm:$0xff] %v11091_v63  ;;  %v1053_v52 = vadd.f32 %v1052_v59, %v10809_v35  ;;  %v1054_v55 = vpop.f32.mrb[53].mxu0  ;;  %2041 = vmatprep.mubr.bf16.mxu0 %v11096_v38  ;;  %4181 = vmatprep.subr.bf16.mxu1 %v9725_v17  ;;  %v1598_v0 = vshrl.u32 %v11091_v63, 16  ;;  %v1601_v15 = vshll.u32 %v11091_v63, 16 }
 0x193   : > { %1202 = vst [vmem:[#allocation2 + $0x288] sm:$0xff] %v11093_v36  ;;  %v1055_v1 = vadd.f32 %v1054_v55, %v10812_v37  ;;  %v1056_v2 = vpop.f32.mrb[54].mxu0  ;;  %2042 = vmatmul.mubr.bf16.gmra.mrb[112].mxu0 %v11105_v61  ;;  %3745 = vmatprep.mubr.bf16.mxu1 %v11093_v36  ;;  %v1610_v8 = vshrl.u32 %v11093_v36, 16  ;;  %v1613_v54 = vshll.u32 %v11093_v36, 16  ;;  %v1266_v57 = vld [vmem:[#allocation2 + $0x2a8] sm:$0x80] }
 0x194   : > { %v1057_v10 = vadd.f32 %v1056_v2, %v10809_v35  ;;  %v1058_v11 = vpop.f32.mrb[55].mxu0  ;;  %3746 = vmatmul.mubr.bf16.gmra.mrb[20].mxu1 %v11091_v63  ;;  %v1600_v14 = vrot.slane %v1598_v0, 7  ;;  %v1133_v17 = vmax.f32 %v1053_v52, 0.0  ;;  %v391_v31 = vld [vmem:[#allocation2 + $0x308] sm:$0x80] }
 0x195   : > { %v1059_v24 = vadd.f32 %v1058_v11, %v10812_v37  ;;  %4182 = vmatpush1.bf16.msra.mxu1 %v9723_v51  ;;  %v1612_v44 = vrot.slane %v1610_v8, 7  ;;  %v1134_v59 = vmax.f32 %v1055_v1, 0.0  ;;  %v388_v0 = vld [vmem:[#allocation2 + $0x300] sm:$0x80]  ;;  %v392_v61 = vsel %vm10487_vm2, 0, %v391_v31 }
 0x196   : > { %v1135_v55 = vmax.f32 %v1057_v10, 0.0  ;;  %4183 = vmatprep.subr.bf16.mxu1 %v9731_v58  ;;  %v1603_v2 = vor.u32 %v1601_v15, %v1600_v14  ;;  %v1265_v63 = vld [vmem:[#allocation2 + $0x2a0] sm:$0x80]  ;;  %v389_v52 = vsel %vm10487_vm2, 0, %v388_v0  ;;  %393 = vst [vmem:[#allocation2 + $0x308] sm:$0x80] %v392_v61 }
 0x197   : > { %v1136_v32 = vmax.f32 %v1059_v24, 0.0  ;;  %v1615_v29 = vor.u32 %v1613_v54, %v1612_v44  ;;  %390 = vst [vmem:[#allocation2 + $0x300] sm:$0x80] %v389_v52  ;;  %v9735_v10 = vld [vmem:[%s12715_s3 + $0x4c0] ss:$8 sps:$4 sm:$0xff]   ;;  %v1630_v11 = vshrl.u32 %v1266_v57, 16 }
 0x198   : > { %v11131_v51 = vpack.c.bf16 %v1135_v55, %v1133_v17  ;;  %v1618_v61 = vshrl.u32 %v1265_v63, 16  ;;  %v1270_v44 = vld [vmem:[#allocation2 + $0x2d8] sm:$0x80]  ;;  %v9741_v57 = vld [vmem:[%s12715_s3 + $0x4d0] ss:$8 sps:$4 sm:$0xff]  }
 0x199   : > { %v11133_v8 = vpack.c.bf16 %v1136_v32, %v1134_v59  ;;  %v1062_v1 = vpop.f32.mrb[56].mxu0  ;;  %4184 = vmatpush1.bf16.msra.mxu1 %v9729_v5  ;;  %v11136_v58 = vsel %vm395_vm3, %v1608_v6, %v1615_v29  ;;  %v11145_v32 = vsel %vm395_vm3, %v1596_v12, %v1603_v2  ;;  %v9743_v29 = vld [vmem:[%s12715_s3 + $0x4d4] ss:$8 sps:$4 sm:$0xff]   ;;  %v1632_v59 = vrot.slane %v1630_v11, 7 }
 0x19a   : > { %12742 = vst [vmem:[#allocation12_spill] sm:$0xff] %v11131_v51  ;;  %1203 = vst [vmem:[#allocation2 + $0x2b0] sm:$0xff] %v11131_v51  ;;  %v1063_v26 = vadd.f32 %v1062_v1, %v10809_v35  ;;  %v1064_v14 = vpop.f32.mrb[57].mxu0  ;;  %2051 = vmatprep.mubr.bf16.mxu0 %v11136_v58  ;;  %4185 = vmatprep.subr.bf16.mxu1 %v9737_v16  ;;  %v1622_v5 = vshrl.u32 %v11131_v51, 16  ;;  %v1625_v63 = vshll.u32 %v11131_v51, 16  ;;  %v1620_v52 = vrot.slane %v1618_v61, 7 }
 0x19b   : > { %12743 = vst [vmem:[#allocation13_spill] sm:$0xff] %v11145_v32  ;;  %1204 = vst [vmem:[#allocation2 + $0x2b8] sm:$0xff] %v11133_v8  ;;  %v1065_v6 = vadd.f32 %v1064_v14, %v10812_v37  ;;  %v1066_v15 = vpop.f32.mrb[58].mxu0  ;;  %2052 = vmatmul.mubr.bf16.gmra.mrb[116].mxu0 %v11145_v32  ;;  %3755 = vmatprep.mubr.bf16.mxu1 %v11133_v8  ;;  %v1634_v12 = vshrl.u32 %v11133_v8, 16  ;;  %v1637_v2 = vshll.u32 %v11133_v8, 16 }
 0x19c   : > { %v1067_v16 = vadd.f32 %v1066_v15, %v10809_v35  ;;  %v1068_v17 = vpop.f32.mrb[59].mxu0  ;;  %3756 = vmatmul.mubr.bf16.gmra.mrb[24].mxu1 %v11131_v51  ;;  %v1624_v24 = vrot.slane %v1622_v5, 7  ;;  %v1137_v31 = vmax.f32 %v1063_v26, 0.0  ;;  %v9749_v14 = vld [vmem:[%s12715_s3 + $0x4e4] ss:$8 sps:$4 sm:$0xff]  }
 0x19d   : > { %v1069_v54 = vadd.f32 %v1068_v17, %v10812_v37  ;;  %4186 = vmatpush1.bf16.msra.mxu1 %v9735_v10  ;;  %v1636_v55 = vrot.slane %v1634_v12, 7  ;;  %v1138_v5 = vmax.f32 %v1065_v6, 0.0  ;;  %v1654_v17 = vshrl.u32 %v1270_v44, 16  ;;  %v1269_v51 = vld [vmem:[#allocation2 + $0x2d0] sm:$0x80] }
 0x19e   : > { %v1139_v0 = vmax.f32 %v1067_v16, 0.0  ;;  %4187 = vmatprep.subr.bf16.mxu1 %v9743_v29  ;;  %v1627_v1 = vor.u32 %v1625_v63, %v1624_v24  ;;  %v9747_v29 = vld [vmem:[%s12715_s3 + $0x4e0] ss:$8 sps:$4 sm:$0xff]   ;;  %v9755_v12 = vld [vmem:[%s12715_s3 + $0x4f4] ss:$8 sps:$4 sm:$0xff]   ;;  %v1642_v16 = vshrl.u32 %v1269_v51, 16 }
 0x19f   : > { %v1140_v15 = vmax.f32 %v1069_v54, 0.0  ;;  %v1639_v10 = vor.u32 %v1637_v2, %v1636_v55  ;;  %v1656_v54 = vrot.slane %v1654_v17, 7  ;;  %v11193_v51 = vld [vmem:[#allocation2 + $0x48] sm:$0xff] }
 0x1a0   : > { %v11167_v32 = vpack.c.bf16 %v1139_v0, %v1137_v31  ;;  %v11180_v6 = vsel %vm395_vm3, %v1620_v52, %v1627_v1 }
 0x1a1   : > { %v11169_v11 = vpack.c.bf16 %v1140_v15, %v1138_v5  ;;  %4188 = vmatpush1.bf16.msra.mxu1 %v9741_v57  ;;  %v11172_v26 = vsel %vm395_vm3, %v1632_v59, %v1639_v10  ;;  %v1072_v61 = vpop.f32.mrb[60].mxu0 }
 0x1a2   : > { %1205 = vst [vmem:[#allocation2 + $0x2e0] sm:$0xff] %v11167_v32  ;;  %2061 = vmatprep.mubr.bf16.mxu0 %v11172_v26  ;;  %4189 = vmatprep.subr.bf16.mxu1 %v9749_v14  ;;  %v1646_v24 = vshrl.u32 %v11167_v32, 16  ;;  %v1073_v63 = vadd.f32 %v1072_v61, %v10809_v35  ;;  %v1074_v44 = vpop.f32.mrb[61].mxu0  ;;  %v1649_v31 = vshll.u32 %v11167_v32, 16  ;;  %v9753_v14 = vld [vmem:[%s12715_s3 + $0x4f0] ss:$8 sps:$4 sm:$0xff]  }
 0x1a3   : > { %1206 = vst [vmem:[#allocation2 + $0x2e8] sm:$0xff] %v11169_v11  ;;  %2062 = vmatmul.mubr.bf16.gmra.mrb[120].mxu0 %v11180_v6  ;;  %3765 = vmatprep.mubr.bf16.mxu1 %v11169_v11  ;;  %v1658_v57 = vshrl.u32 %v11169_v11, 16  ;;  %v1075_v59 = vadd.f32 %v1074_v44, %v10812_v37  ;;  %v1076_v55 = vpop.f32.mrb[62].mxu0  ;;  %v1661_v15 = vshll.u32 %v11169_v11, 16  ;;  %v1644_v61 = vrot.slane %v1642_v16, 7 }
 0x1a4   : > { %3766 = vmatmul.mubr.bf16.gmra.mrb[28].mxu1 %v11167_v32  ;;  %v1648_v2 = vrot.slane %v1646_v24, 7  ;;  %v1141_v0 = vmax.f32 %v1073_v63, 0.0  ;;  %v1077_v52 = vadd.f32 %v1076_v55, %v10809_v35  ;;  %v1078_v1 = vpop.f32.mrb[63].mxu0  ;;  %v9761_v35 = vld [vmem:[%s12715_s3 + $0x704] ss:$8 sps:$4 sm:$0xff]  }
 0x1a5   : > { %4190 = vmatpush1.bf16.msra.mxu1 %v9747_v29  ;;  %4193 = vmatprep.mubr.bf16.mxu1 %v11193_v51  ;;  %v1660_v5 = vrot.slane %v1658_v57, 7  ;;  %v1142_v10 = vmax.f32 %v1075_v59, 0.0  ;;  %v1079_v17 = vadd.f32 %v1078_v1, %v10812_v37  ;;  %v9759_v37 = vld [vmem:[%s12715_s3 + $0x700] ss:$8 sps:$4 sm:$0xff]   ;;  %v9767_v59 = vld [vmem:[%s12715_s3 + $0x714] ss:$8 sps:$4 sm:$0xff]  }
 0x1a6   : > { %4191 = vmatprep.subr.bf16.mxu1 %v9755_v12  ;;  %v1651_v24 = vor.u32 %v1649_v31, %v1648_v2  ;;  %v1143_v29 = vmax.f32 %v1077_v52, 0.0  ;;  %v11230_v2 = vld [vmem:[#allocation2 + $0x78] sm:$0xff]  ;;  %v490_v31 = vld [vmem:[#allocation2 + $0x328] sm:$0x1]  ;;  %v9770_v52 = vld [vmem:[%s12715_s3 + $0x724] ss:$8 sps:$4 sm:$0xff]  }
 0x1a7   : > { %v1663_v63 = vor.u32 %v1661_v15, %v1660_v5  ;;  %v1144_v44 = vmax.f32 %v1079_v17, 0.0  ;;  %v487_v1 = vld [vmem:[#allocation2 + $0x320] sm:$0x1]  ;;  %v9773_v15 = vld [vmem:[%s12715_s3 + $0x734] ss:$8 sps:$4 sm:$0xff]  }
 0x1a8   : > { %v11206_v55 = vpack.c.bf16 %v1143_v29, %v1141_v0  ;;  %v11218_v16 = vsel %vm395_vm3, %v1644_v61, %v1651_v24  ;;  %v9765_v0 = vld [vmem:[%s12715_s3 + $0x710] ss:$8 sps:$4 sm:$0xff]   ;;  %v9768_v5 = vld [vmem:[%s12715_s3 + $0x720] ss:$8 sps:$4 sm:$0xff]   ;;  %v9800_v29 = vld [vmem:[%s12715_s3 + $0x624] ss:$8 sps:$4 sm:$0xff]  }
 0x1a9   : > { %4192 = vmatpush1.bf16.msra.mxu1 %v9753_v14  ;;  %v11209_v57 = vsel %vm395_vm3, %v1656_v54, %v1663_v63  ;;  %v11214_v12 = vpack.c.bf16 %v1144_v44, %v1142_v10  ;;  %v11225_v54 = vld [vmem:[#allocation2 + $0x40] sm:$0xff]  ;;  %v488_v14 = vsel %vm10513_vm5, 0, %v487_v1  ;;  %v11253_v17 = vld [vmem:[#allocation2 + $0x70] sm:$0xff]  ;;  %v11260_v61 = vld [vmem:[#allocation2 + $0xa8] sm:$0xff] }
 0x1aa   : > { %2071 = vmatprep.mubr.bf16.mxu0 %v11209_v57  ;;  %4739 = vmatprep.subr.bf16.mxu1 %v9761_v35  ;;  %1207 = vst [vmem:[#allocation2 + $0x310] sm:$0xff] %v11206_v55  ;;  %489 = vst [vmem:[#allocation2 + $0x320] sm:$0x1] %v488_v14  ;;  %v9789_v10 = vld [vmem:[%s12715_s3 + $0x600] ss:$8 sps:$4 sm:$0xff]  }
 0x1ab   : > { %2072 = vmatmul.mubr.bf16.gmra.mrb[124].mxu0 %v11218_v16  ;;  %1208 = vst [vmem:[#allocation2 + $0x318] sm:$0xff] %v11214_v12  ;;  %v9771_v24 = vld [vmem:[%s12715_s3 + $0x730] ss:$8 sps:$4 sm:$0xff]   ;;  %v9774_v63 = vld [vmem:[%s12715_s3 + $0x740] ss:$8 sps:$4 sm:$0xff]  }
 0x1ac   : > { %2397 = vmatprep.mubr.bf16.mxu0 %v10843_v34  ;;  %4194 = vmatmul.mubr.bf16.vlgmr.msra.gmra.mrb[32].mxu1 %v11225_v54  ;;  %v491_v34 = vsel %vm10513_vm5, 0, %v490_v31  ;;  %v9795_v35 = vld [vmem:[%s12715_s3 + $0x610] ss:$8 sps:$4 sm:$0xff]   ;;  %v9779_v44 = vld [vmem:[%s12715_s3 + $0x754] ss:$8 sps:$4 sm:$0xff]  }
 0x1ad   : > { %4740 = vmatpush1.bf16.msra.mxu1 %v9759_v37  ;;  %4203 = vmatprep.mubr.bf16.mxu1 %v11230_v2  ;;  %492 = vst [vmem:[#allocation2 + $0x328] sm:$0x1] %v491_v34  ;;  %v9798_v37 = vld [vmem:[%s12715_s3 + $0x620] ss:$8 sps:$4 sm:$0xff]   ;;  %v9806_v31 = vld [vmem:[%s12715_s3 + $0x634] ss:$8 sps:$4 sm:$0xff]  }
 0x1ae   : > { %4741 = vmatprep.subr.bf16.mxu1 %v9767_v59  ;;  %v11285_v59 = vld [vmem:[#allocation2 + $0xa0] sm:$0xff]  ;;  %v9804_v1 = vld [vmem:[%s12715_s3 + $0x630] ss:$8 sps:$4 sm:$0xff]  }
 0x1af   : > { %v9782_v34 = vld [vmem:[%s12715_s3 + $0x764] ss:$8 sps:$4 sm:$0xff]  }
 0x1b0   : > { %v9809_v14 = vld [vmem:[%s12715_s3 + $0x644] ss:$8 sps:$4 sm:$0xff]  }
 0x1b1   : > { %4742 = vmatpush1.bf16.msra.mxu1 %v9765_v0  ;;  %v11292_v0 = vld [vmem:[#allocation2 + $0xd8] sm:$0xff] }
 0x1b2   : > { %4743 = vmatprep.subr.bf16.mxu1 %v9770_v52  ;;  %v9777_v52 = vld [vmem:[%s12715_s3 + $0x750] ss:$8 sps:$4 sm:$0xff]  }
 0x1b3   : > { %2398 = vmatmul.mubr.bf16.vlgmr.msra.gmra.mrb[64].mxu0 %v10848_v41  ;;  %v9776_v41 = vld [vmem:[%s12715_s3 + $0x744] ss:$8 sps:$4 sm:$0xff]  }
 0x1b4   : > { %2407 = vmatprep.mubr.bf16.mxu0 %v10855_v3  ;;  %4204 = vmatmul.mubr.bf16.gmra.mrb[36].mxu1 %v11253_v17 }
 0x1b5   : > { %4213 = vmatprep.mubr.bf16.mxu1 %v11260_v61  ;;  %4744 = vmatpush1.bf16.msra.mxu1 %v9768_v5  ;;  %v9780_v5 = vld [vmem:[%s12715_s3 + $0x760] ss:$8 sps:$4 sm:$0xff]  }
 0x1b6   : > { %4745 = vmatprep.subr.bf16.mxu1 %v9773_v15  ;;  %2970 = vmatpush1.bf16.msra.mxu0 %v9789_v10  ;;  %v9785_v15 = vld [vmem:[%s12715_s3 + $0x774] ss:$8 sps:$4 sm:$0xff]   ;;  %v9807_v10 = vld [vmem:[%s12715_s3 + $0x640] ss:$8 sps:$4 sm:$0xff]  }
 0x1b7   : > { %2971 = vmatprep.subr.bf16.mxu0 %v9797_v39  ;;  %v11317_v39 = vld [vmem:[#allocation2 + $0xd0] sm:$0xff] }
 0x1b9   : > { %4746 = vmatpush1.bf16.msra.mxu1 %v9771_v24  ;;  %v9815_v24 = vld [vmem:[%s12715_s3 + $0x654] ss:$8 sps:$4 sm:$0xff]  }
 0x1ba   : > { %4747 = vmatprep.subr.bf16.mxu1 %v9776_v41  ;;  %2972 = vmatpush1.bf16.msra.mxu0 %v9795_v35  ;;  %v11324_v41 = vld [vmem:[#allocation2 + $0x108] sm:$0xff]  ;;  %v9783_v35 = vld [vmem:[%s12715_s3 + $0x770] ss:$8 sps:$4 sm:$0xff]  }
 0x1bb   : > { %2408 = vmatmul.mubr.bf16.gmra.mrb[68].mxu0 %v10860_v7  ;;  %2973 = vmatprep.subr.bf16.mxu0 %v9800_v29  ;;  %v9788_v29 = vld [vmem:[%s12715_s3 + $0x784] ss:$8 sps:$4 sm:$0xff]  }
 0x1bc   : > { %2417 = vmatprep.mubr.bf16.mxu0 %v10867_v40  ;;  %4214 = vmatmul.mubr.bf16.gmra.mrb[40].mxu1 %v11285_v59 }
 0x1bd   : > { %4223 = vmatprep.mubr.bf16.mxu1 %v11292_v0  ;;  %4748 = vmatpush1.bf16.msra.mxu1 %v9774_v63  ;;  %v9813_v63 = vld [vmem:[%s12715_s3 + $0x650] ss:$8 sps:$4 sm:$0xff]  }
 0x1be   : > { %4749 = vmatprep.subr.bf16.mxu1 %v9779_v44  ;;  %2974 = vmatpush1.bf16.msra.mxu0 %v9798_v37  ;;  %v9818_v44 = vld [vmem:[%s12715_s3 + $0x664] ss:$8 sps:$4 sm:$0xff]   ;;  %v9786_v37 = vld [vmem:[%s12715_s3 + $0x780] ss:$8 sps:$4 sm:$0xff]  }
 0x1bf   : > { %2975 = vmatprep.subr.bf16.mxu0 %v9806_v31  ;;  %v9794_v31 = vld [vmem:[%s12715_s3 + $0x794] ss:$8 sps:$4 sm:$0xff]  }
 0x1c1   : > { %4750 = vmatpush1.bf16.msra.mxu1 %v9777_v52  ;;  %v9816_v52 = vld [vmem:[%s12715_s3 + $0x660] ss:$8 sps:$4 sm:$0xff]  }
 0x1c2   : > { %4751 = vmatprep.subr.bf16.mxu1 %v9782_v34  ;;  %2976 = vmatpush1.bf16.msra.mxu0 %v9804_v1  ;;  %v11349_v34 = vld [vmem:[#allocation2 + $0x100] sm:$0xff]  ;;  %v9824_v1 = vld [vmem:[%s12715_s3 + $0x674] ss:$8 sps:$4 sm:$0xff]  }
 0x1c3   : > { %2418 = vmatmul.mubr.bf16.gmra.mrb[72].mxu0 %v10872_v45  ;;  %2977 = vmatprep.subr.bf16.mxu0 %v9809_v14  ;;  %v11356_v14 = vld [vmem:[#allocation2 + $0x138] sm:$0xff] }
 0x1c4   : > { %2427 = vmatprep.mubr.bf16.mxu0 %v10879_v9  ;;  %4224 = vmatmul.mubr.bf16.gmra.mrb[44].mxu1 %v11317_v39 }
 0x1c5   : > { %4233 = vmatprep.mubr.bf16.mxu1 %v11324_v41  ;;  %4752 = vmatpush1.bf16.msra.mxu1 %v9780_v5  ;;  %v9792_v5 = vld [vmem:[%s12715_s3 + $0x790] ss:$8 sps:$4 sm:$0xff]  }
 0x1c6   : > { %4753 = vmatprep.subr.bf16.mxu1 %v9785_v15  ;;  %2978 = vmatpush1.bf16.msra.mxu0 %v9807_v10  ;;  %v9803_v15 = vld [vmem:[%s12715_s3 + $0x7a4] ss:$8 sps:$4 sm:$0xff]   ;;  %v9822_v10 = vld [vmem:[%s12715_s3 + $0x670] ss:$8 sps:$4 sm:$0xff]  }
 0x1c7   : > { %2979 = vmatprep.subr.bf16.mxu0 %v9815_v24  ;;  %v9827_v24 = vld [vmem:[%s12715_s3 + $0x684] ss:$8 sps:$4 sm:$0xff]  }
 0x1c9   : > { %4754 = vmatpush1.bf16.msra.mxu1 %v9783_v35  ;;  %v9801_v35 = vld [vmem:[%s12715_s3 + $0x7a0] ss:$8 sps:$4 sm:$0xff]  }
 0x1ca   : > { %4755 = vmatprep.subr.bf16.mxu1 %v9788_v29  ;;  %2980 = vmatpush1.bf16.msra.mxu0 %v9813_v63  ;;  %v9812_v29 = vld [vmem:[%s12715_s3 + $0x7b4] ss:$8 sps:$4 sm:$0xff]   ;;  %v9825_v63 = vld [vmem:[%s12715_s3 + $0x680] ss:$8 sps:$4 sm:$0xff]  }
 0x1cb   : > { %2428 = vmatmul.mubr.bf16.gmra.mrb[76].mxu0 %v10884_v13  ;;  %2981 = vmatprep.subr.bf16.mxu0 %v9818_v44  ;;  %v11381_v44 = vld [vmem:[#allocation2 + $0x130] sm:$0xff] }
 0x1cc   : > { %2437 = vmatprep.mubr.bf16.mxu0 %v10891_v49  ;;  %4234 = vmatmul.mubr.bf16.gmra.mrb[48].mxu1 %v11349_v34 }
 0x1cd   : > { %4243 = vmatprep.mubr.bf16.mxu1 %v11356_v14  ;;  %4756 = vmatpush1.bf16.msra.mxu1 %v9786_v37  ;;  %v9833_v37 = vld [vmem:[%s12715_s3 + $0x694] ss:$8 sps:$4 sm:$0xff]  }
 0x1ce   : > { %4757 = vmatprep.subr.bf16.mxu1 %v9794_v31  ;;  %2982 = vmatpush1.bf16.msra.mxu0 %v9816_v52  ;;  %v11388_v31 = vld [vmem:[#allocation2 + $0x168] sm:$0xff]  ;;  %v9810_v52 = vld [vmem:[%s12715_s3 + $0x7b0] ss:$8 sps:$4 sm:$0xff]  }
 0x1cf   : > { %2983 = vmatprep.subr.bf16.mxu0 %v9824_v1  ;;  %v9821_v1 = vld [vmem:[%s12715_s3 + $0x7c4] ss:$8 sps:$4 sm:$0xff]  }
 0x1d1   : > { %4758 = vmatpush1.bf16.msra.mxu1 %v9792_v5  ;;  %v9831_v5 = vld [vmem:[%s12715_s3 + $0x690] ss:$8 sps:$4 sm:$0xff]  }
 0x1d2   : > { %4759 = vmatprep.subr.bf16.mxu1 %v9803_v15  ;;  %2984 = vmatpush1.bf16.msra.mxu0 %v9822_v10  ;;  %v9836_v15 = vld [vmem:[%s12715_s3 + $0x6a4] ss:$8 sps:$4 sm:$0xff]   ;;  %v9819_v10 = vld [vmem:[%s12715_s3 + $0x7c0] ss:$8 sps:$4 sm:$0xff]  }
 0x1d3   : > { %2438 = vmatmul.mubr.bf16.gmra.mrb[80].mxu0 %v10896_v53  ;;  %2985 = vmatprep.subr.bf16.mxu0 %v9827_v24  ;;  %v9830_v24 = vld [vmem:[%s12715_s3 + $0x7d4] ss:$8 sps:$4 sm:$0xff]  }
 0x1d4   : > { %2447 = vmatprep.mubr.bf16.mxu0 %v10903_v19  ;;  %4244 = vmatmul.mubr.bf16.gmra.mrb[52].mxu1 %v11381_v44 }
 0x1d5   : > { %4253 = vmatprep.mubr.bf16.mxu1 %v11388_v31  ;;  %4760 = vmatpush1.bf16.msra.mxu1 %v9801_v35  ;;  %v9834_v35 = vld [vmem:[%s12715_s3 + $0x6a0] ss:$8 sps:$4 sm:$0xff]  }
 0x1d6   : > { %4761 = vmatprep.subr.bf16.mxu1 %v9812_v29  ;;  %2986 = vmatpush1.bf16.msra.mxu0 %v9825_v63  ;;  %v11413_v29 = vld [vmem:[#allocation2 + $0x160] sm:$0xff]  ;;  %v9842_v63 = vld [vmem:[%s12715_s3 + $0x6b4] ss:$8 sps:$4 sm:$0xff]  }
 0x1d7   : > { %2987 = vmatprep.subr.bf16.mxu0 %v9833_v37  ;;  %v9828_v37 = vld [vmem:[%s12715_s3 + $0x7d0] ss:$8 sps:$4 sm:$0xff]  }
 0x1d9   : > { %4762 = vmatpush1.bf16.msra.mxu1 %v9810_v52  ;;  %v9839_v52 = vld [vmem:[%s12715_s3 + $0x7e4] ss:$8 sps:$4 sm:$0xff]  }
 0x1da   : > { %4763 = vmatprep.subr.bf16.mxu1 %v9821_v1  ;;  %2988 = vmatpush1.bf16.msra.mxu0 %v9831_v5  ;;  %v9840_v1 = vld [vmem:[%s12715_s3 + $0x6b0] ss:$8 sps:$4 sm:$0xff]   ;;  %v9837_v5 = vld [vmem:[%s12715_s3 + $0x7e0] ss:$8 sps:$4 sm:$0xff]  }
 0x1db   : > { %2448 = vmatmul.mubr.bf16.gmra.mrb[84].mxu0 %v10908_v23  ;;  %2989 = vmatprep.subr.bf16.mxu0 %v9836_v15  ;;  %v9843_v15 = vld [vmem:[%s12715_s3 + $0x6c0] ss:$8 sps:$4 sm:$0xff]  }
 0x1dc   : > { %2457 = vmatprep.mubr.bf16.mxu0 %v10917_v62  ;;  %4254 = vmatmul.mubr.bf16.gmra.mrb[56].mxu1 %v11413_v29 }
 0x1dd   : > { %4263 = vmatprep.mubr.bf16.mxu1 %v10914_v60  ;;  %4764 = vmatpush1.bf16.msra.mxu1 %v9819_v10  ;;  %v9845_v60 = vld [vmem:[%s12715_s3 + $0x6c4] ss:$8 sps:$4 sm:$0xff]   ;;  %v9848_v10 = vld [vmem:[%s12715_s3 + $0x7f4] ss:$8 sps:$4 sm:$0xff]  }
 0x1de   : > { %4765 = vmatprep.subr.bf16.mxu1 %v9830_v24  ;;  %2990 = vmatpush1.bf16.msra.mxu0 %v9834_v35  ;;  %v9851_v24 = vld [vmem:[%s12715_s3 + $0x6d4] ss:$8 sps:$4 sm:$0xff]  }
 0x1df   : > { %2991 = vmatprep.subr.bf16.mxu0 %v9842_v63  ;;  %v11447_v35 = vld [vmem:[#allocation2 + $0x190] sm:$0xff] }
 0x1e0   : > { %v9846_v63 = vld [vmem:[%s12715_s3 + $0x7f0] ss:$8 sps:$4 sm:$0xff]  }
 0x1e1   : > { %4766 = vmatpush1.bf16.msra.mxu1 %v9828_v37  ;;  %v9849_v37 = vld [vmem:[%s12715_s3 + $0x6d0] ss:$8 sps:$4 sm:$0xff]  }
 0x1e2   : > { %4767 = vmatprep.subr.bf16.mxu1 %v9839_v52  ;;  %2992 = vmatpush1.bf16.msra.mxu0 %v9840_v1  ;;  %v9857_v52 = vld [vmem:[%s12715_s3 + $0x204] ss:$8 sps:$4 sm:$0xff]   ;;  %v9852_v1 = vld [vmem:[%s12715_s3 + $0x6e0] ss:$8 sps:$4 sm:$0xff]  }
 0x1e3   : > { %2458 = vmatmul.mubr.bf16.gmra.mrb[88].mxu0 %v10925_v4  ;;  %2993 = vmatprep.subr.bf16.mxu0 %v9845_v60  ;;  %v9860_v60 = vld [vmem:[%s12715_s3 + $0x6f4] ss:$8 sps:$4 sm:$0xff]  }
 0x1e4   : > { %2467 = vmatprep.mubr.bf16.mxu0 %v10949_v48  ;;  %4264 = vmatmul.mubr.bf16.gmra.mrb[60].mxu1 %v11447_v35 }
 0x1e5   : > { %4273 = vmatprep.mubr.bf16.mxu1 %v10946_v46  ;;  %4768 = vmatpush1.bf16.msra.mxu1 %v9837_v5  ;;  %v9854_v46 = vld [vmem:[%s12715_s3 + $0x6e4] ss:$8 sps:$4 sm:$0xff]   ;;  %v9858_v5 = vld [vmem:[%s12715_s3 + $0x6f0] ss:$8 sps:$4 sm:$0xff]  }
 0x1e6   : > { %4769 = vmatprep.subr.bf16.mxu1 %v9848_v10  ;;  %2994 = vmatpush1.bf16.msra.mxu0 %v9843_v15  ;;  %v10051_v15 = vld [vmem:[%s12715_s3 + $0x104] ss:$8 sps:$4 sm:$0xff]  }
 0x1e7   : > { %2995 = vmatprep.subr.bf16.mxu0 %v9851_v24  ;;  %v2166_v24 = vshll.u32 %v11214_v12, 16 }
 0x1e9   : > { %4770 = vmatpush1.bf16.msra.mxu1 %v9846_v63 }
 0x1ea   : > { %2996 = vmatpush1.bf16.msra.mxu0 %v9849_v37  ;;  %5806 = vmatprep.subr.bf16.mxu1 %v9857_v52  ;;  %v2151_v52 = vshrl.u32 %v11206_v55, 16 }
 0x1eb   : > { %2468 = vmatmul.mubr.bf16.gmra.mrb[92].mxu0 %v10961_v56  ;;  %2997 = vmatprep.subr.bf16.mxu0 %v9854_v46  ;;  %v1273_v46 = vld [vmem:[#allocation2 + $0x300] sm:$0x80] }
 0x1ec   : > { %2477 = vmatprep.mubr.bf16.mxu0 %v10988_v33  ;;  %4274 = vmatmul.mubr.bf16.gmra.mrb[0].mxu1 %v10944_v43  ;;  %v12744_v43 = vld [vmem:[#allocation11_spill] sm:$0xff] }
 0x1ed   : > { %4283 = vmatprep.mubr.bf16.mxu1 %v10985_v30  ;;  %v12746_v30 = vld [vmem:[#allocation13_spill] sm:$0xff] }
 0x1ee   : > { %2998 = vmatpush1.bf16.msra.mxu0 %v9852_v1 }
 0x1ef   : > { %2999 = vmatprep.subr.bf16.mxu0 %v9860_v60  ;;  %v2147_v60 = vshrl.u32 %v1273_v46, 16  ;;  %v9867_v46 = vld [vmem:[%s12715_s3 + $0x230] ss:$8 sps:$4 sm:$0xff]  }
 0x1f2   : > { %3000 = vmatpush1.bf16.msra.mxu0 %v9858_v5  ;;  %v2153_v5 = vrot.slane %v2151_v52, 7  ;;  %v9864_v52 = vld [vmem:[%s12715_s3 + $0x220] ss:$8 sps:$4 sm:$0xff]  }
 0x1f3   : > { %2478 = vmatmul.mubr.bf16.gmra.mrb[96].mxu0 %v10997_v47  ;;  %3583 = vmatprep.subr.bf16.mxu0 %v10051_v15  ;;  %v2154_v15 = vshll.u32 %v11206_v55, 16 }
 0x1f4   : > { %2487 = vmatprep.mubr.bf16.mxu0 %v11024_v25  ;;  %4284 = vmatmul.mubr.bf16.gmra.mrb[4].mxu1 %v10983_v27  ;;  %v12745_v27 = vld [vmem:[#allocation10_spill] sm:$0xff] }
 0x1f5   : > { %4293 = vmatprep.mubr.bf16.mxu1 %v11021_v22  ;;  %v2163_v22 = vshrl.u32 %v11214_v12, 16 }
 0x1f7   : > { %v2165_v10 = vrot.slane %v2163_v22, 7  ;;  %v2149_v22 = vrot.slane %v2147_v60, 7  ;;  %v9872_v60 = vld [vmem:[%s12715_s3 + $0x244] ss:$8 sps:$4 sm:$0xff]  }
 0x1f9   : > { %v2168_v37 = vor.u32 %v2166_v24, %v2165_v10  ;;  %v9863_v24 = vld [vmem:[%s12715_s3 + $0x214] ss:$8 sps:$4 sm:$0xff]  }
 0x1fb   : > { %2488 = vmatmul.mubr.bf16.gmra.mrb[100].mxu0 %v11033_v42 }
 0x1fc   : > { %2497 = vmatprep.mubr.bf16.mxu0 %v11060_v28  ;;  %4294 = vmatmul.mubr.bf16.gmra.mrb[8].mxu1 %v11019_v20  ;;  %v12747_v20 = vld [vmem:[#allocation12_spill] sm:$0xff] }
 0x1fd   : > { %4303 = vmatprep.mubr.bf16.mxu1 %v11057_v21 }
 0x203   : > { %2498 = vmatmul.mubr.bf16.gmra.mrb[104].mxu0 %v11069_v50 }
 0x204   : > { %2507 = vmatprep.mubr.bf16.mxu0 %v11096_v38  ;;  %4304 = vmatmul.mubr.bf16.gmra.mrb[12].mxu1 %v11055_v18  ;;  %v1274_v18 = vld [vmem:[#allocation2 + $0x308] sm:$0x80] }
 0x205   : > { %4313 = vmatprep.mubr.bf16.mxu1 %v11093_v36  ;;  %v2159_v21 = vshrl.u32 %v1274_v18, 16  ;;  %v2156_v18 = vor.u32 %v2154_v15, %v2153_v5  ;;  %v9870_v5 = vld [vmem:[%s12715_s3 + $0x240] ss:$8 sps:$4 sm:$0xff]   ;;  %v9875_v15 = vld [vmem:[%s12715_s3 + $0x254] ss:$8 sps:$4 sm:$0xff]  }
 0x207   : > { %v2161_v63 = vrot.slane %v2159_v21, 7  ;;  %v9855_v21 = vld [vmem:[%s12715_s3 + $0x200] ss:$8 sps:$4 sm:$0xff]   ;;  %v11518_v10 = vsel %vm395_vm3, %v2149_v22, %v2156_v18  ;;  %v10054_v22 = vld [vmem:[%s12715_s3 + $0x110] ss:$8 sps:$4 sm:$0xff]  }
 0x208   : > { %v10055_v18 = vld [vmem:[%s12715_s3 + $0x124] ss:$8 sps:$4 sm:$0xff]  }
 0x209   : > { %v11507_v1 = vsel %vm395_vm3, %v2161_v63, %v2168_v37  ;;  %v9861_v63 = vld [vmem:[%s12715_s3 + $0x210] ss:$8 sps:$4 sm:$0xff]   ;;  %v9866_v37 = vld [vmem:[%s12715_s3 + $0x224] ss:$8 sps:$4 sm:$0xff]  }
 0x20b   : > { %2508 = vmatmul.mubr.bf16.gmra.mrb[108].mxu0 %v12744_v43 }
 0x20c   : > { %2517 = vmatprep.mubr.bf16.mxu0 %v11136_v58  ;;  %4314 = vmatmul.mubr.bf16.gmra.mrb[16].mxu1 %v12745_v27 }
 0x20d   : > { %4323 = vmatprep.mubr.bf16.mxu1 %v11133_v8 }
 0x213   : > { %2518 = vmatmul.mubr.bf16.gmra.mrb[112].mxu0 %v12746_v30 }
 0x214   : > { %2527 = vmatprep.mubr.bf16.mxu0 %v11172_v26  ;;  %4324 = vmatmul.mubr.bf16.gmra.mrb[20].mxu1 %v12747_v20 }
 0x215   : > { %4333 = vmatprep.mubr.bf16.mxu1 %v11169_v11 }
 0x21b   : > { %2528 = vmatmul.mubr.bf16.gmra.mrb[116].mxu0 %v11180_v6 }
 0x21c   : > { %2537 = vmatprep.mubr.bf16.mxu0 %v11209_v57  ;;  %4334 = vmatmul.mubr.bf16.gmra.mrb[24].mxu1 %v11167_v32 }
 0x21d   : > { %4343 = vmatprep.mubr.bf16.mxu1 %v11214_v12 }
 0x223   : > { %2538 = vmatmul.mubr.bf16.gmra.mrb[120].mxu0 %v11218_v16 }
 0x224   : > { %4344 = vmatmul.mubr.bf16.gmra.mrb[28].mxu1 %v11206_v55  ;;  %2547 = vmatprep.mubr.bf16.mxu0 %v11507_v1 }
 0x225   : > { %4771 = vmatprep.mubr.bf16.mxu1 %v11230_v2 }
 0x22b   : > { %2548 = vmatmul.mubr.bf16.gmra.mrb[124].mxu0 %v11518_v10 }
 0x22c   : > { %3001 = vmatprep.mubr.bf16.mxu0 %v10855_v3  ;;  %4772 = vmatmul.mubr.bf16.vlgmr.msra.gmra.mrb[32].mxu1 %v11253_v17  ;;  %v9869_v3 = vld [vmem:[%s12715_s3 + $0x234] ss:$8 sps:$4 sm:$0xff]  }
 0x22d   : > { %5807 = vmatpush1.bf16.msra.mxu1 %v9855_v21  ;;  %4781 = vmatprep.mubr.bf16.mxu1 %v11260_v61  ;;  %v9873_v21 = vld [vmem:[%s12715_s3 + $0x250] ss:$8 sps:$4 sm:$0xff]  }
 0x22e   : > { %5808 = vmatprep.subr.bf16.mxu1 %v9863_v24  ;;  %v10056_v24 = vld [vmem:[%s12715_s3 + $0x120] ss:$8 sps:$4 sm:$0xff]  }
 0x231   : > { %5809 = vmatpush1.bf16.msra.mxu1 %v9861_v63  ;;  %v9876_v63 = vld [vmem:[%s12715_s3 + $0x260] ss:$8 sps:$4 sm:$0xff]  }
 0x232   : > { %5810 = vmatprep.subr.bf16.mxu1 %v9866_v37  ;;  %v9881_v37 = vld [vmem:[%s12715_s3 + $0x274] ss:$8 sps:$4 sm:$0xff]  }
 0x233   : > { %3002 = vmatmul.mubr.bf16.vlgmr.msra.gmra.mrb[64].mxu0 %v10860_v7  ;;  %v10052_v7 = vld [vmem:[%s12715_s3 + $0x100] ss:$8 sps:$4 sm:$0xff]  }
 0x234   : > { %3011 = vmatprep.mubr.bf16.mxu0 %v10867_v40  ;;  %4782 = vmatmul.mubr.bf16.gmra.mrb[36].mxu1 %v11285_v59  ;;  %v10053_v40 = vld [vmem:[%s12715_s3 + $0x114] ss:$8 sps:$4 sm:$0xff]  }
 0x235   : > { %4791 = vmatprep.mubr.bf16.mxu1 %v11292_v0  ;;  %5811 = vmatpush1.bf16.msra.mxu1 %v9864_v52  ;;  %v10058_v52 = vld [vmem:[%s12715_s3 + $0x130] ss:$8 sps:$4 sm:$0xff]  }
 0x236   : > { %5812 = vmatprep.subr.bf16.mxu1 %v9869_v3  ;;  %3584 = vmatpush1.bf16.msra.mxu0 %v10052_v7  ;;  %v10059_v3 = vld [vmem:[%s12715_s3 + $0x144] ss:$8 sps:$4 sm:$0xff]   ;;  %v10062_v7 = vld [vmem:[%s12715_s3 + $0x150] ss:$8 sps:$4 sm:$0xff]  }
 0x237   : > { %3585 = vmatprep.subr.bf16.mxu0 %v10053_v40  ;;  %v10063_v40 = vld [vmem:[%s12715_s3 + $0x164] ss:$8 sps:$4 sm:$0xff]  }
 0x239   : > { %5813 = vmatpush1.bf16.msra.mxu1 %v9867_v46  ;;  %v9879_v46 = vld [vmem:[%s12715_s3 + $0x270] ss:$8 sps:$4 sm:$0xff]  }
 0x23a   : > { %5814 = vmatprep.subr.bf16.mxu1 %v9872_v60  ;;  %3586 = vmatpush1.bf16.msra.mxu0 %v10054_v22  ;;  %v10060_v60 = vld [vmem:[%s12715_s3 + $0x140] ss:$8 sps:$4 sm:$0xff]   ;;  %v10066_v22 = vld [vmem:[%s12715_s3 + $0x170] ss:$8 sps:$4 sm:$0xff]  }
 0x23b   : > { %3012 = vmatmul.mubr.bf16.gmra.mrb[68].mxu0 %v10872_v45  ;;  %3587 = vmatprep.subr.bf16.mxu0 %v10055_v18  ;;  %v9878_v45 = vld [vmem:[%s12715_s3 + $0x264] ss:$8 sps:$4 sm:$0xff]  }
 0x23c   : > { %3021 = vmatprep.mubr.bf16.mxu0 %v10879_v9  ;;  %4792 = vmatmul.mubr.bf16.gmra.mrb[40].mxu1 %v11317_v39  ;;  %v10057_v9 = vld [vmem:[%s12715_s3 + $0x134] ss:$8 sps:$4 sm:$0xff]   ;;  %v10067_v18 = vld [vmem:[%s12715_s3 + $0x184] ss:$8 sps:$4 sm:$0xff]  }
 0x23d   : > { %4801 = vmatprep.mubr.bf16.mxu1 %v11324_v41  ;;  %5815 = vmatpush1.bf16.msra.mxu1 %v9870_v5  ;;  %v9885_v5 = vld [vmem:[%s12715_s3 + $0x290] ss:$8 sps:$4 sm:$0xff]  }
 0x23e   : > { %5816 = vmatprep.subr.bf16.mxu1 %v9875_v15  ;;  %3588 = vmatpush1.bf16.msra.mxu0 %v10056_v24  ;;  %v10064_v15 = vld [vmem:[%s12715_s3 + $0x160] ss:$8 sps:$4 sm:$0xff]  }
 0x23f   : > { %3589 = vmatprep.subr.bf16.mxu0 %v10057_v9  ;;  %v10069_v24 = vld [vmem:[%s12715_s3 + $0x180] ss:$8 sps:$4 sm:$0xff]   ;;  %v9899_v9 = vld [vmem:[%s12715_s3 + $0x2d4] ss:$8 sps:$4 sm:$0xff]  }
 0x241   : > { %5817 = vmatpush1.bf16.msra.mxu1 %v9873_v21  ;;  %v10068_v21 = vld [vmem:[#allocation2 + $0x198] sm:$0xff] }
 0x242   : > { %5818 = vmatprep.subr.bf16.mxu1 %v9878_v45  ;;  %3590 = vmatpush1.bf16.msra.mxu0 %v10058_v52  ;;  %v9891_v45 = vld [vmem:[%s12715_s3 + $0x2b0] ss:$8 sps:$4 sm:$0xff]   ;;  %v10073_v52 = vld [vmem:[#allocation2 + $0x1c8] sm:$0xff] }
 0x243   : > { %3022 = vmatmul.mubr.bf16.gmra.mrb[72].mxu0 %v10884_v13  ;;  %3591 = vmatprep.subr.bf16.mxu0 %v10059_v3  ;;  %v9884_v13 = vld [vmem:[%s12715_s3 + $0x284] ss:$8 sps:$4 sm:$0xff]   ;;  %v9897_v3 = vld [vmem:[%s12715_s3 + $0x2d0] ss:$8 sps:$4 sm:$0xff]  }
 0x244   : > { %3031 = vmatprep.mubr.bf16.mxu0 %v10891_v49  ;;  %4802 = vmatmul.mubr.bf16.gmra.mrb[44].mxu1 %v11349_v34  ;;  %v10061_v49 = vld [vmem:[%s12715_s3 + $0x154] ss:$8 sps:$4 sm:$0xff]   ;;  %v9882_v34 = vld [vmem:[%s12715_s3 + $0x280] ss:$8 sps:$4 sm:$0xff]  }
 0x245   : > { %4811 = vmatprep.mubr.bf16.mxu1 %v11356_v14  ;;  %5819 = vmatpush1.bf16.msra.mxu1 %v9876_v63  ;;  %v9887_v14 = vld [vmem:[%s12715_s3 + $0x294] ss:$8 sps:$4 sm:$0xff]   ;;  %v10071_v63 = vld [vmem:[%s12715_s3 + $0x190] ss:$8 sps:$4 sm:$0xff]  }
 0x246   : > { %5820 = vmatprep.subr.bf16.mxu1 %v9881_v37  ;;  %3592 = vmatpush1.bf16.msra.mxu0 %v10060_v60  ;;  %v10072_v37 = vld [vmem:[%s12715_s3 + $0x1a4] ss:$8 sps:$4 sm:$0xff]   ;;  %v9905_v60 = vld [vmem:[%s12715_s3 + $0x2f4] ss:$8 sps:$4 sm:$0xff]  }
 0x247   : > { %3593 = vmatprep.subr.bf16.mxu0 %v10061_v49  ;;  %v10077_v49 = vld [vmem:[%s12715_s3 + $0x1c4] ss:$8 sps:$4 sm:$0xff]  }
 0x249   : > { %5821 = vmatpush1.bf16.msra.mxu1 %v9879_v46  ;;  %v10074_v46 = vld [vmem:[%s12715_s3 + $0x1a0] ss:$8 sps:$4 sm:$0xff]  }
 0x24a   : > { %5822 = vmatprep.subr.bf16.mxu1 %v9884_v13  ;;  %3594 = vmatpush1.bf16.msra.mxu0 %v10062_v7  ;;  %v10076_v13 = vld [vmem:[%s12715_s3 + $0x1b0] ss:$8 sps:$4 sm:$0xff]  }
 0x24b   : > { %3032 = vmatmul.mubr.bf16.gmra.mrb[76].mxu0 %v10896_v53  ;;  %3595 = vmatprep.subr.bf16.mxu0 %v10063_v40  ;;  %v9890_v53 = vld [vmem:[%s12715_s3 + $0x2a4] ss:$8 sps:$4 sm:$0xff]   ;;  %v9903_v7 = vld [vmem:[%s12715_s3 + $0x2f0] ss:$8 sps:$4 sm:$0xff]  }
 0x24c   : > { %3041 = vmatprep.mubr.bf16.mxu0 %v10903_v19  ;;  %4812 = vmatmul.mubr.bf16.gmra.mrb[48].mxu1 %v11381_v44  ;;  %v10065_v19 = vld [vmem:[%s12715_s3 + $0x174] ss:$8 sps:$4 sm:$0xff]   ;;  %v9888_v44 = vld [vmem:[%s12715_s3 + $0x2a0] ss:$8 sps:$4 sm:$0xff]   ;;  %v9908_v40 = vld [vmem:[%s12715_s3 + $0x504] ss:$8 sps:$4 sm:$0xff]  }
 0x24d   : > { %4821 = vmatprep.mubr.bf16.mxu1 %v11388_v31  ;;  %5823 = vmatpush1.bf16.msra.mxu1 %v9882_v34  ;;  %v9893_v31 = vld [vmem:[%s12715_s3 + $0x2b4] ss:$8 sps:$4 sm:$0xff]   ;;  %v10078_v34 = vld [vmem:[#allocation2 + $0x1c0] sm:$0xff] }
 0x24e   : > { %5824 = vmatprep.subr.bf16.mxu1 %v9887_v14  ;;  %3596 = vmatpush1.bf16.msra.mxu0 %v10064_v15  ;;  %v10079_v14 = vld [vmem:[#allocation2 + $0x1f8] sm:$0xff]  ;;  %v10084_v15 = vld [vmem:[#allocation2 + $0x1f0] sm:$0xff] }
 0x24f   : > { %3597 = vmatprep.subr.bf16.mxu0 %v10065_v19  ;;  %v10085_v19 = vld [vmem:[#allocation2 + $0x228] sm:$0xff] }
 0x251   : > { %5825 = vmatpush1.bf16.msra.mxu1 %v9885_v5  ;;  %v10082_v5 = vld [vmem:[%s12715_s3 + $0x1d0] ss:$8 sps:$4 sm:$0xff]  }
 0x252   : > { %5826 = vmatprep.subr.bf16.mxu1 %v9890_v53  ;;  %3598 = vmatpush1.bf16.msra.mxu0 %v10066_v22  ;;  %v10083_v53 = vld [vmem:[%s12715_s3 + $0x1e4] ss:$8 sps:$4 sm:$0xff]   ;;  %v10090_v22 = vld [vmem:[#allocation2 + $0x258] sm:$0xff] }
 0x253   : > { %3042 = vmatmul.mubr.bf16.gmra.mrb[80].mxu0 %v10908_v23  ;;  %3599 = vmatprep.subr.bf16.mxu0 %v10067_v18  ;;  %v9896_v23 = vld [vmem:[%s12715_s3 + $0x2c4] ss:$8 sps:$4 sm:$0xff]   ;;  %v10091_v18 = vld [vmem:[#allocation2 + $0x250] sm:$0xff] }
 0x254   : > { %3051 = vmatprep.mubr.bf16.mxu0 %v10917_v62  ;;  %4822 = vmatmul.mubr.bf16.gmra.mrb[52].mxu1 %v11413_v29  ;;  %v10070_v62 = vld [vmem:[%s12715_s3 + $0x194] ss:$8 sps:$4 sm:$0xff]   ;;  %v9894_v29 = vld [vmem:[%s12715_s3 + $0x2c0] ss:$8 sps:$4 sm:$0xff]  }
 0x255   : > { %4831 = vmatprep.mubr.bf16.mxu1 %v10068_v21  ;;  %5827 = vmatpush1.bf16.msra.mxu1 %v9888_v44  ;;  %v10086_v44 = vld [vmem:[%s12715_s3 + $0x1e0] ss:$8 sps:$4 sm:$0xff]  }
 0x256   : > { %5828 = vmatprep.subr.bf16.mxu1 %v9893_v31  ;;  %3600 = vmatpush1.bf16.msra.mxu0 %v10069_v24  ;;  %v10088_v31 = vld [vmem:[%s12715_s3 + $0x1f0] ss:$8 sps:$4 sm:$0xff]  }
 0x257   : > { %3601 = vmatprep.subr.bf16.mxu0 %v10070_v62 }
 0x259   : > { %5829 = vmatpush1.bf16.msra.mxu1 %v9891_v45 }
 0x25a   : > { %5830 = vmatprep.subr.bf16.mxu1 %v9896_v23  ;;  %3602 = vmatpush1.bf16.msra.mxu0 %v10071_v63  ;;  %v5133_v63 = vld [vmem:[#allocation2 + $0x78] sm:$0xff] }
 0x25b   : > { %3052 = vmatmul.mubr.bf16.gmra.mrb[84].mxu0 %v10925_v4  ;;  %3603 = vmatprep.subr.bf16.mxu0 %v10072_v37  ;;  %v9902_v4 = vld [vmem:[%s12715_s3 + $0x2e4] ss:$8 sps:$4 sm:$0xff]  }
 0x25c   : > { %3061 = vmatprep.mubr.bf16.mxu0 %v10949_v48  ;;  %4832 = vmatmul.mubr.bf16.gmra.mrb[56].mxu1 %v11447_v35  ;;  %v10075_v48 = vld [vmem:[%s12715_s3 + $0x1b4] ss:$8 sps:$4 sm:$0xff]   ;;  %v9900_v35 = vld [vmem:[%s12715_s3 + $0x2e0] ss:$8 sps:$4 sm:$0xff]  }
 0x25d   : > { %4841 = vmatprep.mubr.bf16.mxu1 %v10073_v52  ;;  %5831 = vmatpush1.bf16.msra.mxu1 %v9894_v29  ;;  %v5128_v29 = vld [vmem:[#allocation2 + $0x40] sm:$0xff] }
 0x25e   : > { %5832 = vmatprep.subr.bf16.mxu1 %v9899_v9  ;;  %3604 = vmatpush1.bf16.msra.mxu0 %v10074_v46  ;;  %v5224_v52 = vshll.u32 %v5128_v29, 16 }
 0x25f   : > { %3605 = vmatprep.subr.bf16.mxu0 %v10075_v48  ;;  %v5130_v48 = vld [vmem:[#allocation2 + $0x50] sm:$0x1] }
 0x261   : > { %5833 = vmatpush1.bf16.msra.mxu1 %v9897_v3 }
 0x262   : > { %5834 = vmatprep.subr.bf16.mxu1 %v9902_v4  ;;  %3606 = vmatpush1.bf16.msra.mxu0 %v10076_v13 }
 0x263   : > { %3062 = vmatmul.mubr.bf16.gmra.mrb[88].mxu0 %v10961_v56  ;;  %3607 = vmatprep.subr.bf16.mxu0 %v10077_v49  ;;  %v10080_v56 = vld [vmem:[%s12715_s3 + $0x1c0] ss:$8 sps:$4 sm:$0xff]   ;;  %v9911_v49 = vld [vmem:[%s12715_s3 + $0x514] ss:$8 sps:$4 sm:$0xff]  }
 0x264   : > { %3071 = vmatprep.mubr.bf16.mxu0 %v10988_v33  ;;  %4842 = vmatmul.mubr.bf16.gmra.mrb[60].mxu1 %v10078_v34  ;;  %v10081_v33 = vld [vmem:[%s12715_s3 + $0x1d4] ss:$8 sps:$4 sm:$0xff]   ;;  %v5226_v34 = vrot.slane %v5224_v52, 1 }
 0x265   : > { %4851 = vmatprep.mubr.bf16.mxu1 %v10079_v14  ;;  %5835 = vmatpush1.bf16.msra.mxu1 %v9900_v35  ;;  %v5260_v35 = vshll.u32 %v5133_v63, 16  ;;  %v5229_v14 = vshll.u32 %v5130_v48, 16 }
 0x266   : > { %5836 = vmatprep.subr.bf16.mxu1 %v9905_v60  ;;  %3608 = vmatpush1.bf16.msra.mxu0 %v10080_v56  ;;  %v5135_v60 = vld [vmem:[#allocation2 + $0x88] sm:$0x1] }
 0x267   : > { %3609 = vmatprep.subr.bf16.mxu0 %v10081_v33  ;;  %v5262_v56 = vrot.slane %v5260_v35, 1  ;;  %v5132_v33 = vld [vmem:[#allocation2 + $0x70] sm:$0xff] }
 0x268   : > { %v9921_v35 = vld [vmem:[%s12715_s3 + $0x550] ss:$8 sps:$4 sm:$0xff]  }
 0x269   : > { %5837 = vmatpush1.bf16.msra.mxu1 %v9903_v7 }
 0x26a   : > { %3610 = vmatpush1.bf16.msra.mxu0 %v10082_v5  ;;  %6410 = vmatprep.subr.bf16.mxu1 %v9908_v40  ;;  %v5265_v40 = vshll.u32 %v5135_v60, 16  ;;  %v9909_v5 = vld [vmem:[%s12715_s3 + $0x510] ss:$8 sps:$4 sm:$0xff]  }
 0x26b   : > { %3072 = vmatmul.mubr.bf16.gmra.mrb[92].mxu0 %v10997_v47  ;;  %3611 = vmatprep.subr.bf16.mxu0 %v10083_v53  ;;  %v10087_v47 = vld [vmem:[%s12715_s3 + $0x1f4] ss:$8 sps:$4 sm:$0xff]   ;;  %v5222_v53 = vshrl.u32 %v5128_v29, 16 }
 0x26c   : > { %3081 = vmatprep.mubr.bf16.mxu0 %v11024_v25  ;;  %4852 = vmatmul.mubr.bf16.gmra.mrb[0].mxu1 %v10084_v15  ;;  %v10089_v25 = vld [vmem:[#allocation2 + $0x220] sm:$0xff]  ;;  %v5137_v15 = vld [vmem:[#allocation2 + $0xa8] sm:$0xff]  ;;  %v9923_v29 = vld [vmem:[%s12715_s3 + $0x554] ss:$8 sps:$4 sm:$0xff]  }
 0x26d   : > { %4861 = vmatprep.mubr.bf16.mxu1 %v10085_v19  ;;  %v5258_v19 = vshrl.u32 %v5133_v63, 16 }
 0x26e   : > { %3612 = vmatpush1.bf16.msra.mxu0 %v10086_v44  ;;  %v9914_v44 = vld [vmem:[%s12715_s3 + $0x524] ss:$8 sps:$4 sm:$0xff]  }
 0x26f   : > { %3613 = vmatprep.subr.bf16.mxu0 %v10087_v47  ;;  %v5227_v47 = vor.u32 %v5226_v34, %v5222_v53  ;;  %v9929_v53 = vld [vmem:[%s12715_s3 + $0x574] ss:$8 sps:$4 sm:$0xff]  }
 0x272   : > { %3614 = vmatpush1.bf16.msra.mxu0 %v10088_v31  ;;  %v5231_v31 = vrot.slane %v5229_v14, 1 }
 0x273   : > { %3082 = vmatmul.mubr.bf16.gmra.mrb[96].mxu0 %v11033_v42  ;;  %v11753_v42 = vld [vmem:[#allocation2 + $0x8] sm:$0xff] }
 0x274   : > { %3091 = vmatprep.mubr.bf16.mxu0 %v11060_v28  ;;  %4862 = vmatmul.mubr.bf16.gmra.mrb[4].mxu1 %v10089_v25  ;;  %v2767_v28 = vshrl.u32 %v11753_v42, 16  ;;  %v5248_v25 = vshll.u32 %v5132_v33, 16 }
 0x275   : > { %4871 = vmatprep.mubr.bf16.mxu1 %v10090_v22  ;;  %v5263_v22 = vor.u32 %v5262_v56, %v5258_v19  ;;  %v5142_v56 = vld [vmem:[#allocation2 + $0xe0] sm:$0x1] }
 0x27b   : > { %3092 = vmatmul.mubr.bf16.gmra.mrb[100].mxu0 %v11069_v50  ;;  %v1278_v50 = vld [vmem:[#allocation2 + $0x338] sm:$0x80] }
 0x27c   : > { %3101 = vmatprep.mubr.bf16.mxu0 %v11096_v38  ;;  %4872 = vmatmul.mubr.bf16.gmra.mrb[8].mxu1 %v10091_v18  ;;  %v5127_v38 = vld [vmem:[#allocation2 + $0x28] sm:$0x1]  ;;  %v5267_v18 = vrot.slane %v5265_v40, 1 }
 0x27d   : > { %4881 = vmatprep.mubr.bf16.mxu1 %v11093_v36  ;;  %v2770_v36 = vshll.u32 %v11753_v42, 16 }
 0x283   : > { %3102 = vmatmul.mubr.bf16.gmra.mrb[104].mxu0 %v12744_v43 }
 0x284   : > { %3111 = vmatprep.mubr.bf16.mxu0 %v11136_v58  ;;  %4882 = vmatmul.mubr.bf16.gmra.mrb[12].mxu1 %v12745_v27  ;;  %v2769_v58 = vrot.slane %v2767_v28, 7 }
 0x285   : > { %4891 = vmatprep.mubr.bf16.mxu1 %v11133_v8  ;;  %v2763_v8 = vshrl.u32 %v1278_v50, 16  ;;  %v5284_v50 = vshll.u32 %v5137_v15, 16 }
 0x28b   : > { %3112 = vmatmul.mubr.bf16.gmra.mrb[108].mxu0 %v12746_v30  ;;  %v5126_v30 = vld [vmem:[#allocation2 + $0x20] sm:$0x1] }
 0x28c   : > { %3121 = vmatprep.mubr.bf16.mxu0 %v11172_v26  ;;  %4892 = vmatmul.mubr.bf16.gmra.mrb[16].mxu1 %v12747_v20  ;;  %v5214_v26 = vrot.slane %v2770_v36, 1  ;;  %v5205_v23 = vshll.u32 %v5126_v30, 16  ;;  %v5282_v30 = vshrl.u32 %v5137_v15, 16 }
 0x28d   : > { %4901 = vmatprep.mubr.bf16.mxu1 %v11169_v11  ;;  %v5217_v11 = vshll.u32 %v5127_v38, 16  ;;  %v5139_v38 = vld [vmem:[#allocation2 + $0xb8] sm:$0x1] }
 0x28e   : > { %v5215_v43 = vor.u32 %v5214_v26, %v2767_v28  ;;  %v5207_v9 = vrot.slane %v5205_v23, 1  ;;  %v5134_v28 = vld [vmem:[#allocation2 + $0x80] sm:$0x1]  ;;  %v5250_v26 = vrot.slane %v5248_v25, 1 }
 0x28f   : > { %v5219_v27 = vrot.slane %v5217_v11, 1  ;;  %v5253_v11 = vshll.u32 %v5134_v28, 16  ;;  %v5149_v28 = vld [vmem:[#allocation2 + $0x138] sm:$0xff] }
 0x290   : > { %v5208_v13 = vsel %vm5196_vm6, %v5215_v43, %v5207_v9 }
 0x293   : > { %3122 = vmatmul.mubr.bf16.gmra.mrb[112].mxu0 %v11180_v6  ;;  %v2772_v6 = vor.u32 %v2770_v36, %v2769_v58  ;;  %v9912_v36 = vld [vmem:[%s12715_s3 + $0x520] ss:$8 sps:$4 sm:$0xff]   ;;  %v11792_v58 = vsel %vm5196_vm6, %v5227_v47, %v5231_v31 }
 0x294   : > { %3131 = vmatprep.mubr.bf16.mxu0 %v11209_v57  ;;  %4902 = vmatmul.mubr.bf16.gmra.mrb[20].mxu1 %v11167_v32  ;;  %v2765_v32 = vrot.slane %v2763_v8, 7  ;;  %v1277_v57 = vld [vmem:[#allocation2 + $0x330] sm:$0x80] }
 0x295   : > { %4911 = vmatprep.mubr.bf16.mxu1 %v11214_v12  ;;  %v5129_v12 = vld [vmem:[#allocation2 + $0x48] sm:$0xff]  ;;  %v2751_v20 = vshrl.u32 %v1277_v57, 16  ;;  %v9917_v8 = vld [vmem:[%s12715_s3 + $0x534] ss:$8 sps:$4 sm:$0xff]   ;;  %v5289_v57 = vshll.u32 %v5139_v38, 16 }
 0x296   : > { %v5236_v21 = vshll.u32 %v5129_v12, 16  ;;  %v2773_v45 = vsel %vm395_vm3, %v2765_v32, %v2772_v6  ;;  %v5234_v37 = vshrl.u32 %v5129_v12, 16  ;;  %v11797_v32 = vsel %vm5196_vm6, %v5263_v22, %v5267_v18  ;;  %v5136_v12 = vld [vmem:[#allocation2 + $0xa0] sm:$0xff] }
 0x297   : > { %v5270_v48 = vshrl.u32 %v5136_v12, 16  ;;  %v5144_v22 = vld [vmem:[#allocation2 + $0x100] sm:$0xff] }
 0x298   : > { %v5238_v24 = vrot.slane %v5236_v21, 1  ;;  %v5255_v21 = vrot.slane %v5253_v11, 1 }
 0x29a   : > { %v5239_v4 = vor.u32 %v5238_v24, %v5234_v37  ;;  %v5143_v24 = vld [vmem:[#allocation2 + $0xe8] sm:$0x1] }
 0x29b   : > { %3132 = vmatmul.mubr.bf16.gmra.mrb[116].mxu0 %v11218_v16  ;;  %v5131_v16 = vld [vmem:[#allocation2 + $0x58] sm:$0x1] }
 0x29c   : > { %3141 = vmatprep.mubr.bf16.mxu0 %v11507_v1  ;;  %4912 = vmatmul.mubr.bf16.gmra.mrb[24].mxu1 %v11206_v55  ;;  %v5220_v1 = vsel %vm5196_vm6, %v5215_v43, %v5219_v27  ;;  %v2753_v55 = vrot.slane %v2751_v20, 7  ;;  %v5241_v62 = vshll.u32 %v5131_v16, 16  ;;  %v5246_v43 = vshrl.u32 %v5132_v33, 16  ;;  %v5141_v27 = vld [vmem:[#allocation2 + $0xd8] sm:$0xff] }
 0x29d   : > { %4921 = vmatprep.mubr.bf16.mxu1 %v11753_v42  ;;  %v5291_v16 = vrot.slane %v5289_v57, 1  ;;  %v5147_v33 = vld [vmem:[#allocation2 + $0x118] sm:$0x1]  ;;  %v5356_v57 = vshll.u32 %v5149_v28, 16 }
 0x29e   : > { %v2761_v3 = vsel %vm395_vm3, %v2753_v55, %v2772_v6  ;;  %v5243_v46 = vrot.slane %v5241_v62, 1  ;;  %v5286_v6 = vrot.slane %v5284_v50, 1  ;;  %v5251_v20 = vor.u32 %v5250_v26, %v5246_v43  ;;  %v9918_v62 = vld [vmem:[%s12715_s3 + $0x540] ss:$8 sps:$4 sm:$0xff]  }
 0x29f   : > { %v5308_v55 = vshll.u32 %v5141_v27, 16  ;;  %v5337_v25 = vshll.u32 %v5147_v33, 16  ;;  %v9930_v43 = vld [vmem:[%s12715_s3 + $0x580] ss:$8 sps:$4 sm:$0xff]  }
 0x2a0   : > { %v11774_v7 = vsel %vm5196_vm6, %v5239_v4, %v5243_v46  ;;  %v5287_v23 = vor.u32 %v5286_v6, %v5282_v30  ;;  %v11814_v9 = vsel %vm5196_vm6, %v5251_v20, %v5255_v21  ;;  %v5313_v4 = vshll.u32 %v5143_v24, 16  ;;  %v5140_v46 = vld [vmem:[#allocation2 + $0xd0] sm:$0xff] }
 0x2a1   : > { %v5294_v18 = vshrl.u32 %v5140_v46, 16  ;;  %v5339_v11 = vrot.slane %v5337_v25, 1  ;;  %v5146_v6 = vld [vmem:[#allocation2 + $0x110] sm:$0x1]  ;;  %v5358_v21 = vrot.slane %v5356_v57, 1 }
 0x2a2   : > { %v11819_v52 = vsel %vm5196_vm6, %v5287_v23, %v5291_v16  ;;  %v5315_v14 = vrot.slane %v5313_v4, 1  ;;  %v5148_v23 = vld [vmem:[#allocation2 + $0x130] sm:$0xff]  ;;  %v5318_v16 = vshrl.u32 %v5144_v22, 16 }
 0x2a3   : > { %3142 = vmatmul.mubr.bf16.gmra.mrb[120].mxu0 %v11518_v10  ;;  %v9906_v10 = vld [vmem:[%s12715_s3 + $0x500] ss:$8 sps:$4 sm:$0xff]  }
 0x2a4   : > { %4922 = vmatmul.mubr.bf16.gmra.mrb[28].mxu1 %v11753_v42  ;;  %3151 = vmatprep.mubr.bf16.mxu0 %v2773_v45  ;;  %v5272_v45 = vshll.u32 %v5136_v12, 16  ;;  %v5151_v12 = vld [vmem:[#allocation2 + $0x148] sm:$0x1] }
 0x2a5   : > { %5838 = vmatprep.mubr.bf16.mxu1 %v5220_v1  ;;  %v5138_v1 = vld [vmem:[#allocation2 + $0xb0] sm:$0x1] }
 0x2a6   : > { %v5274_v63 = vrot.slane %v5272_v45, 1  ;;  %v5277_v37 = vshll.u32 %v5138_v1, 16  ;;  %v5361_v45 = vshll.u32 %v5151_v12, 16  ;;  %v5153_v1 = vld [vmem:[#allocation2 + $0x168] sm:$0xff] }
 0x2a7   : > { %v5380_v4 = vshll.u32 %v5153_v1, 16  ;;  %v5161_v12 = vld [vmem:[#allocation2 + $0x1c8] sm:$0xff] }
 0x2a8   : > { %v5279_v60 = vrot.slane %v5277_v37, 1  ;;  %v5363_v37 = vrot.slane %v5361_v45, 1 }
 0x2ab   : > { %3152 = vmatmul.mubr.bf16.gmra.mrb[124].mxu0 %v2761_v3  ;;  %v5310_v3 = vrot.slane %v5308_v55, 1  ;;  %v5354_v55 = vshrl.u32 %v5149_v28, 16  ;;  %v9947_v28 = vld [vmem:[%s12715_s3 + $0x5d4] ss:$8 sps:$4 sm:$0xff]  }
 0x2ac   : > { %5839 = vmatmul.mubr.bf16.vlgmr.msra.gmra.mrb[32].mxu1 %v5208_v13  ;;  %3615 = vmatprep.mubr.bf16.mxu0 %v11753_v42  ;;  %v5275_v13 = vor.u32 %v5274_v63, %v5270_v48  ;;  %v9936_v48 = vld [vmem:[%s12715_s3 + $0x5a0] ss:$8 sps:$4 sm:$0xff]  }
 0x2ad   : > { %6411 = vmatpush1.bf16.msra.mxu1 %v9906_v10  ;;  %5848 = vmatprep.mubr.bf16.mxu1 %v11774_v7  ;;  %v5306_v10 = vshrl.u32 %v5141_v27, 16  ;;  %v5359_v63 = vor.u32 %v5358_v21, %v5354_v55  ;;  %v5163_v55 = vld [vmem:[#allocation2 + $0x1d8] sm:$0x1] }
 0x2ae   : > { %6412 = vmatprep.subr.bf16.mxu1 %v9911_v49  ;;  %v5296_v49 = vshll.u32 %v5140_v46, 16  ;;  %v11836_v15 = vsel %vm5196_vm6, %v5275_v13, %v5279_v60  ;;  %v5155_v46 = vld [vmem:[#allocation2 + $0x178] sm:$0x1]  ;;  %v5382_v60 = vrot.slane %v5380_v4, 1 }
 0x2af   : > { %v5311_v34 = vor.u32 %v5310_v3, %v5306_v10  ;;  %v5150_v3 = vld [vmem:[#allocation2 + $0x140] sm:$0x1]  ;;  %v11885_v13 = vsel %vm5196_vm6, %v5359_v63, %v5363_v37 }
 0x2b0   : > { %v5298_v19 = vrot.slane %v5296_v49, 1  ;;  %v5385_v49 = vshll.u32 %v5155_v46, 16 }
 0x2b1   : > { %6413 = vmatpush1.bf16.msra.mxu1 %v9909_v5  ;;  %v9924_v5 = vld [vmem:[%s12715_s3 + $0x560] ss:$8 sps:$4 sm:$0xff]   ;;  %v11841_v47 = vsel %vm5196_vm6, %v5311_v34, %v5315_v14  ;;  %v5342_v14 = vshrl.u32 %v5148_v23, 16 }
 0x2b2   : > { %6414 = vmatprep.subr.bf16.mxu1 %v9914_v44  ;;  %v5301_v44 = vshll.u32 %v5142_v56, 16  ;;  %v5152_v34 = vld [vmem:[#allocation2 + $0x160] sm:$0xff]  ;;  %v5157_v56 = vld [vmem:[#allocation2 + $0x198] sm:$0xff] }
 0x2b3   : > { %3616 = vmatmul.mubr.bf16.vlgmr.msra.gmra.mrb[64].mxu0 %v11753_v42  ;;  %v9915_v42 = vld [vmem:[%s12715_s3 + $0x530] ss:$8 sps:$4 sm:$0xff]   ;;  %v5404_v25 = vshll.u32 %v5157_v56, 16  ;;  %v5366_v57 = vshrl.u32 %v5152_v34, 16 }
 0x2b4   : > { %3625 = vmatprep.mubr.bf16.mxu0 %v11193_v51  ;;  %5849 = vmatmul.mubr.bf16.gmra.mrb[36].mxu1 %v11792_v58  ;;  %v9920_v51 = vld [vmem:[%s12715_s3 + $0x544] ss:$8 sps:$4 sm:$0xff]   ;;  %v5303_v38 = vrot.slane %v5301_v44, 1  ;;  %v5387_v44 = vrot.slane %v5385_v49, 1  ;;  %v5426_v49 = vshrl.u32 %v5161_v12, 16 }
 0x2b5   : > { %5858 = vmatprep.mubr.bf16.mxu1 %v11797_v32  ;;  %6415 = vmatpush1.bf16.msra.mxu1 %v9912_v36  ;;  %v5299_v36 = vor.u32 %v5298_v19, %v5294_v18  ;;  %v9942_v18 = vld [vmem:[%s12715_s3 + $0x5c0] ss:$8 sps:$4 sm:$0xff]  }
 0x2b6   : > { %6416 = vmatprep.subr.bf16.mxu1 %v9917_v8  ;;  %v5320_v8 = vshll.u32 %v5144_v22, 16  ;;  %v5159_v22 = vld [vmem:[#allocation2 + $0x1a8] sm:$0x1] }
 0x2b7   : > { %v11858_v27 = vsel %vm5196_vm6, %v5299_v36, %v5303_v38  ;;  %v10094_v38 = vld [vmem:[#allocation2 + $0x138] sm:$0xff] }
 0x2b8   : > { %v5322_v30 = vrot.slane %v5320_v8, 1 }
 0x2b9   : > { %6417 = vmatpush1.bf16.msra.mxu1 %v9915_v42  ;;  %v9935_v42 = vld [vmem:[%s12715_s3 + $0x594] ss:$8 sps:$4 sm:$0xff]  }
 0x2ba   : > { %6418 = vmatprep.subr.bf16.mxu1 %v9920_v51  ;;  %v5325_v51 = vshll.u32 %v5146_v6, 16  ;;  %v5323_v24 = vor.u32 %v5322_v30, %v5318_v16  ;;  %v5156_v6 = vld [vmem:[#allocation2 + $0x190] sm:$0xff]  ;;  %v9950_v30 = vld [vmem:[%s12715_s3 + $0x5e4] ss:$8 sps:$4 sm:$0xff]  }
 0x2bb   : > { %3626 = vmatmul.mubr.bf16.gmra.mrb[68].mxu0 %v11225_v54  ;;  %v5145_v54 = vld [vmem:[#allocation2 + $0x108] sm:$0xff]  ;;  %v5392_v45 = vshll.u32 %v5156_v6, 16 }
 0x2bc   : > { %3635 = vmatprep.mubr.bf16.mxu0 %v11230_v2  ;;  %5859 = vmatmul.mubr.bf16.gmra.mrb[40].mxu1 %v11814_v9  ;;  %v9926_v2 = vld [vmem:[%s12715_s3 + $0x564] ss:$8 sps:$4 sm:$0xff]   ;;  %v5332_v40 = vshll.u32 %v5145_v54, 16  ;;  %v5330_v50 = vshrl.u32 %v5145_v54, 16  ;;  %v9941_v54 = vld [vmem:[%s12715_s3 + $0x5b4] ss:$8 sps:$4 sm:$0xff]  }
 0x2bd   : > { %5868 = vmatprep.mubr.bf16.mxu1 %v11819_v52  ;;  %6419 = vmatpush1.bf16.msra.mxu1 %v9918_v62  ;;  %v5327_v62 = vrot.slane %v5325_v51, 1  ;;  %v5394_v63 = vrot.slane %v5392_v45, 1 }
 0x2be   : > { %6420 = vmatprep.subr.bf16.mxu1 %v9923_v29  ;;  %v5334_v31 = vrot.slane %v5332_v40, 1  ;;  %v5344_v29 = vshll.u32 %v5148_v23, 16  ;;  %v5378_v40 = vshrl.u32 %v5153_v1, 16  ;;  %v5158_v1 = vld [vmem:[#allocation2 + $0x1a0] sm:$0x1] }
 0x2bf   : > { %v5397_v37 = vshll.u32 %v5158_v1, 16 }
 0x2c0   : > { %v5335_v26 = vor.u32 %v5334_v31, %v5330_v50  ;;  %v5346_v10 = vrot.slane %v5344_v29, 1  ;;  %v5383_v19 = vor.u32 %v5382_v60, %v5378_v40  ;;  %v5154_v31 = vld [vmem:[#allocation2 + $0x170] sm:$0x1] }
 0x2c1   : > { %6421 = vmatpush1.bf16.msra.mxu1 %v9921_v35  ;;  %v11880_v35 = vsel %vm5196_vm6, %v5323_v24, %v5327_v62  ;;  %v5373_v36 = vshll.u32 %v5154_v31, 16  ;;  %v9953_v24 = vld [vmem:[%s12715_s3 + $0x5f4] ss:$8 sps:$4 sm:$0xff]   ;;  %v9951_v60 = vld [vmem:[%s12715_s3 + $0x5f0] ss:$8 sps:$4 sm:$0xff]  }
 0x2c2   : > { %6422 = vmatprep.subr.bf16.mxu1 %v9926_v2  ;;  %v11863_v20 = vsel %vm5196_vm6, %v5335_v26, %v5339_v11  ;;  %v5349_v2 = vshll.u32 %v5150_v3, 16  ;;  %v5347_v33 = vor.u32 %v5346_v10, %v5342_v14  ;;  %v11905_v8 = vsel %vm5196_vm6, %v5383_v19, %v5387_v44  ;;  %v10095_v62 = vld [vmem:[#allocation2 + $0x130] sm:$0xff]  ;;  %v10096_v3 = vld [vmem:[#allocation2 + $0x168] sm:$0xff]  ;;  %v10097_v19 = vld [vmem:[#allocation2 + $0x160] sm:$0xff] }
 0x2c3   : > { %3636 = vmatmul.mubr.bf16.gmra.mrb[72].mxu0 %v11253_v17  ;;  %v9927_v17 = vld [vmem:[%s12715_s3 + $0x570] ss:$8 sps:$4 sm:$0xff]   ;;  %v5406_v26 = vrot.slane %v5404_v25, 1  ;;  %v5409_v11 = vshll.u32 %v5159_v22, 16  ;;  %v5375_v21 = vrot.slane %v5373_v36, 1  ;;  %v5390_v10 = vshrl.u32 %v5156_v6, 16 }
 0x2c4   : > { %3645 = vmatprep.mubr.bf16.mxu0 %v11260_v61  ;;  %5869 = vmatmul.mubr.bf16.gmra.mrb[44].mxu1 %v11836_v15  ;;  %v9932_v61 = vld [vmem:[%s12715_s3 + $0x584] ss:$8 sps:$4 sm:$0xff]  }
 0x2c5   : > { %5878 = vmatprep.mubr.bf16.mxu1 %v11841_v47  ;;  %6423 = vmatpush1.bf16.msra.mxu1 %v9924_v5  ;;  %v5351_v5 = vrot.slane %v5349_v2, 1  ;;  %v5411_v16 = vrot.slane %v5409_v11, 1  ;;  %v5165_v2 = vld [vmem:[#allocation2 + $0x1f8] sm:$0xff]  ;;  %v5395_v14 = vor.u32 %v5394_v63, %v5390_v10  ;;  %v5169_v36 = vld [vmem:[#allocation2 + $0x228] sm:$0xff] }
 0x2c6   : > { %6424 = vmatprep.subr.bf16.mxu1 %v9929_v53  ;;  %v5368_v53 = vshll.u32 %v5152_v34, 16  ;;  %v9956_v34 = vld [vmem:[%s12715_s3 + $0x804] ss:$8 sps:$4 sm:$0xff]   ;;  %v5175_v10 = vld [vmem:[#allocation2 + $0x268] sm:$0x1] }
 0x2c7   : > { %v11901_v50 = vsel %vm5196_vm6, %v5347_v33, %v5351_v5  ;;  %v5162_v33 = vld [vmem:[#allocation2 + $0x1d0] sm:$0x1]  ;;  %v5452_v5 = vshll.u32 %v5165_v2, 16 }
 0x2c8   : > { %v5421_v25 = vshll.u32 %v5162_v33, 16 }
 0x2c9   : > { %6425 = vmatpush1.bf16.msra.mxu1 %v9927_v17  ;;  %v10093_v17 = vld [vmem:[#allocation2 + $0x100] sm:$0xff] }
 0x2ca   : > { %6426 = vmatprep.subr.bf16.mxu1 %v9932_v61  ;;  %v5370_v61 = vrot.slane %v5368_v53, 1  ;;  %v5167_v53 = vld [vmem:[#allocation2 + $0x208] sm:$0x1]  ;;  %v5423_v11 = vrot.slane %v5421_v25, 1 }
 0x2cb   : > { %3646 = vmatmul.mubr.bf16.gmra.mrb[76].mxu0 %v11285_v59  ;;  %v9933_v59 = vld [vmem:[%s12715_s3 + $0x590] ss:$8 sps:$4 sm:$0xff]  }
 0x2cc   : > { %3655 = vmatprep.mubr.bf16.mxu0 %v11292_v0  ;;  %5879 = vmatmul.mubr.bf16.gmra.mrb[48].mxu1 %v11858_v27  ;;  %v9938_v0 = vld [vmem:[%s12715_s3 + $0x5a4] ss:$8 sps:$4 sm:$0xff]   ;;  %v5371_v51 = vor.u32 %v5370_v61, %v5366_v57 }
 0x2cd   : > { %5888 = vmatprep.mubr.bf16.mxu1 %v11863_v20  ;;  %6427 = vmatpush1.bf16.msra.mxu1 %v9930_v43  ;;  %v9945_v43 = vld [vmem:[%s12715_s3 + $0x5d0] ss:$8 sps:$4 sm:$0xff]  }
 0x2ce   : > { %6428 = vmatprep.subr.bf16.mxu1 %v9935_v42  ;;  %v5402_v42 = vshrl.u32 %v5157_v56, 16  ;;  %v11921_v29 = vsel %vm5196_vm6, %v5371_v51, %v5375_v21  ;;  %v5399_v56 = vrot.slane %v5397_v37, 1 }
 0x2d0   : > { %v5407_v23 = vor.u32 %v5406_v26, %v5402_v42  ;;  %v11935_v44 = vsel %vm5196_vm6, %v5395_v14, %v5399_v56  ;;  %v5476_v42 = vshll.u32 %v5169_v36, 16  ;;  %v5505_v56 = vshll.u32 %v5175_v10, 16  ;;  %v5185_v10 = vld [vmem:[#allocation2 + $0x2e8] sm:$0xff] }
 0x2d1   : > { %6429 = vmatpush1.bf16.msra.mxu1 %v9933_v59  ;;  %v5428_v59 = vshll.u32 %v5161_v12, 16 }
 0x2d2   : > { %6430 = vmatprep.subr.bf16.mxu1 %v9938_v0  ;;  %v9948_v0 = vld [vmem:[%s12715_s3 + $0x5e0] ss:$8 sps:$4 sm:$0xff]   ;;  %v11925_v4 = vsel %vm5196_vm6, %v5407_v23, %v5411_v16  ;;  %v5478_v16 = vrot.slane %v5476_v42, 1  ;;  %v5507_v25 = vrot.slane %v5505_v56, 1 }
 0x2d3   : > { %3656 = vmatmul.mubr.bf16.gmra.mrb[80].mxu0 %v11317_v39  ;;  %v9939_v39 = vld [vmem:[%s12715_s3 + $0x5b0] ss:$8 sps:$4 sm:$0xff]   ;;  %v5430_v46 = vrot.slane %v5428_v59, 1  ;;  %v5168_v59 = vld [vmem:[#allocation2 + $0x220] sm:$0xff] }
 0x2d4   : > { %3665 = vmatprep.mubr.bf16.mxu0 %v11324_v41  ;;  %5889 = vmatmul.mubr.bf16.gmra.mrb[52].mxu1 %v11880_v35  ;;  %v9944_v41 = vld [vmem:[%s12715_s3 + $0x5c4] ss:$8 sps:$4 sm:$0xff]   ;;  %v5464_v37 = vshll.u32 %v5168_v59, 16 }
 0x2d5   : > { %5898 = vmatprep.mubr.bf16.mxu1 %v11885_v13  ;;  %6431 = vmatpush1.bf16.msra.mxu1 %v9936_v48  ;;  %v5433_v48 = vshll.u32 %v5163_v55, 16  ;;  %v5431_v40 = vor.u32 %v5430_v46, %v5426_v49 }
 0x2d6   : > { %6432 = vmatprep.subr.bf16.mxu1 %v9941_v54  ;;  %v5160_v54 = vld [vmem:[#allocation2 + $0x1c0] sm:$0xff] }
 0x2d7   : > { %v5414_v61 = vshrl.u32 %v5160_v54, 16 }
 0x2d9   : > { %6433 = vmatpush1.bf16.msra.mxu1 %v9939_v39  ;;  %v5416_v39 = vshll.u32 %v5160_v54, 16 }
 0x2da   : > { %6434 = vmatprep.subr.bf16.mxu1 %v9944_v41  ;;  %v5435_v41 = vrot.slane %v5433_v48, 1  ;;  %v5170_v48 = vld [vmem:[#allocation2 + $0x230] sm:$0x1] }
 0x2db   : > { %3666 = vmatmul.mubr.bf16.gmra.mrb[84].mxu0 %v10093_v17  ;;  %v5418_v31 = vrot.slane %v5416_v39, 1  ;;  %v5164_v17 = vld [vmem:[#allocation2 + $0x1f0] sm:$0xff]  ;;  %v5469_v49 = vshll.u32 %v5170_v48, 16 }
 0x2dc   : > { %3675 = vmatprep.mubr.bf16.mxu0 %v10094_v38  ;;  %5899 = vmatmul.mubr.bf16.gmra.mrb[56].mxu1 %v11901_v50  ;;  %v11939_v22 = vsel %vm5196_vm6, %v5431_v40, %v5435_v41  ;;  %v5450_v38 = vshrl.u32 %v5165_v2, 16  ;;  %v5440_v6 = vshll.u32 %v5164_v17, 16  ;;  %v5438_v55 = vshrl.u32 %v5164_v17, 16  ;;  %v5172_v39 = vld [vmem:[#allocation2 + $0x250] sm:$0xff]  ;;  %v5177_v41 = vld [vmem:[#allocation2 + $0x288] sm:$0xff] }
 0x2dd   : > { %5908 = vmatprep.mubr.bf16.mxu1 %v11905_v8  ;;  %6435 = vmatpush1.bf16.msra.mxu1 %v9942_v18  ;;  %v5454_v18 = vrot.slane %v5452_v5, 1  ;;  %v5419_v26 = vor.u32 %v5418_v31, %v5414_v61  ;;  %v5462_v40 = vshrl.u32 %v5168_v59, 16  ;;  %v5179_v17 = vld [vmem:[#allocation2 + $0x298] sm:$0x1]  ;;  %v5522_v42 = vshrl.u32 %v5177_v41, 16  ;;  %v5180_v48 = vld [vmem:[#allocation2 + $0x2b0] sm:$0xff] }
 0x2de   : > { %6436 = vmatprep.subr.bf16.mxu1 %v9947_v28  ;;  %v5457_v28 = vshll.u32 %v5167_v53, 16  ;;  %v5442_v21 = vrot.slane %v5440_v6, 1  ;;  %v5471_v53 = vrot.slane %v5469_v49, 1  ;;  %v5529_v6 = vshll.u32 %v5179_v17, 16  ;;  %v5178_v59 = vld [vmem:[#allocation2 + $0x290] sm:$0x1] }
 0x2df   : > { %v5455_v57 = vor.u32 %v5454_v18, %v5450_v38  ;;  %v11943_v51 = vsel %vm5196_vm6, %v5419_v26, %v5423_v11  ;;  %v5174_v18 = vld [vmem:[#allocation2 + $0x260] sm:$0x1]  ;;  %v5536_v56 = vshll.u32 %v5180_v48, 16 }
 0x2e0   : > { %v5459_v12 = vrot.slane %v5457_v28, 1  ;;  %v5524_v28 = vshll.u32 %v5177_v41, 16  ;;  %v5493_v38 = vshll.u32 %v5174_v18, 16  ;;  %v5182_v41 = vld [vmem:[#allocation2 + $0x2c0] sm:$0x1] }
 0x2e1   : > { %6437 = vmatpush1.bf16.msra.mxu1 %v9945_v43  ;;  %v5166_v43 = vld [vmem:[#allocation2 + $0x200] sm:$0x1] }
 0x2e2   : > { %6438 = vmatprep.subr.bf16.mxu1 %v9950_v30  ;;  %v5171_v30 = vld [vmem:[#allocation2 + $0x238] sm:$0x1]  ;;  %v5445_v45 = vshll.u32 %v5166_v43, 16  ;;  %v11947_v23 = vsel %vm5196_vm6, %v5455_v57, %v5459_v12  ;;  %v5526_v11 = vrot.slane %v5524_v28, 1  ;;  %v5176_v57 = vld [vmem:[#allocation2 + $0x280] sm:$0xff]  ;;  %v5486_v12 = vshrl.u32 %v5172_v39, 16 }
 0x2e3   : > { %3676 = vmatmul.mubr.bf16.gmra.mrb[88].mxu0 %v10095_v62  ;;  %v5481_v1 = vshll.u32 %v5171_v30, 16  ;;  %v5443_v62 = vor.u32 %v5442_v21, %v5438_v55  ;;  %v5181_v43 = vld [vmem:[#allocation2 + $0x2b8] sm:$0xff]  ;;  %v5495_v21 = vrot.slane %v5493_v38, 1  ;;  %v5184_v17 = vld [vmem:[#allocation2 + $0x2e0] sm:$0xff]  ;;  %v5570_v38 = vshrl.u32 %v5185_v10, 16 }
 0x2e4   : > { %3685 = vmatprep.mubr.bf16.mxu0 %v10096_v3  ;;  %5909 = vmatmul.mubr.bf16.gmra.mrb[60].mxu1 %v11921_v29  ;;  %v5447_v63 = vrot.slane %v5445_v45, 1  ;;  %v5512_v45 = vshll.u32 %v5176_v57, 16  ;;  %v5548_v55 = vshll.u32 %v5181_v43, 16 }
 0x2e5   : > { %5918 = vmatprep.mubr.bf16.mxu1 %v11925_v4  ;;  %6439 = vmatpush1.bf16.msra.mxu1 %v9948_v0  ;;  %v5173_v0 = vld [vmem:[#allocation2 + $0x258] sm:$0xff]  ;;  %v5483_v46 = vrot.slane %v5481_v1, 1  ;;  %v5531_v1 = vrot.slane %v5529_v6, 1 }
 0x2e6   : > { %6440 = vmatprep.subr.bf16.mxu1 %v9953_v24  ;;  %v5474_v24 = vshrl.u32 %v5169_v36, 16  ;;  %v5500_v54 = vshll.u32 %v5173_v0, 16  ;;  %v11951_v2 = vsel %vm5196_vm6, %v5443_v62, %v5447_v63  ;;  %v5498_v33 = vshrl.u32 %v5173_v0, 16  ;;  %v5183_v0 = vld [vmem:[#allocation2 + $0x2c8] sm:$0x1] }
 0x2e7   : > { %v5514_v62 = vrot.slane %v5512_v45, 1  ;;  %v5517_v63 = vshll.u32 %v5178_v59, 16 }
 0x2e8   : > { %v5479_v3 = vor.u32 %v5478_v16, %v5474_v24  ;;  %v5502_v14 = vrot.slane %v5500_v54, 1  ;;  %v5527_v16 = vor.u32 %v5526_v11, %v5522_v42  ;;  %v5510_v54 = vshrl.u32 %v5176_v57, 16  ;;  %v5186_v42 = vld [vmem:[#allocation2 + $0x2f0] sm:$0x1] }
 0x2e9   : > { %6441 = vmatpush1.bf16.msra.mxu1 %v9951_v60  ;;  %v5466_v60 = vrot.slane %v5464_v37, 1  ;;  %v5560_v57 = vshll.u32 %v5184_v17, 16  ;;  %v5565_v45 = vshll.u32 %v5186_v42, 16  ;;  %v9987_v42 = vld [vmem:[%s12715_s3 + $0x8b0] ss:$8 sps:$4 sm:$0xff]  }
 0x2ea   : > { %7014 = vmatprep.subr.bf16.mxu1 %v9956_v34  ;;  %v11955_v34 = vsel %vm5196_vm6, %v5479_v3, %v5483_v46  ;;  %v5503_v31 = vor.u32 %v5502_v14, %v5498_v33  ;;  %v11971_v37 = vsel %vm5196_vm6, %v5527_v16, %v5531_v1  ;;  %v5550_v3 = vrot.slane %v5548_v55, 1 }
 0x2eb   : > { %3686 = vmatmul.mubr.bf16.gmra.mrb[92].mxu0 %v10097_v19  ;;  %v5467_v5 = vor.u32 %v5466_v60, %v5462_v40  ;;  %v5488_v19 = vshll.u32 %v5172_v39, 16  ;;  %v5553_v46 = vshll.u32 %v5183_v0, 16  ;;  %v5546_v60 = vshrl.u32 %v5181_v43, 16 }
 0x2ec   : > { %5919 = vmatmul.mubr.bf16.gmra.mrb[0].mxu1 %v11935_v44  ;;  %v11963_v26 = vsel %vm5196_vm6, %v5503_v31, %v5507_v25  ;;  %v5515_v49 = vor.u32 %v5514_v62, %v5510_v54  ;;  %v5519_v14 = vrot.slane %v5517_v63, 1  ;;  %v5572_v33 = vshll.u32 %v5185_v10, 16  ;;  %v9954_v62 = vld [vmem:[%s12715_s3 + $0x800] ss:$8 sps:$4 sm:$0xff]   ;;  %v9959_v63 = vld [vmem:[%s12715_s3 + $0x814] ss:$8 sps:$4 sm:$0xff]  }
 0x2ed   : > { %5928 = vmatprep.mubr.bf16.mxu1 %v11939_v22  ;;  %v11959_v61 = vsel %vm5196_vm6, %v5467_v5, %v5471_v53  ;;  %v5490_v36 = vrot.slane %v5488_v19, 1  ;;  %v5551_v39 = vor.u32 %v5550_v3, %v5546_v60  ;;  %v5555_v40 = vrot.slane %v5553_v46, 1  ;;  %v5187_v5 = vld [vmem:[#allocation2 + $0x2f8] sm:$0x1]  ;;  %v9960_v46 = vld [vmem:[%s12715_s3 + $0x820] ss:$8 sps:$4 sm:$0xff]  }
 0x2ee   : > { %v11975_v53 = vsel %vm5196_vm6, %v5515_v49, %v5519_v14  ;;  %v5538_v19 = vrot.slane %v5536_v56, 1  ;;  %v5541_v31 = vshll.u32 %v5182_v41, 16  ;;  %v5574_v18 = vrot.slane %v5572_v33, 1  ;;  %v9957_v3 = vld [vmem:[%s12715_s3 + $0x810] ss:$8 sps:$4 sm:$0xff]  }
 0x2ef   : > { %v5491_v30 = vor.u32 %v5490_v36, %v5486_v12  ;;  %v11979_v25 = vsel %vm5196_vm6, %v5551_v39, %v5555_v40  ;;  %v5577_v28 = vshll.u32 %v5187_v5, 16  ;;  %v5534_v36 = vshrl.u32 %v5180_v48, 16  ;;  %v9963_v48 = vld [vmem:[%s12715_s3 + $0x830] ss:$8 sps:$4 sm:$0xff]   ;;  %v9968_v54 = vld [vmem:[%s12715_s3 + $0x844] ss:$8 sps:$4 sm:$0xff]  }
 0x2f0   : > { %v5543_v6 = vrot.slane %v5541_v31, 1  ;;  %v5575_v12 = vor.u32 %v5574_v18, %v5570_v38  ;;  %v5558_v1 = vshrl.u32 %v5184_v17, 16  ;;  %v5567_v55 = vrot.slane %v5565_v45, 1  ;;  %v9966_v10 = vld [vmem:[%s12715_s3 + $0x840] ss:$8 sps:$4 sm:$0xff]  }
 0x2f1   : > { %v11967_v24 = vsel %vm5196_vm6, %v5491_v30, %v5495_v21  ;;  %v5539_v11 = vor.u32 %v5538_v19, %v5534_v36  ;;  %v5579_v43 = vrot.slane %v5577_v28, 1  ;;  %v5562_v21 = vrot.slane %v5560_v57, 1  ;;  %v9971_v60 = vld [vmem:[%s12715_s3 + $0x854] ss:$8 sps:$4 sm:$0xff]   ;;  %v9969_v49 = vld [vmem:[%s12715_s3 + $0x850] ss:$8 sps:$4 sm:$0xff]  }
 0x2f2   : > { %v9974_v14 = vld [vmem:[%s12715_s3 + $0x864] ss:$8 sps:$4 sm:$0xff]   ;;  %v9972_v56 = vld [vmem:[%s12715_s3 + $0x860] ss:$8 sps:$4 sm:$0xff]   ;;  %v9977_v39 = vld [vmem:[%s12715_s3 + $0x874] ss:$8 sps:$4 sm:$0xff]  }
 0x2f3   : > { %v11983_v30 = vsel %vm5196_vm6, %v5539_v11, %v5543_v6  ;;  %v11987_v16 = vsel %vm5196_vm6, %v5575_v12, %v5579_v43  ;;  %v5563_v59 = vor.u32 %v5562_v21, %v5558_v1  ;;  %v9975_v40 = vld [vmem:[%s12715_s3 + $0x870] ss:$8 sps:$4 sm:$0xff]   ;;  %v9980_v33 = vld [vmem:[%s12715_s3 + $0x884] ss:$8 sps:$4 sm:$0xff]   ;;  %v9978_v18 = vld [vmem:[%s12715_s3 + $0x880] ss:$8 sps:$4 sm:$0xff]  }
 0x2f4   : > { %5929 = vmatmul.mubr.bf16.gmra.mrb[4].mxu1 %v11943_v51  ;;  %v9983_v28 = vld [vmem:[%s12715_s3 + $0x894] ss:$8 sps:$4 sm:$0xff]   ;;  %v9981_v17 = vld [vmem:[%s12715_s3 + $0x890] ss:$8 sps:$4 sm:$0xff]   ;;  %v9986_v38 = vld [vmem:[%s12715_s3 + $0x8a4] ss:$8 sps:$4 sm:$0xff]  }
 0x2f5   : > { %5938 = vmatprep.mubr.bf16.mxu1 %v11947_v23  ;;  %v11991_v0 = vsel %vm5196_vm6, %v5563_v59, %v5567_v55  ;;  %v9984_v12 = vld [vmem:[%s12715_s3 + $0x8a0] ss:$8 sps:$4 sm:$0xff]   ;;  %v9989_v43 = vld [vmem:[%s12715_s3 + $0x8b4] ss:$8 sps:$4 sm:$0xff]   ;;  %v9992_v45 = vld [vmem:[%s12715_s3 + $0x8c4] ss:$8 sps:$4 sm:$0xff]  }
 0x2fc   : > { %5939 = vmatmul.mubr.bf16.gmra.mrb[8].mxu1 %v11951_v2 }
 0x2fd   : > { %5948 = vmatprep.mubr.bf16.mxu1 %v11955_v34 }
 0x304   : > { %5949 = vmatmul.mubr.bf16.gmra.mrb[12].mxu1 %v11959_v61 }
 0x305   : > { %5958 = vmatprep.mubr.bf16.mxu1 %v11963_v26 }
 0x30c   : > { %5959 = vmatmul.mubr.bf16.gmra.mrb[16].mxu1 %v11967_v24 }
 0x30d   : > { %5968 = vmatprep.mubr.bf16.mxu1 %v11971_v37 }
 0x314   : > { %5969 = vmatmul.mubr.bf16.gmra.mrb[20].mxu1 %v11975_v53 }
 0x315   : > { %5978 = vmatprep.mubr.bf16.mxu1 %v11979_v25 }
 0x31c   : > { %5979 = vmatmul.mubr.bf16.gmra.mrb[24].mxu1 %v11983_v30 }
 0x31d   : > { %5988 = vmatprep.mubr.bf16.mxu1 %v11987_v16 }
 0x324   : > { %5989 = vmatmul.mubr.bf16.gmra.mrb[28].mxu1 %v11991_v0 }
 0x325   : > { %6442 = vmatprep.mubr.bf16.mxu1 %v11774_v7  ;;  %v9962_v7 = vld [vmem:[%s12715_s3 + $0x824] ss:$8 sps:$4 sm:$0xff]  }
 0x32c   : > { %6443 = vmatmul.mubr.bf16.vlgmr.msra.gmra.mrb[32].mxu1 %v11792_v58  ;;  %v9965_v58 = vld [vmem:[%s12715_s3 + $0x834] ss:$8 sps:$4 sm:$0xff]  }
 0x32d   : > { %7015 = vmatpush1.bf16.msra.mxu1 %v9954_v62  ;;  %6452 = vmatprep.mubr.bf16.mxu1 %v11797_v32  ;;  %v9990_v62 = vld [vmem:[%s12715_s3 + $0x8c0] ss:$8 sps:$4 sm:$0xff]  }
 0x32e   : > { %7016 = vmatprep.subr.bf16.mxu1 %v9959_v63  ;;  %v9995_v63 = vld [vmem:[%s12715_s3 + $0x8d4] ss:$8 sps:$4 sm:$0xff]  }
 0x331   : > { %7017 = vmatpush1.bf16.msra.mxu1 %v9957_v3  ;;  %v9993_v3 = vld [vmem:[%s12715_s3 + $0x8d0] ss:$8 sps:$4 sm:$0xff]  }
 0x332   : > { %7018 = vmatprep.subr.bf16.mxu1 %v9962_v7 }
 0x334   : > { %6453 = vmatmul.mubr.bf16.gmra.mrb[36].mxu1 %v11814_v9 }
 0x335   : > { %6462 = vmatprep.mubr.bf16.mxu1 %v11819_v52  ;;  %7019 = vmatpush1.bf16.msra.mxu1 %v9960_v46  ;;  %v9998_v46 = vld [vmem:[%s12715_s3 + $0x8e4] ss:$8 sps:$4 sm:$0xff]  }
 0x336   : > { %7020 = vmatprep.subr.bf16.mxu1 %v9965_v58 }
 0x339   : > { %7021 = vmatpush1.bf16.msra.mxu1 %v9963_v48 }
 0x33a   : > { %7022 = vmatprep.subr.bf16.mxu1 %v9968_v54 }
 0x33c   : > { %6463 = vmatmul.mubr.bf16.gmra.mrb[40].mxu1 %v11836_v15 }
 0x33d   : > { %6472 = vmatprep.mubr.bf16.mxu1 %v11841_v47  ;;  %7023 = vmatpush1.bf16.msra.mxu1 %v9966_v10  ;;  %v9996_v10 = vld [vmem:[%s12715_s3 + $0x8e0] ss:$8 sps:$4 sm:$0xff]  }
 0x33e   : > { %7024 = vmatprep.subr.bf16.mxu1 %v9971_v60  ;;  %v10001_v60 = vld [vmem:[%s12715_s3 + $0x8f4] ss:$8 sps:$4 sm:$0xff]  }
 0x341   : > { %7025 = vmatpush1.bf16.msra.mxu1 %v9969_v49  ;;  %v9999_v49 = vld [vmem:[%s12715_s3 + $0x8f0] ss:$8 sps:$4 sm:$0xff]  }
 0x342   : > { %7026 = vmatprep.subr.bf16.mxu1 %v9974_v14 }
 0x344   : > { %6473 = vmatmul.mubr.bf16.gmra.mrb[44].mxu1 %v11858_v27 }
 0x345   : > { %6482 = vmatprep.mubr.bf16.mxu1 %v11863_v20  ;;  %7027 = vmatpush1.bf16.msra.mxu1 %v9972_v56 }
 0x346   : > { %v12048_v41 = vpop.f32.mrb[96].mxu0  ;;  %7028 = vmatprep.subr.bf16.mxu1 %v9977_v39 }
 0x347   : > { %v12053_v5 = vpop.f32.mrb[97].mxu0 }
 0x348   : > { %v12055_v19 = vpop.f32.mrb[98].mxu0 }
 0x349   : > { %v12057_v31 = vpop.f32.mrb[99].mxu0  ;;  %7029 = vmatpush1.bf16.msra.mxu1 %v9975_v40 }
 0x34a   : > { %7030 = vmatprep.subr.bf16.mxu1 %v9980_v33 }
 0x34c   : > { %6483 = vmatmul.mubr.bf16.gmra.mrb[48].mxu1 %v11880_v35 }
 0x34d   : > { %6492 = vmatprep.mubr.bf16.mxu1 %v11885_v13  ;;  %7031 = vmatpush1.bf16.msra.mxu1 %v9978_v18 }
 0x34e   : > { %v12070_v36 = vpop.f32.mrb[100].mxu0  ;;  %7032 = vmatprep.subr.bf16.mxu1 %v9983_v28 }
 0x34f   : > { %12748 = vst [vmem:[#allocation11_spill] sm:$0xff] %v12070_v36  ;;  %v12075_v11 = vpop.f32.mrb[101].mxu0 }
 0x350   : > { %12749 = vst [vmem:[#allocation10_spill] sm:$0xff] %v12075_v11  ;;  %v12077_v6 = vpop.f32.mrb[102].mxu0 }
 0x351   : > { %12750 = vst [vmem:[#allocation13_spill] sm:$0xff] %v12077_v6  ;;  %v12079_v57 = vpop.f32.mrb[103].mxu0  ;;  %7033 = vmatpush1.bf16.msra.mxu1 %v9981_v17 }
 0x352   : > { %12751 = vst [vmem:[#allocation12_spill] sm:$0xff] %v12079_v57  ;;  %7034 = vmatprep.subr.bf16.mxu1 %v9986_v38 }
 0x354   : > { %6493 = vmatmul.mubr.bf16.gmra.mrb[52].mxu1 %v11901_v50 }
 0x355   : > { %6502 = vmatprep.mubr.bf16.mxu1 %v11905_v8  ;;  %7035 = vmatpush1.bf16.msra.mxu1 %v9984_v12 }
 0x356   : > { %v12092_v21 = vpop.f32.mrb[104].mxu0  ;;  %7036 = vmatprep.subr.bf16.mxu1 %v9989_v43 }
 0x357   : > { %12752 = vst [vmem:[#allocation14_spill] sm:$0xff] %v12092_v21  ;;  %v12097_v1 = vpop.f32.mrb[105].mxu0 }
 0x358   : > { %12753 = vst [vmem:[#allocation15_spill] sm:$0xff] %v12097_v1  ;;  %v12099_v59 = vpop.f32.mrb[106].mxu0 }
 0x359   : > { %12754 = vst [vmem:[#allocation16_spill] sm:$0xff] %v12099_v59  ;;  %v12101_v55 = vpop.f32.mrb[107].mxu0  ;;  %7037 = vmatpush1.bf16.msra.mxu1 %v9987_v42 }
 0x35a   : > { %12755 = vst [vmem:[#allocation17_spill] sm:$0xff] %v12101_v55  ;;  %7038 = vmatprep.subr.bf16.mxu1 %v9992_v45 }
 0x35c   : > { %6503 = vmatmul.mubr.bf16.gmra.mrb[56].mxu1 %v11921_v29 }
 0x35d   : > { %6512 = vmatprep.mubr.bf16.mxu1 %v11925_v4  ;;  %7039 = vmatpush1.bf16.msra.mxu1 %v9990_v62 }
 0x35e   : > { %v12114_v7 = vpop.f32.mrb[108].mxu0  ;;  %7040 = vmatprep.subr.bf16.mxu1 %v9995_v63 }
 0x35f   : > { %12756 = vst [vmem:[#allocation18_spill] sm:$0xff] %v12114_v7  ;;  %v12119_v58 = vpop.f32.mrb[109].mxu0 }
 0x360   : > { %12757 = vst [vmem:[#allocation19_spill] sm:$0xff] %v12119_v58  ;;  %v12121_v48 = vpop.f32.mrb[110].mxu0 }
 0x361   : > { %12758 = vst [vmem:[#allocation20_spill] sm:$0xff] %v12121_v48  ;;  %v12123_v54 = vpop.f32.mrb[111].mxu0  ;;  %7041 = vmatpush1.bf16.msra.mxu1 %v9993_v3  ;;  %v5190_v48 = vld [vmem:[#allocation2 + $0x320] sm:$0x1] }
 0x362   : > { %12759 = vst [vmem:[#allocation21_spill] sm:$0xff] %v12123_v54  ;;  %7042 = vmatprep.subr.bf16.mxu1 %v9998_v46 }
 0x364   : > { %6513 = vmatmul.mubr.bf16.gmra.mrb[60].mxu1 %v11935_v44 }
 0x365   : > { %6522 = vmatprep.mubr.bf16.mxu1 %v11939_v22  ;;  %7043 = vmatpush1.bf16.msra.mxu1 %v9996_v10 }
 0x366   : > { %v12136_v14 = vpop.f32.mrb[112].mxu0  ;;  %7044 = vmatprep.subr.bf16.mxu1 %v10001_v60 }
 0x367   : > { %12760 = vst [vmem:[#allocation22_spill] sm:$0xff] %v12136_v14  ;;  %v12138_v56 = vpop.f32.mrb[113].mxu0 }
 0x368   : > { %12761 = vst [vmem:[#allocation23_spill] sm:$0xff] %v12138_v56  ;;  %v12140_v39 = vpop.f32.mrb[114].mxu0 }
 0x369   : > { %12762 = vst [vmem:[#allocation24_spill] sm:$0xff] %v12140_v39  ;;  %v12142_v40 = vpop.f32.mrb[115].mxu0  ;;  %7045 = vmatpush1.bf16.msra.mxu1 %v9999_v49 }
 0x36a   : > { %12763 = vst [vmem:[#allocation25_spill] sm:$0xff] %v12142_v40 }
 0x36c   : > { %6523 = vmatmul.mubr.bf16.gmra.mrb[0].mxu1 %v11943_v51 }
 0x36d   : > { %6532 = vmatprep.mubr.bf16.mxu1 %v11947_v23 }
 0x36e   : > { %v12146_v33 = vpop.f32.mrb[116].mxu0 }
 0x36f   : > { %12764 = vst [vmem:[#allocation26_spill] sm:$0xff] %v12146_v33  ;;  %v12148_v18 = vpop.f32.mrb[117].mxu0 }
 0x370   : > { %12765 = vst [vmem:[#allocation27_spill] sm:$0xff] %v12148_v18  ;;  %v12150_v28 = vpop.f32.mrb[118].mxu0  ;;  %v5188_v18 = vld [vmem:[#allocation2 + $0x310] sm:$0xff] }
 0x371   : > { %12766 = vst [vmem:[#allocation28_spill] sm:$0xff] %v12150_v28  ;;  %v12152_v17 = vpop.f32.mrb[119].mxu0  ;;  %v6194_v39 = vshll.u32 %v5188_v18, 16  ;;  %v6192_v7 = vshrl.u32 %v5188_v18, 16 }
 0x372   : > { %12767 = vst [vmem:[#allocation29_spill] sm:$0xff] %v12152_v17 }
 0x373   : > { %v6196_v55 = vrot.slane %v6194_v39, 1 }
 0x374   : > { %6533 = vmatmul.mubr.bf16.gmra.mrb[4].mxu1 %v11951_v2 }
 0x375   : > { %6542 = vmatprep.mubr.bf16.mxu1 %v11955_v34  ;;  %v6197_v1 = vor.u32 %v6196_v55, %v6192_v7  ;;  %v10007_v55 = vld [vmem:[%s12717_s5 + $0x14] ss:$8 sps:$4 sm:$0xff]  }
 0x376   : > { %v12156_v38 = vpop.f32.mrb[120].mxu0 }
 0x377   : > { %12768 = vst [vmem:[#allocation30_spill] sm:$0xff] %v12156_v38  ;;  %v12158_v12 = vpop.f32.mrb[121].mxu0 }
 0x378   : > { %12769 = vst [vmem:[#allocation31_spill] sm:$0xff] %v12158_v12  ;;  %v12160_v43 = vpop.f32.mrb[122].mxu0  ;;  %v5191_v12 = vld [vmem:[#allocation2 + $0x328] sm:$0x1] }
 0x379   : > { %12770 = vst [vmem:[#allocation32_spill] sm:$0xff] %v12160_v43  ;;  %v12162_v42 = vpop.f32.mrb[123].mxu0  ;;  %v6211_v28 = vshll.u32 %v5191_v12, 16 }
 0x37a   : > { %12771 = vst [vmem:[#allocation33_spill] sm:$0xff] %v12162_v42 }
 0x37b   : > { %v6213_v54 = vrot.slane %v6211_v28, 1 }
 0x37c   : > { %6543 = vmatmul.mubr.bf16.gmra.mrb[8].mxu1 %v11959_v61 }
 0x37d   : > { %6552 = vmatprep.mubr.bf16.mxu1 %v11963_v26 }
 0x37e   : > { %v12166_v45 = vpop.f32.mrb[124].mxu0 }
 0x37f   : > { %12772 = vst [vmem:[#allocation34_spill] sm:$0xff] %v12166_v45  ;;  %v12168_v62 = vpop.f32.mrb[125].mxu0 }
 0x380   : > { %12773 = vst [vmem:[#allocation35_spill] sm:$0xff] %v12168_v62  ;;  %v12170_v63 = vpop.f32.mrb[126].mxu0  ;;  %v5189_v62 = vld [vmem:[#allocation2 + $0x318] sm:$0xff] }
 0x381   : > { %12774 = vst [vmem:[#allocation36_spill] sm:$0xff] %v12170_v63  ;;  %v12172_v3 = vpop.f32.mrb[127].mxu0  ;;  %v6206_v42 = vshll.u32 %v5189_v62, 16  ;;  %v6204_v38 = vshrl.u32 %v5189_v62, 16  ;;  %v6199_v62 = vshll.u32 %v5190_v48, 16 }
 0x382   : > { %12775 = vst [vmem:[#allocation37_spill] sm:$0xff] %v12172_v3  ;;  %v10002_v48 = vld [vmem:[%s12717_s5] ss:$8 sps:$4 sm:$0xff]  }
 0x383   : > { %v6208_v17 = vrot.slane %v6206_v42, 1 }
 0x384   : > { %6553 = vmatmul.mubr.bf16.gmra.mrb[12].mxu1 %v11967_v24 }
 0x385   : > { %6562 = vmatprep.mubr.bf16.mxu1 %v11971_v37  ;;  %v6209_v14 = vor.u32 %v6208_v17, %v6204_v38  ;;  %v6201_v17 = vrot.slane %v6199_v62, 1 }
 0x386   : > { %v12176_v46 = vpop.f32.mrb[64].mxu0 }
 0x387   : > { %v12178_v10 = vpop.f32.mrb[65].mxu0  ;;  %v12206_v12 = vsel %vm5196_vm6, %v6209_v14, %v6213_v54  ;;  %v12218_v39 = vsel %vm5196_vm6, %v6197_v1, %v6201_v17  ;;  %v10004_v54 = vld [vmem:[%s12717_s5 + $0x4] ss:$8 sps:$4 sm:$0xff]   ;;  %v10005_v14 = vld [vmem:[%s12717_s5 + $0x10] ss:$8 sps:$4 sm:$0xff]  }
 0x388   : > { %v12180_v60 = vpop.f32.mrb[66].mxu0  ;;  %7901 = vmatprep.subr.bf16.mxu0 %v10004_v54  ;;  %v10008_v17 = vld [vmem:[%s12717_s5 + $0x20] ss:$8 sps:$4 sm:$0xff]  }
 0x389   : > { %v12182_v49 = vpop.f32.mrb[67].mxu0  ;;  %7902 = vmatpush1.bf16.msra.mxu0 %v10002_v48  ;;  %v10013_v48 = vld [vmem:[%s12717_s5 + $0x34] ss:$8 sps:$4 sm:$0xff]  }
 0x38a   : > { %7903 = vmatprep.subr.bf16.mxu0 %v10007_v55 }
 0x38c   : > { %6563 = vmatmul.mubr.bf16.gmra.mrb[16].mxu1 %v11975_v53 }
 0x38d   : > { %6572 = vmatprep.mubr.bf16.mxu1 %v11979_v25  ;;  %7904 = vmatpush1.bf16.msra.mxu0 %v10005_v14  ;;  %v10011_v14 = vld [vmem:[%s12717_s5 + $0x30] ss:$8 sps:$4 sm:$0xff]  }
 0x38e   : > { %v12186_v63 = vpop.f32.mrb[68].mxu0 }
 0x38f   : > { %v12188_v3 = vpop.f32.mrb[69].mxu0 }
 0x390   : > { %v12190_v45 = vpop.f32.mrb[70].mxu0 }
 0x391   : > { %v12192_v43 = vpop.f32.mrb[71].mxu0 }
 0x394   : > { %6573 = vmatmul.mubr.bf16.gmra.mrb[20].mxu1 %v11983_v30 }
 0x395   : > { %6582 = vmatprep.mubr.bf16.mxu1 %v11987_v16 }
 0x396   : > { %v12196_v33 = vpop.f32.mrb[72].mxu0 }
 0x397   : > { %v12198_v40 = vpop.f32.mrb[73].mxu0 }
 0x398   : > { %v12200_v56 = vpop.f32.mrb[74].mxu0 }
 0x399   : > { %v12202_v58 = vpop.f32.mrb[75].mxu0 }
 0x39c   : > { %6583 = vmatmul.mubr.bf16.gmra.mrb[24].mxu1 %v11991_v0 }
 0x39d   : > { %6592 = vmatprep.mubr.bf16.mxu1 %v12206_v12 }
 0x39e   : > { %v12209_v42 = vpop.f32.mrb[76].mxu0 }
 0x39f   : > { %v12211_v59 = vpop.f32.mrb[77].mxu0 }
 0x3a0   : > { %v12213_v28 = vpop.f32.mrb[78].mxu0 }
 0x3a1   : > { %v12215_v38 = vpop.f32.mrb[79].mxu0 }
 0x3a4   : > { %6593 = vmatmul.mubr.bf16.gmra.mrb[28].mxu1 %v12218_v39 }
 0x3a5   : > { %7046 = vmatprep.mubr.bf16.mxu1 %v11797_v32  ;;  %v10010_v32 = vld [vmem:[%s12717_s5 + $0x24] ss:$8 sps:$4 sm:$0xff]  }
 0x3a6   : > { %v12231_v7 = vpop.f32.mrb[80].mxu0  ;;  %7905 = vmatprep.subr.bf16.mxu0 %v10010_v32 }
 0x3a7   : > { %v12233_v1 = vpop.f32.mrb[81].mxu0  ;;  %7906 = vmatpush1.bf16.msra.mxu0 %v10008_v17  ;;  %v10019_v17 = vld [vmem:[%s12717_s5 + $0x54] ss:$8 sps:$4 sm:$0xff]  }
 0x3a8   : > { %v12238_v18 = vpop.f32.mrb[82].mxu0  ;;  %7907 = vmatprep.subr.bf16.mxu0 %v10013_v48 }
 0x3a9   : > { %v12243_v62 = vpop.f32.mrb[83].mxu0 }
 0x3ab   : > { %7908 = vmatpush1.bf16.msra.mxu0 %v10011_v14  ;;  %v10017_v14 = vld [vmem:[%s12717_s5 + $0x50] ss:$8 sps:$4 sm:$0xff]  }
 0x3ac   : > { %7047 = vmatmul.mubr.bf16.vlgmr.msra.gmra.mrb[32].mxu1 %v11814_v9  ;;  %v10016_v9 = vld [vmem:[%s12717_s5 + $0x44] ss:$8 sps:$4 sm:$0xff]  }
 0x3ad   : > { %7056 = vmatprep.mubr.bf16.mxu1 %v11819_v52  ;;  %v10014_v52 = vld [vmem:[%s12717_s5 + $0x40] ss:$8 sps:$4 sm:$0xff]   ;;  %7909 = vmatprep.subr.bf16.mxu0 %v10016_v9 }
 0x3ae   : > { %v12253_v54 = vpop.f32.mrb[84].mxu0 }
 0x3af   : > { %v12255_v55 = vpop.f32.mrb[85].mxu0  ;;  %7910 = vmatpush1.bf16.msra.mxu0 %v10014_v52  ;;  %v10025_v52 = vld [vmem:[%s12717_s5 + $0x74] ss:$8 sps:$4 sm:$0xff]  }
 0x3b0   : > { %v12260_v21 = vpop.f32.mrb[86].mxu0  ;;  %7911 = vmatprep.subr.bf16.mxu0 %v10019_v17 }
 0x3b1   : > { %v12265_v32 = vpop.f32.mrb[87].mxu0 }
 0x3b3   : > { %7912 = vmatpush1.bf16.msra.mxu0 %v10017_v14  ;;  %v10023_v14 = vld [vmem:[%s12717_s5 + $0x70] ss:$8 sps:$4 sm:$0xff]  }
 0x3b4   : > { %7057 = vmatmul.mubr.bf16.gmra.mrb[36].mxu1 %v11836_v15  ;;  %v10022_v15 = vld [vmem:[%s12717_s5 + $0x64] ss:$8 sps:$4 sm:$0xff]  }
 0x3b5   : > { %7066 = vmatprep.mubr.bf16.mxu1 %v11841_v47  ;;  %v10020_v47 = vld [vmem:[%s12717_s5 + $0x60] ss:$8 sps:$4 sm:$0xff]   ;;  %7913 = vmatprep.subr.bf16.mxu0 %v10022_v15 }
 0x3b6   : > { %v12275_v48 = vpop.f32.mrb[88].mxu0 }
 0x3b7   : > { %v12277_v57 = vpop.f32.mrb[89].mxu0  ;;  %7914 = vmatpush1.bf16.msra.mxu0 %v10020_v47  ;;  %v10031_v47 = vld [vmem:[%s12717_s5 + $0x94] ss:$8 sps:$4 sm:$0xff]  }
 0x3b8   : > { %v12282_v6 = vpop.f32.mrb[90].mxu0  ;;  %7915 = vmatprep.subr.bf16.mxu0 %v10025_v52  ;;  %v10029_v52 = vld [vmem:[%s12717_s5 + $0x90] ss:$8 sps:$4 sm:$0xff]  }
 0x3b9   : > { %v12287_v9 = vpop.f32.mrb[91].mxu0 }
 0x3bb   : > { %7916 = vmatpush1.bf16.msra.mxu0 %v10023_v14  ;;  %v10034_v14 = vld [vmem:[%s12717_s5 + $0xa4] ss:$8 sps:$4 sm:$0xff]  }
 0x3bc   : > { %7067 = vmatmul.mubr.bf16.gmra.mrb[40].mxu1 %v11858_v27  ;;  %v10028_v27 = vld [vmem:[%s12717_s5 + $0x84] ss:$8 sps:$4 sm:$0xff]  }
 0x3bd   : > { %7076 = vmatprep.mubr.bf16.mxu1 %v11863_v20  ;;  %v10026_v20 = vld [vmem:[%s12717_s5 + $0x80] ss:$8 sps:$4 sm:$0xff]   ;;  %7917 = vmatprep.subr.bf16.mxu0 %v10028_v27  ;;  %v10035_v27 = vld [vmem:[%s12717_s5 + $0xb0] ss:$8 sps:$4 sm:$0xff]  }
 0x3be   : > { %v12297_v17 = vpop.f32.mrb[92].mxu0 }
 0x3bf   : > { %v12299_v11 = vpop.f32.mrb[93].mxu0  ;;  %7918 = vmatpush1.bf16.msra.mxu0 %v10026_v20  ;;  %v10040_v20 = vld [vmem:[%s12717_s5 + $0xc4] ss:$8 sps:$4 sm:$0xff]  }
 0x3c0   : > { %v12304_v36 = vpop.f32.mrb[94].mxu0  ;;  %7919 = vmatprep.subr.bf16.mxu0 %v10031_v47 }
 0x3c1   : > { %v12309_v15 = vpop.f32.mrb[95].mxu0 }
 0x3c3   : > { %7920 = vmatpush1.bf16.msra.mxu0 %v10029_v52 }
 0x3c4   : > { %7077 = vmatmul.mubr.bf16.gmra.mrb[44].mxu1 %v11880_v35  ;;  %v10032_v35 = vld [vmem:[%s12717_s5 + $0xa0] ss:$8 sps:$4 sm:$0xff]   ;;  %7921 = vmatprep.subr.bf16.mxu0 %v10034_v14 }
 0x3c5   : > { %7086 = vmatprep.mubr.bf16.mxu1 %v11885_v13  ;;  %v10037_v13 = vld [vmem:[%s12717_s5 + $0xb4] ss:$8 sps:$4 sm:$0xff]   ;;  %v279_v14 = vld [vmem:[%s12716_s4] sm:$0x3] }
 0x3c7   : > { %7922 = vmatpush1.bf16.msra.mxu0 %v10032_v35 }
 0x3c8   : > { %7923 = vmatprep.subr.bf16.mxu0 %v10037_v13  ;;  %v12777_v13 = vld [vmem:[#allocation9_spill] sm:$0xff] }
 0x3cb   : > { %7924 = vmatpush1.bf16.msra.mxu0 %v10035_v27  ;;  %v12388_v27 = vrot.slane %v279_v14, %v12777_v13 }
 0x3cc   : > { %7087 = vmatmul.mubr.bf16.gmra.mrb[48].mxu1 %v11901_v50  ;;  %v10038_v50 = vld [vmem:[%s12717_s5 + $0xc0] ss:$8 sps:$4 sm:$0xff]   ;;  %7925 = vmatprep.subr.bf16.mxu0 %v10040_v20 }
 0x3cd   : > { %7096 = vmatprep.mubr.bf16.mxu1 %v11905_v8  ;;  %v10041_v8 = vld [vmem:[%s12717_s5 + $0xd0] ss:$8 sps:$4 sm:$0xff]  }
 0x3cf   : > { %7926 = vmatpush1.bf16.msra.mxu0 %v10038_v50 }
 0x3d4   : > { %7097 = vmatmul.mubr.bf16.gmra.mrb[52].mxu1 %v11921_v29  ;;  %v10043_v29 = vld [vmem:[%s12717_s5 + $0xd4] ss:$8 sps:$4 sm:$0xff]  }
 0x3d5   : > { %7106 = vmatprep.mubr.bf16.mxu1 %v11925_v4  ;;  %7927 = vmatprep.subr.bf16.mxu0 %v10043_v29  ;;  %v10044_v4 = vld [vmem:[%s12717_s5 + $0xe0] ss:$8 sps:$4 sm:$0xff]  }
 0x3d6   : > { %7928 = vmatpush1.bf16.msra.mxu0 %v10041_v8 }
 0x3dc   : > { %7107 = vmatmul.mubr.bf16.gmra.mrb[56].mxu1 %v11935_v44  ;;  %v10046_v44 = vld [vmem:[%s12717_s5 + $0xe4] ss:$8 sps:$4 sm:$0xff]  }
 0x3dd   : > { %7116 = vmatprep.mubr.bf16.mxu1 %v11939_v22  ;;  %7929 = vmatprep.subr.bf16.mxu0 %v10046_v44  ;;  %v10047_v22 = vld [vmem:[%s12717_s5 + $0xf0] ss:$8 sps:$4 sm:$0xff]  }
 0x3de   : > { %7930 = vmatpush1.bf16.msra.mxu0 %v10044_v4 }
 0x3e4   : > { %7117 = vmatmul.mubr.bf16.gmra.mrb[60].mxu1 %v11943_v51  ;;  %v10049_v51 = vld [vmem:[%s12717_s5 + $0xf4] ss:$8 sps:$4 sm:$0xff]  }
 0x3e5   : > { %7126 = vmatprep.mubr.bf16.mxu1 %v11947_v23  ;;  %v10098_v23 = vld [vmem:[#allocation2 + $0x8] sm:$0xff]  ;;  %7931 = vmatprep.subr.bf16.mxu0 %v10049_v51 }
 0x3e6   : > { %7932 = vmatpush1.bf16.msra.mxu0 %v10047_v22 }
 0x3ec   : > { %7127 = vmatmul.mubr.bf16.gmra.mrb[0].mxu1 %v11951_v2  ;;  %v6810_v2 = vshll.u32 %v10098_v23, 16 }
 0x3ed   : > { %7136 = vmatprep.mubr.bf16.mxu1 %v11955_v34  ;;  %v5195_v34 = vld [vmem:[#allocation2 + $0x358] sm:$0x1] }
 0x3f4   : > { %7137 = vmatmul.mubr.bf16.gmra.mrb[4].mxu1 %v11959_v61  ;;  %v6808_v61 = vshrl.u32 %v10098_v23, 16 }
 0x3f5   : > { %7146 = vmatprep.mubr.bf16.mxu1 %v11963_v26  ;;  %v6812_v26 = vrot.slane %v6810_v2, 1 }
 0x3fc   : > { %7147 = vmatmul.mubr.bf16.gmra.mrb[8].mxu1 %v11967_v24  ;;  %v6815_v24 = vshll.u32 %v5195_v34, 16 }
 0x3fd   : > { %7156 = vmatprep.mubr.bf16.mxu1 %v11971_v37  ;;  %v6813_v37 = vor.u32 %v6812_v26, %v6808_v61 }
 0x404   : > { %7157 = vmatmul.mubr.bf16.gmra.mrb[12].mxu1 %v11975_v53  ;;  %v6817_v53 = vrot.slane %v6815_v24, 1 }
 0x405   : > { %7166 = vmatprep.mubr.bf16.mxu1 %v11979_v25  ;;  %v5194_v25 = vld [vmem:[#allocation2 + $0x350] sm:$0x1] }
 0x406   : > { %v6818_v47 = vsel %vm5196_vm6, %v6813_v37, %v6817_v53 }
 0x40c   : > { %7167 = vmatmul.mubr.bf16.gmra.mrb[16].mxu1 %v11983_v30  ;;  %v6803_v30 = vshll.u32 %v5194_v25, 16 }
 0x40d   : > { %7176 = vmatprep.mubr.bf16.mxu1 %v11987_v16 }
 0x40e   : > { %v6805_v16 = vrot.slane %v6803_v30, 1 }
 0x410   : > { %v6806_v52 = vsel %vm5196_vm6, %v6813_v37, %v6805_v16 }
 0x414   : > { %7177 = vmatmul.mubr.bf16.gmra.mrb[20].mxu1 %v11991_v0  ;;  %v12776_v0 = vld [vmem:[#allocation8_spill] sm:$0xff] }
 0x415   : > { %7186 = vmatprep.mubr.bf16.mxu1 %v12206_v12  ;;  %v12385_v35 = vrot.slane %v279_v14, %v12776_v0 }
 0x41c   : > { %7187 = vmatmul.mubr.bf16.gmra.mrb[24].mxu1 %v12218_v39 }
 0x41d   : > { %7196 = vmatprep.mubr.bf16.mxu1 %v6818_v47 }
 0x424   : > { %7197 = vmatmul.mubr.bf16.gmra.mrb[28].mxu1 %v6806_v52 }
 0x47f   : > { %v7048_v12 = vpop.f32.mrb[32].mxu1 }
 0x480   : > { %v8920_v20 = vadd.f32 %v7048_v12, %v12176_v46  ;;  %v7050_v50 = vpop.f32.mrb[33].mxu1 }
 0x481   : > { %v8921_v39 = vadd.f32 %v7050_v50, %v12178_v10  ;;  %v7052_v8 = vpop.f32.mrb[34].mxu1 }
 0x482   : > { %v7474_v29 = vadd.f32 %v8920_v20, %v12385_v35  ;;  %v8922_v4 = vadd.f32 %v7052_v8, %v12180_v60  ;;  %v7054_v44 = vpop.f32.mrb[35].mxu1 }
 0x483   : > { %v7475_v22 = vadd.f32 %v8921_v39, %v12388_v27  ;;  %v8923_v51 = vadd.f32 %v7054_v44, %v12182_v49 }
 0x484   : > { %v7476_v23 = vadd.f32 %v8922_v4, %v12385_v35  ;;  %v7538_v34 = vmax.f32 %v7474_v29, 0.0 }
 0x485   : > { %v7477_v2 = vadd.f32 %v8923_v51, %v12388_v27  ;;  %v7539_v46 = vmax.f32 %v7475_v22, 0.0 }
 0x486   : > { %v7540_v61 = vmax.f32 %v7476_v23, 0.0 }
 0x487   : > { %v7541_v26 = vmax.f32 %v7477_v2, 0.0  ;;  %v7058_v24 = vpop.f32.mrb[36].mxu1 }
 0x488   : > { %v7602_v10 = vpack.c.bf16 %v7540_v61, %v7538_v34  ;;  %v8924_v37 = vadd.f32 %v7058_v24, %v12186_v63  ;;  %v7060_v53 = vpop.f32.mrb[37].mxu1 }
 0x489   : > { %v8925_v60 = vadd.f32 %v7060_v53, %v12188_v3  ;;  %v7062_v25 = vpop.f32.mrb[38].mxu1  ;;  %v7603_v30 = vpack.c.bf16 %v7541_v26, %v7539_v46 }
 0x48a   : > { %v7478_v47 = vadd.f32 %v8924_v37, %v12385_v35  ;;  %v8926_v49 = vadd.f32 %v7062_v25, %v12190_v45  ;;  %v7064_v16 = vpop.f32.mrb[39].mxu1 }
 0x48b   : > { %v7479_v52 = vadd.f32 %v8925_v60, %v12388_v27  ;;  %v8927_v14 = vadd.f32 %v7064_v16, %v12192_v43  ;;  %7933 = vmatprep.mubr.bf16.mxu0 %v7603_v30 }
 0x48c   : > { %v7480_v12 = vadd.f32 %v8926_v49, %v12385_v35  ;;  %7934 = vmatmul.mubr.bf16.vlgmr.msra.gmra.mrb[128].mxu0 %v7602_v10  ;;  %v7542_v20 = vmax.f32 %v7478_v47, 0.0 }
 0x48d   : > { %v7481_v63 = vadd.f32 %v8927_v14, %v12388_v27  ;;  %v7543_v3 = vmax.f32 %v7479_v52, 0.0 }
 0x48e   : > { %v7544_v50 = vmax.f32 %v7480_v12, 0.0 }
 0x48f   : > { %v7545_v39 = vmax.f32 %v7481_v63, 0.0  ;;  %v7068_v8 = vpop.f32.mrb[40].mxu1 }
 0x490   : > { %v8928_v29 = vadd.f32 %v7068_v8, %v12196_v33  ;;  %v7070_v4 = vpop.f32.mrb[41].mxu1  ;;  %v7604_v45 = vpack.c.bf16 %v7544_v50, %v7542_v20 }
 0x491   : > { %v8929_v44 = vadd.f32 %v7070_v4, %v12198_v40  ;;  %v7072_v22 = vpop.f32.mrb[42].mxu1  ;;  %v7605_v51 = vpack.c.bf16 %v7545_v39, %v7543_v3 }
 0x492   : > { %v7482_v43 = vadd.f32 %v8928_v29, %v12385_v35  ;;  %v8930_v23 = vadd.f32 %v7072_v22, %v12200_v56  ;;  %v7074_v2 = vpop.f32.mrb[43].mxu1 }
 0x493   : > { %v7483_v34 = vadd.f32 %v8929_v44, %v12388_v27  ;;  %v8931_v61 = vadd.f32 %v7074_v2, %v12202_v58  ;;  %7943 = vmatprep.mubr.bf16.mxu0 %v7605_v51 }
 0x494   : > { %v7484_v46 = vadd.f32 %v8930_v23, %v12385_v35  ;;  %7944 = vmatmul.mubr.bf16.gmra.mrb[132].mxu0 %v7604_v45  ;;  %v7546_v26 = vmax.f32 %v7482_v43, 0.0 }
 0x495   : > { %v7485_v33 = vadd.f32 %v8931_v61, %v12388_v27  ;;  %v7547_v40 = vmax.f32 %v7483_v34, 0.0 }
 0x496   : > { %v7548_v24 = vmax.f32 %v7484_v46, 0.0 }
 0x497   : > { %v7549_v10 = vmax.f32 %v7485_v33, 0.0  ;;  %v7078_v37 = vpop.f32.mrb[44].mxu1 }
 0x498   : > { %v8932_v53 = vadd.f32 %v7078_v37, %v12209_v42  ;;  %v7080_v60 = vpop.f32.mrb[45].mxu1  ;;  %v7606_v56 = vpack.c.bf16 %v7548_v24, %v7546_v26 }
 0x499   : > { %v8933_v25 = vadd.f32 %v7080_v60, %v12211_v59  ;;  %v7082_v30 = vpop.f32.mrb[46].mxu1  ;;  %v7607_v47 = vpack.c.bf16 %v7549_v10, %v7547_v40 }
 0x49a   : > { %v7486_v58 = vadd.f32 %v8932_v53, %v12385_v35  ;;  %v8934_v49 = vadd.f32 %v7082_v30, %v12213_v28  ;;  %v7084_v16 = vpop.f32.mrb[47].mxu1 }
 0x49b   : > { %v7487_v52 = vadd.f32 %v8933_v25, %v12388_v27  ;;  %v8935_v14 = vadd.f32 %v7084_v16, %v12215_v38  ;;  %7953 = vmatprep.mubr.bf16.mxu0 %v7607_v47 }
 0x49c   : > { %v7488_v12 = vadd.f32 %v8934_v49, %v12385_v35  ;;  %7954 = vmatmul.mubr.bf16.gmra.mrb[136].mxu0 %v7606_v56  ;;  %v7550_v63 = vmax.f32 %v7486_v58, 0.0 }
 0x49d   : > { %v7489_v42 = vadd.f32 %v8935_v14, %v12388_v27  ;;  %v7551_v59 = vmax.f32 %v7487_v52, 0.0 }
 0x49e   : > { %v7552_v20 = vmax.f32 %v7488_v12, 0.0 }
 0x49f   : > { %v7553_v50 = vmax.f32 %v7489_v42, 0.0  ;;  %v7088_v3 = vpop.f32.mrb[48].mxu1 }
 0x4a0   : > { %v8936_v39 = vadd.f32 %v7088_v3, %v12231_v7  ;;  %v7090_v8 = vpop.f32.mrb[49].mxu1  ;;  %v7608_v28 = vpack.c.bf16 %v7552_v20, %v7550_v63 }
 0x4a1   : > { %v8937_v29 = vadd.f32 %v7090_v8, %v12233_v1  ;;  %v7092_v4 = vpop.f32.mrb[50].mxu1  ;;  %v7609_v45 = vpack.c.bf16 %v7553_v50, %v7551_v59 }
 0x4a2   : > { %v7490_v38 = vadd.f32 %v8936_v39, %v12385_v35  ;;  %v8938_v44 = vadd.f32 %v7092_v4, %v12238_v18  ;;  %v7094_v22 = vpop.f32.mrb[51].mxu1 }
 0x4a3   : > { %v7491_v51 = vadd.f32 %v8937_v29, %v12388_v27  ;;  %v8939_v43 = vadd.f32 %v7094_v22, %v12243_v62  ;;  %7963 = vmatprep.mubr.bf16.mxu0 %v7609_v45 }
 0x4a4   : > { %v7492_v23 = vadd.f32 %v8938_v44, %v12385_v35  ;;  %7964 = vmatmul.mubr.bf16.gmra.mrb[140].mxu0 %v7608_v28  ;;  %v7554_v2 = vmax.f32 %v7490_v38, 0.0 }
 0x4a5   : > { %v7493_v7 = vadd.f32 %v8939_v43, %v12388_v27  ;;  %v7555_v1 = vmax.f32 %v7491_v51, 0.0 }
 0x4a6   : > { %v7556_v34 = vmax.f32 %v7492_v23, 0.0 }
 0x4a7   : > { %v7557_v61 = vmax.f32 %v7493_v7, 0.0  ;;  %v7098_v46 = vpop.f32.mrb[52].mxu1 }
 0x4a8   : > { %v8940_v33 = vadd.f32 %v7098_v46, %v12253_v54  ;;  %v7100_v26 = vpop.f32.mrb[53].mxu1  ;;  %v7610_v18 = vpack.c.bf16 %v7556_v34, %v7554_v2 }
 0x4a9   : > { %v8941_v24 = vadd.f32 %v7100_v26, %v12255_v55  ;;  %v7102_v40 = vpop.f32.mrb[54].mxu1  ;;  %v7611_v10 = vpack.c.bf16 %v7557_v61, %v7555_v1 }
 0x4aa   : > { %v7494_v62 = vadd.f32 %v8940_v33, %v12385_v35  ;;  %v8942_v37 = vadd.f32 %v7102_v40, %v12260_v21  ;;  %v7104_v53 = vpop.f32.mrb[55].mxu1 }
 0x4ab   : > { %v7495_v60 = vadd.f32 %v8941_v24, %v12388_v27  ;;  %v8943_v56 = vadd.f32 %v7104_v53, %v12265_v32  ;;  %7973 = vmatprep.mubr.bf16.mxu0 %v7611_v10 }
 0x4ac   : > { %v7496_v25 = vadd.f32 %v8942_v37, %v12385_v35  ;;  %7974 = vmatmul.mubr.bf16.gmra.mrb[144].mxu0 %v7610_v18  ;;  %v7558_v30 = vmax.f32 %v7494_v62, 0.0 }
 0x4ad   : > { %v7497_v54 = vadd.f32 %v8943_v56, %v12388_v27  ;;  %v7559_v55 = vmax.f32 %v7495_v60, 0.0 }
 0x4ae   : > { %v7560_v47 = vmax.f32 %v7496_v25, 0.0 }
 0x4af   : > { %v7561_v58 = vmax.f32 %v7497_v54, 0.0  ;;  %v7108_v49 = vpop.f32.mrb[56].mxu1 }
 0x4b0   : > { %v8944_v16 = vadd.f32 %v7108_v49, %v12275_v48  ;;  %v7110_v52 = vpop.f32.mrb[57].mxu1  ;;  %v7612_v21 = vpack.c.bf16 %v7560_v47, %v7558_v30  ;;  %v12778_v47 = vld [vmem:[#allocation11_spill] sm:$0xff]  ;;  %v12779_v49 = vld [vmem:[#allocation10_spill] sm:$0xff] }
 0x4b1   : > { %v8945_v14 = vadd.f32 %v7110_v52, %v12277_v57  ;;  %v7112_v12 = vpop.f32.mrb[58].mxu1  ;;  %v7613_v42 = vpack.c.bf16 %v7561_v58, %v7559_v55 }
 0x4b2   : > { %v7498_v32 = vadd.f32 %v8944_v16, %v12385_v35  ;;  %v8946_v63 = vadd.f32 %v7112_v12, %v12282_v6  ;;  %v7114_v20 = vpop.f32.mrb[59].mxu1 }
 0x4b3   : > { %v7499_v59 = vadd.f32 %v8945_v14, %v12388_v27  ;;  %v8947_v50 = vadd.f32 %v7114_v20, %v12287_v9  ;;  %7983 = vmatprep.mubr.bf16.mxu0 %v7613_v42  ;;  %v12780_v14 = vld [vmem:[#allocation13_spill] sm:$0xff] }
 0x4b4   : > { %v7500_v3 = vadd.f32 %v8946_v63, %v12385_v35  ;;  %7984 = vmatmul.mubr.bf16.gmra.mrb[148].mxu0 %v7612_v21  ;;  %v7562_v39 = vmax.f32 %v7498_v32, 0.0  ;;  %v12781_v63 = vld [vmem:[#allocation12_spill] sm:$0xff] }
 0x4b5   : > { %v7501_v48 = vadd.f32 %v8947_v50, %v12388_v27  ;;  %v7563_v57 = vmax.f32 %v7499_v59, 0.0 }
 0x4b6   : > { %v7564_v8 = vmax.f32 %v7500_v3, 0.0 }
 0x4b7   : > { %v7565_v28 = vmax.f32 %v7501_v48, 0.0  ;;  %v7118_v29 = vpop.f32.mrb[60].mxu1 }
 0x4b8   : > { %v8948_v4 = vadd.f32 %v7118_v29, %v12297_v17  ;;  %v7120_v45 = vpop.f32.mrb[61].mxu1  ;;  %v7614_v6 = vpack.c.bf16 %v7564_v8, %v7562_v39 }
 0x4b9   : > { %v8949_v38 = vadd.f32 %v7120_v45, %v12299_v11  ;;  %v7122_v44 = vpop.f32.mrb[62].mxu1  ;;  %v7615_v22 = vpack.c.bf16 %v7565_v28, %v7563_v57  ;;  %v12782_v28 = vld [vmem:[#allocation14_spill] sm:$0xff] }
 0x4ba   : > { %v7502_v9 = vadd.f32 %v8948_v4, %v12385_v35  ;;  %v8950_v51 = vadd.f32 %v7122_v44, %v12304_v36  ;;  %v7124_v43 = vpop.f32.mrb[63].mxu1 }
 0x4bb   : > { %v7503_v23 = vadd.f32 %v8949_v38, %v12388_v27  ;;  %v8951_v7 = vadd.f32 %v7124_v43, %v12309_v15  ;;  %7993 = vmatprep.mubr.bf16.mxu0 %v7615_v22 }
 0x4bc   : > { %v7504_v2 = vadd.f32 %v8950_v51, %v12385_v35  ;;  %7994 = vmatmul.mubr.bf16.gmra.mrb[152].mxu0 %v7614_v6  ;;  %v7566_v34 = vmax.f32 %v7502_v9, 0.0  ;;  %v12783_v6 = vld [vmem:[#allocation15_spill] sm:$0xff]  ;;  %v12784_v51 = vld [vmem:[#allocation16_spill] sm:$0xff] }
 0x4bd   : > { %v7505_v17 = vadd.f32 %v8951_v7, %v12388_v27  ;;  %v7567_v11 = vmax.f32 %v7503_v23, 0.0 }
 0x4be   : > { %v7568_v1 = vmax.f32 %v7504_v2, 0.0  ;;  %v12785_v2 = vld [vmem:[#allocation17_spill] sm:$0xff] }
 0x4bf   : > { %v7569_v61 = vmax.f32 %v7505_v17, 0.0  ;;  %v7128_v46 = vpop.f32.mrb[0].mxu1 }
 0x4c0   : > { %v8952_v33 = vadd.f32 %v7128_v46, %v12048_v41  ;;  %v7130_v26 = vpop.f32.mrb[1].mxu1  ;;  %v7616_v36 = vpack.c.bf16 %v7568_v1, %v7566_v34 }
 0x4c1   : > { %v8953_v18 = vadd.f32 %v7130_v26, %v12053_v5  ;;  %v7132_v24 = vpop.f32.mrb[2].mxu1  ;;  %v7617_v40 = vpack.c.bf16 %v7569_v61, %v7567_v11 }
 0x4c2   : > { %v7506_v15 = vadd.f32 %v8952_v33, %v12385_v35  ;;  %v8954_v10 = vadd.f32 %v7132_v24, %v12055_v19  ;;  %v7134_v62 = vpop.f32.mrb[3].mxu1 }
 0x4c3   : > { %v7507_v37 = vadd.f32 %v8953_v18, %v12388_v27  ;;  %v8955_v53 = vadd.f32 %v7134_v62, %v12057_v31  ;;  %8003 = vmatprep.mubr.bf16.mxu0 %v7617_v40 }
 0x4c4   : > { %v7508_v60 = vadd.f32 %v8954_v10, %v12385_v35  ;;  %8004 = vmatmul.mubr.bf16.gmra.mrb[156].mxu0 %v7616_v36  ;;  %v7570_v56 = vmax.f32 %v7506_v15, 0.0  ;;  %v12786_v36 = vld [vmem:[#allocation18_spill] sm:$0xff]  ;;  %v12787_v15 = vld [vmem:[#allocation19_spill] sm:$0xff] }
 0x4c5   : > { %v7509_v41 = vadd.f32 %v8955_v53, %v12388_v27  ;;  %v7571_v5 = vmax.f32 %v7507_v37, 0.0 }
 0x4c6   : > { %v7572_v25 = vmax.f32 %v7508_v60, 0.0  ;;  %v12788_v60 = vld [vmem:[#allocation20_spill] sm:$0xff] }
 0x4c7   : > { %v7573_v54 = vmax.f32 %v7509_v41, 0.0  ;;  %v7138_v30 = vpop.f32.mrb[4].mxu1 }
 0x4c8   : > { %v8956_v55 = vadd.f32 %v7138_v30, %v12778_v47  ;;  %v7140_v58 = vpop.f32.mrb[5].mxu1  ;;  %v7618_v19 = vpack.c.bf16 %v7572_v25, %v7570_v56 }
 0x4c9   : > { %v8957_v16 = vadd.f32 %v7140_v58, %v12779_v49  ;;  %v7142_v52 = vpop.f32.mrb[6].mxu1  ;;  %v7619_v21 = vpack.c.bf16 %v7573_v54, %v7571_v5  ;;  %v12789_v5 = vld [vmem:[#allocation21_spill] sm:$0xff] }
 0x4ca   : > { %v7510_v31 = vadd.f32 %v8956_v55, %v12385_v35  ;;  %v8958_v12 = vadd.f32 %v7142_v52, %v12780_v14  ;;  %v7144_v42 = vpop.f32.mrb[7].mxu1  ;;  %v12790_v52 = vld [vmem:[#allocation22_spill] sm:$0xff] }
 0x4cb   : > { %v7511_v32 = vadd.f32 %v8957_v16, %v12388_v27  ;;  %v8959_v20 = vadd.f32 %v7144_v42, %v12781_v63  ;;  %8013 = vmatprep.mubr.bf16.mxu0 %v7619_v21 }
 0x4cc   : > { %v7512_v59 = vadd.f32 %v8958_v12, %v12385_v35  ;;  %8014 = vmatmul.mubr.bf16.gmra.mrb[160].mxu0 %v7618_v19  ;;  %v7574_v3 = vmax.f32 %v7510_v31, 0.0  ;;  %v12791_v12 = vld [vmem:[#allocation23_spill] sm:$0xff] }
 0x4cd   : > { %v7513_v50 = vadd.f32 %v8959_v20, %v12388_v27  ;;  %v7575_v39 = vmax.f32 %v7511_v32, 0.0 }
 0x4ce   : > { %v7576_v48 = vmax.f32 %v7512_v59, 0.0  ;;  %v12792_v59 = vld [vmem:[#allocation24_spill] sm:$0xff] }
 0x4cf   : > { %v7577_v8 = vmax.f32 %v7513_v50, 0.0  ;;  %v7148_v57 = vpop.f32.mrb[8].mxu1 }
 0x4d0   : > { %v8960_v29 = vadd.f32 %v7148_v57, %v12782_v28  ;;  %v7150_v4 = vpop.f32.mrb[9].mxu1  ;;  %v7620_v45 = vpack.c.bf16 %v7576_v48, %v7574_v3 }
 0x4d1   : > { %v8961_v38 = vadd.f32 %v7150_v4, %v12783_v6  ;;  %v7152_v44 = vpop.f32.mrb[10].mxu1  ;;  %v7621_v22 = vpack.c.bf16 %v7577_v8, %v7575_v39  ;;  %v12793_v39 = vld [vmem:[#allocation25_spill] sm:$0xff] }
 0x4d2   : > { %v7514_v9 = vadd.f32 %v8960_v29, %v12385_v35  ;;  %v8962_v43 = vadd.f32 %v7152_v44, %v12784_v51  ;;  %v7154_v23 = vpop.f32.mrb[11].mxu1  ;;  %v12794_v44 = vld [vmem:[#allocation26_spill] sm:$0xff] }
 0x4d3   : > { %v7515_v7 = vadd.f32 %v8961_v38, %v12388_v27  ;;  %v8963_v17 = vadd.f32 %v7154_v23, %v12785_v2  ;;  %8023 = vmatprep.mubr.bf16.mxu0 %v7621_v22 }
 0x4d4   : > { %v7516_v34 = vadd.f32 %v8962_v43, %v12385_v35  ;;  %8024 = vmatmul.mubr.bf16.gmra.mrb[164].mxu0 %v7620_v45  ;;  %v7578_v11 = vmax.f32 %v7514_v9, 0.0  ;;  %v12795_v43 = vld [vmem:[#allocation27_spill] sm:$0xff] }
 0x4d5   : > { %v7517_v1 = vadd.f32 %v8963_v17, %v12388_v27  ;;  %v7579_v46 = vmax.f32 %v7515_v7, 0.0 }
 0x4d6   : > { %v7580_v61 = vmax.f32 %v7516_v34, 0.0  ;;  %v12796_v34 = vld [vmem:[#allocation28_spill] sm:$0xff] }
 0x4d7   : > { %v7581_v33 = vmax.f32 %v7517_v1, 0.0  ;;  %v7158_v26 = vpop.f32.mrb[12].mxu1 }
 0x4d8   : > { %v8964_v18 = vadd.f32 %v7158_v26, %v12786_v36  ;;  %v7160_v24 = vpop.f32.mrb[13].mxu1  ;;  %v7622_v40 = vpack.c.bf16 %v7580_v61, %v7578_v11 }
 0x4d9   : > { %v8965_v10 = vadd.f32 %v7160_v24, %v12787_v15  ;;  %v7162_v62 = vpop.f32.mrb[14].mxu1  ;;  %v7623_v37 = vpack.c.bf16 %v7581_v33, %v7579_v46  ;;  %v12797_v46 = vld [vmem:[#allocation29_spill] sm:$0xff] }
 0x4da   : > { %v7518_v53 = vadd.f32 %v8964_v18, %v12385_v35  ;;  %v8966_v41 = vadd.f32 %v7162_v62, %v12788_v60  ;;  %v7164_v56 = vpop.f32.mrb[15].mxu1  ;;  %v12798_v62 = vld [vmem:[#allocation30_spill] sm:$0xff] }
 0x4db   : > { %v7519_v25 = vadd.f32 %v8965_v10, %v12388_v27  ;;  %v8967_v54 = vadd.f32 %v7164_v56, %v12789_v5  ;;  %8033 = vmatprep.mubr.bf16.mxu0 %v7623_v37 }
 0x4dc   : > { %v7520_v30 = vadd.f32 %v8966_v41, %v12385_v35  ;;  %8034 = vmatmul.mubr.bf16.gmra.mrb[168].mxu0 %v7622_v40  ;;  %v7582_v55 = vmax.f32 %v7518_v53, 0.0  ;;  %v12799_v41 = vld [vmem:[#allocation31_spill] sm:$0xff] }
 0x4dd   : > { %v7521_v47 = vadd.f32 %v8967_v54, %v12388_v27  ;;  %v7583_v19 = vmax.f32 %v7519_v25, 0.0 }
 0x4de   : > { %v7584_v58 = vmax.f32 %v7520_v30, 0.0  ;;  %v12800_v30 = vld [vmem:[#allocation32_spill] sm:$0xff] }
 0x4df   : > { %v7585_v49 = vmax.f32 %v7521_v47, 0.0  ;;  %v7168_v16 = vpop.f32.mrb[16].mxu1 }
 0x4e0   : > { %v8968_v21 = vadd.f32 %v7168_v16, %v12790_v52  ;;  %v7170_v31 = vpop.f32.mrb[17].mxu1  ;;  %v7624_v14 = vpack.c.bf16 %v7584_v58, %v7582_v55 }
 0x4e1   : > { %v8969_v42 = vadd.f32 %v7170_v31, %v12791_v12  ;;  %v7172_v32 = vpop.f32.mrb[18].mxu1  ;;  %v7625_v63 = vpack.c.bf16 %v7585_v49, %v7583_v19  ;;  %v12801_v19 = vld [vmem:[#allocation33_spill] sm:$0xff] }
 0x4e2   : > { %v7522_v20 = vadd.f32 %v8968_v21, %v12385_v35  ;;  %v8970_v50 = vadd.f32 %v7172_v32, %v12792_v59  ;;  %v7174_v3 = vpop.f32.mrb[19].mxu1  ;;  %v12802_v32 = vld [vmem:[#allocation34_spill] sm:$0xff] }
 0x4e3   : > { %v7523_v48 = vadd.f32 %v8969_v42, %v12388_v27  ;;  %v8971_v8 = vadd.f32 %v7174_v3, %v12793_v39  ;;  %8043 = vmatprep.mubr.bf16.mxu0 %v7625_v63 }
 0x4e4   : > { %v7524_v57 = vadd.f32 %v8970_v50, %v12385_v35  ;;  %8044 = vmatmul.mubr.bf16.gmra.mrb[172].mxu0 %v7624_v14  ;;  %v7586_v29 = vmax.f32 %v7522_v20, 0.0  ;;  %v12803_v50 = vld [vmem:[#allocation35_spill] sm:$0xff] }
 0x4e5   : > { %v7525_v28 = vadd.f32 %v8971_v8, %v12388_v27  ;;  %v7587_v45 = vmax.f32 %v7523_v48, 0.0 }
 0x4e6   : > { %v7588_v4 = vmax.f32 %v7524_v57, 0.0  ;;  %v12804_v57 = vld [vmem:[#allocation36_spill] sm:$0xff] }
 0x4e7   : > { %v7589_v6 = vmax.f32 %v7525_v28, 0.0  ;;  %v7178_v38 = vpop.f32.mrb[20].mxu1 }
 0x4e8   : > { %v8972_v22 = vadd.f32 %v7178_v38, %v12794_v44  ;;  %v7180_v9 = vpop.f32.mrb[21].mxu1  ;;  %v7626_v51 = vpack.c.bf16 %v7588_v4, %v7586_v29 }
 0x4e9   : > { %v8973_v23 = vadd.f32 %v7180_v9, %v12795_v43  ;;  %v7182_v7 = vpop.f32.mrb[22].mxu1  ;;  %v7627_v2 = vpack.c.bf16 %v7589_v6, %v7587_v45  ;;  %v12805_v45 = vld [vmem:[#allocation37_spill] sm:$0xff] }
 0x4ea   : > { %v7526_v17 = vadd.f32 %v8972_v22, %v12385_v35  ;;  %v8974_v1 = vadd.f32 %v7182_v7, %v12796_v34  ;;  %v7184_v11 = vpop.f32.mrb[23].mxu1 }
 0x4eb   : > { %v7527_v61 = vadd.f32 %v8973_v23, %v12388_v27  ;;  %v8975_v33 = vadd.f32 %v7184_v11, %v12797_v46  ;;  %8053 = vmatprep.mubr.bf16.mxu0 %v7627_v2  ;;  %v280_v2 = vld [vmem:[%s12718_s6] sm:$0x3] }
 0x4ec   : > { %v7528_v26 = vadd.f32 %v8974_v1, %v12385_v35  ;;  %8054 = vmatmul.mubr.bf16.gmra.mrb[176].mxu0 %v7626_v51  ;;  %v7590_v18 = vmax.f32 %v7526_v17, 0.0 }
 0x4ed   : > { %v7529_v36 = vadd.f32 %v8975_v33, %v12388_v27  ;;  %v7591_v40 = vmax.f32 %v7527_v61, 0.0 }
 0x4ee   : > { %v7592_v24 = vmax.f32 %v7528_v26, 0.0 }
 0x4ef   : > { %v7593_v15 = vmax.f32 %v7529_v36, 0.0  ;;  %v7188_v10 = vpop.f32.mrb[24].mxu1 }
 0x4f0   : > { %v8976_v37 = vadd.f32 %v7188_v10, %v12798_v62  ;;  %v7190_v53 = vpop.f32.mrb[25].mxu1  ;;  %v7628_v60 = vpack.c.bf16 %v7592_v24, %v7590_v18 }
 0x4f1   : > { %v8977_v56 = vadd.f32 %v7190_v53, %v12799_v41  ;;  %v7192_v25 = vpop.f32.mrb[26].mxu1  ;;  %v7629_v5 = vpack.c.bf16 %v7593_v15, %v7591_v40 }
 0x4f2   : > { %v7530_v54 = vadd.f32 %v8976_v37, %v12385_v35  ;;  %v8978_v47 = vadd.f32 %v7192_v25, %v12800_v30  ;;  %v7194_v55 = vpop.f32.mrb[27].mxu1 }
 0x4f3   : > { %v7531_v58 = vadd.f32 %v8977_v56, %v12388_v27  ;;  %v8979_v49 = vadd.f32 %v7194_v55, %v12801_v19  ;;  %8063 = vmatprep.mubr.bf16.mxu0 %v7629_v5 }
 0x4f4   : > { %v7532_v16 = vadd.f32 %v8978_v47, %v12385_v35  ;;  %8064 = vmatmul.mubr.bf16.gmra.mrb[180].mxu0 %v7628_v60  ;;  %v7594_v21 = vmax.f32 %v7530_v54, 0.0 }
 0x4f5   : > { %v7533_v52 = vadd.f32 %v8979_v49, %v12388_v27  ;;  %v7595_v14 = vmax.f32 %v7531_v58, 0.0 }
 0x4f6   : > { %v7596_v31 = vmax.f32 %v7532_v16, 0.0 }
 0x4f7   : > { %v7597_v12 = vmax.f32 %v7533_v52, 0.0  ;;  %v7198_v42 = vpop.f32.mrb[28].mxu1 }
 0x4f8   : > { %v8980_v63 = vadd.f32 %v7198_v42, %v12802_v32  ;;  %v7200_v20 = vpop.f32.mrb[29].mxu1  ;;  %v7630_v59 = vpack.c.bf16 %v7596_v31, %v7594_v21 }
 0x4f9   : > { %v8981_v3 = vadd.f32 %v7200_v20, %v12803_v50  ;;  %v7202_v48 = vpop.f32.mrb[30].mxu1  ;;  %v7631_v39 = vpack.c.bf16 %v7597_v12, %v7595_v14 }
 0x4fa   : > { %v7534_v8 = vadd.f32 %v8980_v63, %v12385_v35  ;;  %v8982_v28 = vadd.f32 %v7202_v48, %v12804_v57  ;;  %v7204_v29 = vpop.f32.mrb[31].mxu1 }
 0x4fb   : > { %v7535_v4 = vadd.f32 %v8981_v3, %v12388_v27  ;;  %v8983_v6 = vadd.f32 %v7204_v29, %v12805_v45  ;;  %8073 = vmatprep.mubr.bf16.mxu0 %v7631_v39 }
 0x4fc   : > { %v7536_v38 = vadd.f32 %v8982_v28, %v12385_v35  ;;  %8074 = vmatmul.mubr.bf16.gmra.mrb[184].mxu0 %v7630_v59  ;;  %v7598_v22 = vmax.f32 %v7534_v8, 0.0  ;;  %v12525_v35 = vrot.slane %v280_v2, %v12776_v0 }
 0x4fd   : > { %v7537_v44 = vadd.f32 %v8983_v6, %v12388_v27  ;;  %v7599_v51 = vmax.f32 %v7535_v4, 0.0  ;;  %v12528_v27 = vrot.slane %v280_v2, %v12777_v13 }
 0x4fe   : > { %v7600_v9 = vmax.f32 %v7536_v38, 0.0 }
 0x4ff   : > { %v7601_v43 = vmax.f32 %v7537_v44, 0.0 }
 0x500   : > { %v7632_v23 = vpack.c.bf16 %v7600_v9, %v7598_v22 }
 0x501   : > { %v7633_v7 = vpack.c.bf16 %v7601_v43, %v7599_v51 }
 0x503   : > { %8083 = vmatprep.mubr.bf16.mxu0 %v7633_v7 }
 0x504   : > { %8084 = vmatmul.mubr.bf16.gmra.mrb[188].mxu0 %v7632_v23 }
 0x55f   : > { %v7935_v17 = vpop.f32.mrb[128].mxu0 }
 0x560   : > { %v7936_v34 = vadd.f32 %v7935_v17, %v12525_v35  ;;  %v7937_v1 = vpop.f32.mrb[129].mxu0 }
 0x561   : > { %v7938_v11 = vadd.f32 %v7937_v1, %v12528_v27  ;;  %v7939_v61 = vpop.f32.mrb[130].mxu0 }
 0x562   : > { %8094 = vst [vmem:[%s12532_s20] sm:$0xff] %v7936_v34  ;;  %v7940_v0 = vadd.f32 %v7939_v61, %v12525_v35  ;;  %v7941_v13 = vpop.f32.mrb[131].mxu0 }
 0x563   : > { %8095 = vst [vmem:[%s12532_s20 + $0x8] sm:$0xff] %v7938_v11  ;;  %v7942_v46 = vadd.f32 %v7941_v13, %v12528_v27 }
 0x564   : > { %8096 = vst [vmem:[%s12532_s20 + $0x10] sm:$0xff] %v7940_v0 }
 0x565   : > { %8097 = vst [vmem:[%s12532_s20 + $0x18] sm:$0xff] %v7942_v46 }
 0x567   : > { %v7945_v33 = vpop.f32.mrb[132].mxu0 }
 0x568   : > { %v7946_v26 = vadd.f32 %v7945_v33, %v12525_v35  ;;  %v7947_v36 = vpop.f32.mrb[133].mxu0 }
 0x569   : > { %v7948_v18 = vadd.f32 %v7947_v36, %v12528_v27  ;;  %v7949_v24 = vpop.f32.mrb[134].mxu0 }
 0x56a   : > { %8098 = vst [vmem:[%s12532_s20 + $0x20] sm:$0xff] %v7946_v26  ;;  %v7950_v40 = vadd.f32 %v7949_v24, %v12525_v35  ;;  %v7951_v15 = vpop.f32.mrb[135].mxu0 }
 0x56b   : > { %8099 = vst [vmem:[%s12532_s20 + $0x28] sm:$0xff] %v7948_v18  ;;  %v7952_v10 = vadd.f32 %v7951_v15, %v12528_v27 }
 0x56c   : > { %8100 = vst [vmem:[%s12532_s20 + $0x30] sm:$0xff] %v7950_v40 }
 0x56d   : > { %8101 = vst [vmem:[%s12532_s20 + $0x38] sm:$0xff] %v7952_v10 }
 0x56f   : > { %v7955_v62 = vpop.f32.mrb[136].mxu0 }
 0x570   : > { %v7956_v37 = vadd.f32 %v7955_v62, %v12525_v35  ;;  %v7957_v53 = vpop.f32.mrb[137].mxu0 }
 0x571   : > { %v7958_v60 = vadd.f32 %v7957_v53, %v12528_v27  ;;  %v7959_v41 = vpop.f32.mrb[138].mxu0 }
 0x572   : > { %8102 = vst [vmem:[%s12532_s20 + $0x40] sm:$0xff] %v7956_v37  ;;  %v7960_v56 = vadd.f32 %v7959_v41, %v12525_v35  ;;  %v7961_v25 = vpop.f32.mrb[139].mxu0 }
 0x573   : > { %8103 = vst [vmem:[%s12532_s20 + $0x48] sm:$0xff] %v7958_v60  ;;  %v7962_v5 = vadd.f32 %v7961_v25, %v12528_v27 }
 0x574   : > { %8104 = vst [vmem:[%s12532_s20 + $0x50] sm:$0xff] %v7960_v56 }
 0x575   : > { %8105 = vst [vmem:[%s12532_s20 + $0x58] sm:$0xff] %v7962_v5 }
 0x577   : > { %v7965_v54 = vpop.f32.mrb[140].mxu0 }
 0x578   : > { %v7966_v30 = vadd.f32 %v7965_v54, %v12525_v35  ;;  %v7967_v47 = vpop.f32.mrb[141].mxu0 }
 0x579   : > { %v7968_v55 = vadd.f32 %v7967_v47, %v12528_v27  ;;  %v7969_v58 = vpop.f32.mrb[142].mxu0 }
 0x57a   : > { %8106 = vst [vmem:[%s12532_s20 + $0x60] sm:$0xff] %v7966_v30  ;;  %v7970_v19 = vadd.f32 %v7969_v58, %v12525_v35  ;;  %v7971_v49 = vpop.f32.mrb[143].mxu0 }
 0x57b   : > { %8107 = vst [vmem:[%s12532_s20 + $0x68] sm:$0xff] %v7968_v55  ;;  %v7972_v16 = vadd.f32 %v7971_v49, %v12528_v27 }
 0x57c   : > { %8108 = vst [vmem:[%s12532_s20 + $0x70] sm:$0xff] %v7970_v19 }
 0x57d   : > { %8109 = vst [vmem:[%s12532_s20 + $0x78] sm:$0xff] %v7972_v16 }
 0x57f   : > { %v7975_v52 = vpop.f32.mrb[144].mxu0 }
 0x580   : > { %v7976_v21 = vadd.f32 %v7975_v52, %v12525_v35  ;;  %v7977_v31 = vpop.f32.mrb[145].mxu0 }
 0x581   : > { %v7978_v14 = vadd.f32 %v7977_v31, %v12528_v27  ;;  %v7979_v12 = vpop.f32.mrb[146].mxu0 }
 0x582   : > { %8110 = vst [vmem:[%s12532_s20 + $0x80] sm:$0xff] %v7976_v21  ;;  %v7980_v42 = vadd.f32 %v7979_v12, %v12525_v35  ;;  %v7981_v32 = vpop.f32.mrb[147].mxu0 }
 0x583   : > { %8111 = vst [vmem:[%s12532_s20 + $0x88] sm:$0xff] %v7978_v14  ;;  %v7982_v63 = vadd.f32 %v7981_v32, %v12528_v27 }
 0x584   : > { %8112 = vst [vmem:[%s12532_s20 + $0x90] sm:$0xff] %v7980_v42 }
 0x585   : > { %8113 = vst [vmem:[%s12532_s20 + $0x98] sm:$0xff] %v7982_v63 }
 0x587   : > { %v7985_v20 = vpop.f32.mrb[148].mxu0 }
 0x588   : > { %v7986_v59 = vadd.f32 %v7985_v20, %v12525_v35  ;;  %v7987_v50 = vpop.f32.mrb[149].mxu0 }
 0x589   : > { %v7988_v3 = vadd.f32 %v7987_v50, %v12528_v27  ;;  %v7989_v48 = vpop.f32.mrb[150].mxu0 }
 0x58a   : > { %8114 = vst [vmem:[%s12532_s20 + $0xa0] sm:$0xff] %v7986_v59  ;;  %v7990_v39 = vadd.f32 %v7989_v48, %v12525_v35  ;;  %v7991_v8 = vpop.f32.mrb[151].mxu0 }
 0x58b   : > { %8115 = vst [vmem:[%s12532_s20 + $0xa8] sm:$0xff] %v7988_v3  ;;  %v7992_v57 = vadd.f32 %v7991_v8, %v12528_v27 }
 0x58c   : > { %8116 = vst [vmem:[%s12532_s20 + $0xb0] sm:$0xff] %v7990_v39 }
 0x58d   : > { %8117 = vst [vmem:[%s12532_s20 + $0xb8] sm:$0xff] %v7992_v57 }
 0x58f   : > { %v7995_v28 = vpop.f32.mrb[152].mxu0 }
 0x590   : > { %v7996_v29 = vadd.f32 %v7995_v28, %v12525_v35  ;;  %v7997_v4 = vpop.f32.mrb[153].mxu0 }
 0x591   : > { %v7998_v45 = vadd.f32 %v7997_v4, %v12528_v27  ;;  %v7999_v6 = vpop.f32.mrb[154].mxu0 }
 0x592   : > { %8118 = vst [vmem:[%s12532_s20 + $0xc0] sm:$0xff] %v7996_v29  ;;  %v8000_v38 = vadd.f32 %v7999_v6, %v12525_v35  ;;  %v8001_v44 = vpop.f32.mrb[155].mxu0 }
 0x593   : > { %8119 = vst [vmem:[%s12532_s20 + $0xc8] sm:$0xff] %v7998_v45  ;;  %v8002_v22 = vadd.f32 %v8001_v44, %v12528_v27 }
 0x594   : > { %8120 = vst [vmem:[%s12532_s20 + $0xd0] sm:$0xff] %v8000_v38 }
 0x595   : > { %8121 = vst [vmem:[%s12532_s20 + $0xd8] sm:$0xff] %v8002_v22 }
 0x597   : > { %v8005_v9 = vpop.f32.mrb[156].mxu0 }
 0x598   : > { %v8006_v51 = vadd.f32 %v8005_v9, %v12525_v35  ;;  %v8007_v43 = vpop.f32.mrb[157].mxu0 }
 0x599   : > { %v8008_v23 = vadd.f32 %v8007_v43, %v12528_v27  ;;  %v8009_v7 = vpop.f32.mrb[158].mxu0 }
 0x59a   : > { %8122 = vst [vmem:[%s12532_s20 + $0xe0] sm:$0xff] %v8006_v51  ;;  %v8010_v2 = vadd.f32 %v8009_v7, %v12525_v35  ;;  %v8011_v17 = vpop.f32.mrb[159].mxu0 }
 0x59b   : > { %8123 = vst [vmem:[%s12532_s20 + $0xe8] sm:$0xff] %v8008_v23  ;;  %v8012_v34 = vadd.f32 %v8011_v17, %v12528_v27 }
 0x59c   : > { %8124 = vst [vmem:[%s12532_s20 + $0xf0] sm:$0xff] %v8010_v2 }
 0x59d   : > { %8125 = vst [vmem:[%s12532_s20 + $0xf8] sm:$0xff] %v8012_v34 }
 0x59f   : > { %v8015_v1 = vpop.f32.mrb[160].mxu0 }
 0x5a0   : > { %v8016_v11 = vadd.f32 %v8015_v1, %v12525_v35  ;;  %v8017_v61 = vpop.f32.mrb[161].mxu0 }
 0x5a1   : > { %v8018_v0 = vadd.f32 %v8017_v61, %v12528_v27  ;;  %v8019_v13 = vpop.f32.mrb[162].mxu0 }
 0x5a2   : > { %8126 = vst [vmem:[%s12532_s20 + $0x100] sm:$0xff] %v8016_v11  ;;  %v8020_v46 = vadd.f32 %v8019_v13, %v12525_v35  ;;  %v8021_v33 = vpop.f32.mrb[163].mxu0 }
 0x5a3   : > { %8127 = vst [vmem:[%s12532_s20 + $0x108] sm:$0xff] %v8018_v0  ;;  %v8022_v26 = vadd.f32 %v8021_v33, %v12528_v27 }
 0x5a4   : > { %8128 = vst [vmem:[%s12532_s20 + $0x110] sm:$0xff] %v8020_v46 }
 0x5a5   : > { %8129 = vst [vmem:[%s12532_s20 + $0x118] sm:$0xff] %v8022_v26 }
 0x5a7   : > { %v8025_v36 = vpop.f32.mrb[164].mxu0 }
 0x5a8   : > { %v8026_v18 = vadd.f32 %v8025_v36, %v12525_v35  ;;  %v8027_v24 = vpop.f32.mrb[165].mxu0 }
 0x5a9   : > { %v8028_v40 = vadd.f32 %v8027_v24, %v12528_v27  ;;  %v8029_v15 = vpop.f32.mrb[166].mxu0 }
 0x5aa   : > { %8130 = vst [vmem:[%s12532_s20 + $0x120] sm:$0xff] %v8026_v18  ;;  %v8030_v10 = vadd.f32 %v8029_v15, %v12525_v35  ;;  %v8031_v62 = vpop.f32.mrb[167].mxu0 }
 0x5ab   : > { %8131 = vst [vmem:[%s12532_s20 + $0x128] sm:$0xff] %v8028_v40  ;;  %v8032_v37 = vadd.f32 %v8031_v62, %v12528_v27 }
 0x5ac   : > { %8132 = vst [vmem:[%s12532_s20 + $0x130] sm:$0xff] %v8030_v10 }
 0x5ad   : > { %8133 = vst [vmem:[%s12532_s20 + $0x138] sm:$0xff] %v8032_v37 }
 0x5af   : > { %v8035_v53 = vpop.f32.mrb[168].mxu0 }
 0x5b0   : > { %v8036_v60 = vadd.f32 %v8035_v53, %v12525_v35  ;;  %v8037_v41 = vpop.f32.mrb[169].mxu0 }
 0x5b1   : > { %v8038_v56 = vadd.f32 %v8037_v41, %v12528_v27  ;;  %v8039_v25 = vpop.f32.mrb[170].mxu0 }
 0x5b2   : > { %8134 = vst [vmem:[%s12532_s20 + $0x140] sm:$0xff] %v8036_v60  ;;  %v8040_v5 = vadd.f32 %v8039_v25, %v12525_v35  ;;  %v8041_v54 = vpop.f32.mrb[171].mxu0 }
 0x5b3   : > { %8135 = vst [vmem:[%s12532_s20 + $0x148] sm:$0xff] %v8038_v56  ;;  %v8042_v30 = vadd.f32 %v8041_v54, %v12528_v27 }
 0x5b4   : > { %8136 = vst [vmem:[%s12532_s20 + $0x150] sm:$0xff] %v8040_v5 }
 0x5b5   : > { %8137 = vst [vmem:[%s12532_s20 + $0x158] sm:$0xff] %v8042_v30 }
 0x5b7   : > { %v8045_v47 = vpop.f32.mrb[172].mxu0 }
 0x5b8   : > { %v8046_v55 = vadd.f32 %v8045_v47, %v12525_v35  ;;  %v8047_v58 = vpop.f32.mrb[173].mxu0 }
 0x5b9   : > { %v8048_v19 = vadd.f32 %v8047_v58, %v12528_v27  ;;  %v8049_v49 = vpop.f32.mrb[174].mxu0 }
 0x5ba   : > { %8138 = vst [vmem:[%s12532_s20 + $0x160] sm:$0xff] %v8046_v55  ;;  %v8050_v16 = vadd.f32 %v8049_v49, %v12525_v35  ;;  %v8051_v52 = vpop.f32.mrb[175].mxu0 }
 0x5bb   : > { %8139 = vst [vmem:[%s12532_s20 + $0x168] sm:$0xff] %v8048_v19  ;;  %v8052_v21 = vadd.f32 %v8051_v52, %v12528_v27 }
 0x5bc   : > { %8140 = vst [vmem:[%s12532_s20 + $0x170] sm:$0xff] %v8050_v16 }
 0x5bd   : > { %8141 = vst [vmem:[%s12532_s20 + $0x178] sm:$0xff] %v8052_v21 }
 0x5bf   : > { %v8055_v31 = vpop.f32.mrb[176].mxu0 }
 0x5c0   : > { %v8056_v14 = vadd.f32 %v8055_v31, %v12525_v35  ;;  %v8057_v12 = vpop.f32.mrb[177].mxu0 }
 0x5c1   : > { %v8058_v42 = vadd.f32 %v8057_v12, %v12528_v27  ;;  %v8059_v32 = vpop.f32.mrb[178].mxu0 }
 0x5c2   : > { %8142 = vst [vmem:[%s12532_s20 + $0x180] sm:$0xff] %v8056_v14  ;;  %v8060_v63 = vadd.f32 %v8059_v32, %v12525_v35  ;;  %v8061_v20 = vpop.f32.mrb[179].mxu0 }
 0x5c3   : > { %8143 = vst [vmem:[%s12532_s20 + $0x188] sm:$0xff] %v8058_v42  ;;  %v8062_v59 = vadd.f32 %v8061_v20, %v12528_v27 }
 0x5c4   : > { %8144 = vst [vmem:[%s12532_s20 + $0x190] sm:$0xff] %v8060_v63 }
 0x5c5   : > { %8145 = vst [vmem:[%s12532_s20 + $0x198] sm:$0xff] %v8062_v59 }
 0x5c7   : > { %v8065_v50 = vpop.f32.mrb[180].mxu0 }
 0x5c8   : > { %v8066_v3 = vadd.f32 %v8065_v50, %v12525_v35  ;;  %v8067_v48 = vpop.f32.mrb[181].mxu0 }
 0x5c9   : > { %v8068_v39 = vadd.f32 %v8067_v48, %v12528_v27  ;;  %v8069_v8 = vpop.f32.mrb[182].mxu0 }
 0x5ca   : > { %8146 = vst [vmem:[%s12532_s20 + $0x1a0] sm:$0xff] %v8066_v3  ;;  %v8070_v57 = vadd.f32 %v8069_v8, %v12525_v35  ;;  %v8071_v28 = vpop.f32.mrb[183].mxu0 }
 0x5cb   : > { %8147 = vst [vmem:[%s12532_s20 + $0x1a8] sm:$0xff] %v8068_v39  ;;  %v8072_v29 = vadd.f32 %v8071_v28, %v12528_v27 }
 0x5cc   : > { %8148 = vst [vmem:[%s12532_s20 + $0x1b0] sm:$0xff] %v8070_v57 }
 0x5cd   : > { %8149 = vst [vmem:[%s12532_s20 + $0x1b8] sm:$0xff] %v8072_v29 }
 0x5cf   : > { %v8075_v4 = vpop.f32.mrb[184].mxu0 }
 0x5d0   : > { %v8076_v45 = vadd.f32 %v8075_v4, %v12525_v35  ;;  %v8077_v6 = vpop.f32.mrb[185].mxu0 }
 0x5d1   : > { %v8078_v38 = vadd.f32 %v8077_v6, %v12528_v27  ;;  %v8079_v44 = vpop.f32.mrb[186].mxu0 }
 0x5d2   : > { %8150 = vst [vmem:[%s12532_s20 + $0x1c0] sm:$0xff] %v8076_v45  ;;  %v8080_v22 = vadd.f32 %v8079_v44, %v12525_v35  ;;  %v8081_v9 = vpop.f32.mrb[187].mxu0 }
 0x5d3   : > { %8151 = vst [vmem:[%s12532_s20 + $0x1c8] sm:$0xff] %v8078_v38  ;;  %v8082_v51 = vadd.f32 %v8081_v9, %v12528_v27 }
 0x5d4   : > { %8152 = vst [vmem:[%s12532_s20 + $0x1d0] sm:$0xff] %v8080_v22 }
 0x5d5   : > { %8153 = vst [vmem:[%s12532_s20 + $0x1d8] sm:$0xff] %v8082_v51 }
 0x5d7   : > { %v8085_v43 = vpop.f32.mrb[188].mxu0 }
 0x5d8   : > { %v8086_v23 = vadd.f32 %v8085_v43, %v12525_v35  ;;  %v8087_v7 = vpop.f32.mrb[189].mxu0 }
 0x5d9   : > { %v8088_v2 = vadd.f32 %v8087_v7, %v12528_v27  ;;  %v8089_v17 = vpop.f32.mrb[190].mxu0 }
 0x5da   : > { %8154 = vst [vmem:[%s12532_s20 + $0x1e0] sm:$0xff] %v8086_v23  ;;  %v8090_v34 = vadd.f32 %v8089_v17, %v12525_v35  ;;  %v8091_v1 = vpop.f32.mrb[191].mxu0 }
 0x5db   : > { %8155 = vst [vmem:[%s12532_s20 + $0x1e8] sm:$0xff] %v8088_v2  ;;  %v8092_v11 = vadd.f32 %v8091_v1, %v12528_v27 }
 0x5dc   : > { %8156 = vst [vmem:[%s12532_s20 + $0x1f0] sm:$0xff] %v8090_v34 }
 0x5dd   : > { %8157 = vst [vmem:[%s12532_s20 + $0x1f8] sm:$0xff] %v8092_v11 }
 0x5de   : > { %10112 = shalt.err (!%p10109_p3)
}
 0x5df   : > { %s10113_s16 = scalar_lea.hbm %s12661_s29, 8192  ;;  %s10117_s19 = scalar_lea.hbm %s12719_s7, 16384 }
 0x5e0   : > { %p10114_p4 = scmp.ne.s32.totalorder %s12661_s29, %s10113_s16  ;;  %p10118_p9 = scmp.lt.u32.totalorder %s12661_s29, %s12719_s7 }
 0x5e1   : > { %p10119_p10 = scmp.lt.u32.totalorder %s10117_s19, %s10113_s16  ;;  %p10121_p12 = scmp.lt.u32.totalorder %s10113_s16, %s12661_s29 }
 0x5e2   : > { %p10115_p7 = pnand %p10114_p4, %p10245_p5 }
 0x5e3   : > { %p10120_p11 = por %p10119_p10, %p10118_p9 }
 0x5e4   : > { %p10116_p8 = pneg %p10115_p7 }
 0x5e5   : > { %p10122_p13 = por %p10121_p12, %p10120_p11 }
 0x5e7   : > { %p10123_p0 = pnand %p10122_p13, %p10116_p8 }
 0x5e9   : > { %10126 = shalt.err (!%p10123_p0)
}
 0x5ea   : > { %s10165_s23 = smov 256   ;;  %s10166_s13 = smov 16  }
 0x5eb   : > { %9432 = dma.vmem_to_hbm [thread:$0]  (%p10245_p5), %s12663_s22, 8192, %s12661_s29, %s12671_s28, %s10165_s23, %s10165_s23, %s10166_s13  }
 0x5ec PF: > { %p9438_p1 = scmp.ge.s32.totalorder %s10161_s27, 2  ;;  %s8187_s8 = sand.u32 1, %s10149_s24  }
 0x5ed   : > { %s8188_s9 = scalar_lea.sflag [#allocation6], %s8187_s8 }
 0x5ee   : > { %p9435_p2 = pnand %p9438_p1, %p10249_p6 }
 0x5f0   : > { %10144 = dma.done.wait (!%p9435_p2), %s8188_s9, 8192  }
 0x5f1   : > { %10146 = vsyncadd (!%p9435_p2), %s8188_s9, 4294959104  ;;  %p17_p3 = scmp.ge.s32.totalorder %s10232_s30, 4   ;;  %s12806_s24 = smov %s10153_s25 }
 0x5f2   : > { %s12807_s25 = smov %s10157_s26  ;;  %s12808_s26 = smov %s10243_s10 }
 0x5f3   : > { %s12809_s27 = smov %s10232_s30  ;;  %19 = sbr.rel (!%p17_p3) target bundleno = 3 (0x3), region = 93 }
 0x5fa   :  { %8193 = vsyncpa [#allocation6], 1 }
 0x5fb   :  { %8195 = vsyncpa [#allocation6 + $0x1], 1 }

</bundles_post_ra>
